<compile_context>
chip_gen: v7x
topology: tpu7x:2x2x1
jax: 0.10.0
libtpu: 0.0.40
codegen_flags: <defaults>
</compile_context>

<pallas_src>
import functools

import jax
import jax.numpy as jnp
from jax.experimental import pallas as pl
from jax.experimental.pallas import tpu as pltpu


# ------------------------------- fused kernel -------------------------------

def _t_net_kernel(x_ref, m_ref, w1, b1, w2, b2, w3, b3, w4, b4,
                  o_ref, pad_ref, im_ref, *, H, W, ngf, t_clamp, w_prior):
    HW = H * W
    DOFF = 2 * W + 2               # data offset inside the flat padded scratch

    # Re-zero only the thin border strips (2W+2 columns on each side); the
    # interior is fully rewritten before every read.  Doing this per step is
    # tiny and keeps the kernel correct when the grid is split across cores.
    zero_strip = jnp.zeros((pad_ref.shape[0], DOFF), pad_ref.dtype)
    pad_ref[:, 0:DOFF] = zero_strip
    pad_ref[:, DOFF + HW:DOFF + HW + DOFF] = zero_strip

    # Precomputed masks: [ones, ox=-1, ox=+1, ox=-2, ox=+2, x_even, y_even, 0]
    mb = m_ref[...]                                         # (8, HW) bf16
    col_mask = {-1: mb[1:2, :], 1: mb[2:3, :], -2: mb[3:4, :], 2: mb[4:5, :]}
    x_even = mb[5:6, :] > 0.5
    y_even = mb[6:7, :] > 0.5

    def write_pad(val, row0=0):
        """Write a (cin, HW) value into the flat padded scratch interior."""
        cin = val.shape[0]
        pad_ref[row0:row0 + cin, DOFF:DOFF + HW] = val.astype(jnp.bfloat16)

    def shifted(cin, off):
        """(cin, HW) bf16 view of the interior shifted by `off` flat pixels."""
        return pad_ref[0:cin, DOFF + off:DOFF + off + HW]

    def conv3x3(cin, w_ref_, b_ref_, *, dil, relu):
        """3x3 'same' conv (dilation `dil`) on data currently in pad rows 0:cin.

        Builds bf16 im2col patches (9*cin, HW) with lane-dense tap stores,
        then runs one wide-K MXU matmul with f32 accumulation.
        """
        for ky in range(3):
            for kx in range(3):
                tap = ky * 3 + kx
                oy, ox = (ky - 1) * dil, (kx - 1) * dil
                sl = shifted(cin, oy * W + ox)              # (cin, HW) bf16
                if ox != 0:
                    sl = sl * col_mask[ox]                  # kill row wrap-around
                im_ref[tap * cin:(tap + 1) * cin, :] = sl
        y = jnp.dot(w_ref_[...], im_ref[0:9 * cin, :],
                    preferred_element_type=jnp.float32) + b_ref_[...]
        return jnp.maximum(y, 0.0) if relu else y

    # ------------- U-Net stand-in (channel-major, HW on lanes) --------------
    t_row = x_ref[0, 4:5, :]                                # (1, HW) f32

    write_pad(t_row)
    e1 = conv3x3(1, w1, b1, dil=1, relu=True)               # (ngf, HW)

    # 2x2 mean-pool fused with nearest 2x upsample: every pixel holds the mean
    # of its 2x2 block (parity-selected shifted adds, O(C*HW)).
    write_pad(e1)
    sx = (shifted(ngf, 0).astype(jnp.float32)
          + jnp.where(x_even, shifted(ngf, 1), shifted(ngf, -1)).astype(jnp.float32))
    write_pad(sx)
    pf = 0.25 * (shifted(ngf, 0).astype(jnp.float32)
                 + jnp.where(y_even, shifted(ngf, W), shifted(ngf, -W)).astype(jnp.float32))

    # enc2 at the coarse scale == dilation-2 conv on the block-constant map;
    # its output equals upsample(relu(conv(pool(e1)))) at every fine pixel.
    write_pad(pf)
    u1 = conv3x3(ngf, w2, b2, dil=2, relu=True)             # (2*ngf, HW)

    # Skip "concat": stack u1 and e1 on the channel (sublane) axis of the pad.
    write_pad(u1, 0)
    write_pad(e1, 2 * ngf)
    d1 = conv3x3(3 * ngf, w3, b3, dil=1, relu=True)         # (ngf, HW)

    write_pad(d1)
    t_prior = conv3x3(ngf, w4, b4, dil=1, relu=False)       # (1, HW), lane-dense

    # --------------- fused dehaze t-update (lane-dense (1, HW) rows) --------
    A = x_ref[0, 3:4, :]
    t = x_ref[0, 4:5, :]
    tc = jnp.maximum(t, t_clamp)                 # torch.clamp(t, min=t_clamp)
    inv = pl.reciprocal(tc, approx=False)        # one reciprocal, no divides
    sf = jnp.zeros_like(t)
    sg = jnp.zeros_like(t)
    for c in range(3):                           # explicit 3-channel mean
        Ic = x_ref[0, c:c + 1, :]
        Jc = x_ref[0, 5 + c:6 + c, :]
        sf = sf + (Jc * t + A * (1.0 - t) - Ic) * (Jc - A)
        r = (Ic - A) * inv
        sg = sg + (r + A - Jc) * (-(r * inv))
    o_ref[0] = t - w_prior * ((sf + sg) * (1.0 / 3.0) + t_prior)


# ------------------------------- JAX wrappers --------------------------------

def _make_masks(H, W):
    """(8, HW) bf16 masks: ones, ox=-1, ox=+1, ox=-2, ox=+2, x_even, y_even, 0."""
    HW = H * W
    xi = jnp.arange(HW, dtype=jnp.int32) % W
    yi = jnp.arange(HW, dtype=jnp.int32) // W
    rows = [
        jnp.ones((HW,), jnp.float32),
        (xi >= 1).astype(jnp.float32),
        (xi <= W - 2).astype(jnp.float32),
        (xi >= 2).astype(jnp.float32),
        (xi <= W - 3).astype(jnp.float32),
        (xi % 2 == 0).astype(jnp.float32),
        (yi % 2 == 0).astype(jnp.float32),
        jnp.zeros((HW,), jnp.float32),
    ]
    return jnp.stack(rows, axis=0).astype(jnp.bfloat16)


def init_t_net_params(key, ngf):
    def conv_p(k, cin, cout):
        kw, kb = jax.random.split(k)
        w = jax.random.normal(kw, (cout, 3, 3, cin), jnp.float32) * 0.08
        w = w.reshape(cout, 9 * cin).astype(jnp.bfloat16)   # (cout, 9*cin) bf16
        b = jax.random.normal(kb, (cout, 1), jnp.float32) * 0.02
        return w, b

    ks = jax.random.split(key, 4)
    return {
        "enc1": conv_p(ks[0], 1, ngf),
        "enc2": conv_p(ks[1], ngf, 2 * ngf),
        "dec1": conv_p(ks[2], 3 * ngf, ngf),
        "out": conv_p(ks[3], ngf, 1),
    }


def t_net_forward(params, I_A_t_J, *, t_clamp, weight_t_prior):
    N, C, H, W = I_A_t_J.shape
    assert C == 8 and H % 2 == 0 and W % 2 == 0 and H >= 4 and W >= 4
    HW = H * W
    ngf = params["enc1"][0].shape[0]

    # Layout plumbing only — a single fused kernel does all the compute.
    x_rows = I_A_t_J.reshape(N, 8, HW)                      # lane-dense rows
    masks = _make_masks(H, W)

    w1, b1 = params["enc1"]
    w2, b2 = params["enc2"]
    w3, b3 = params["dec1"]
    w4, b4 = params["out"]

    kern = functools.partial(_t_net_kernel, H=H, W=W, ngf=ngf,
                             t_clamp=t_clamp, w_prior=weight_t_prior)
    fixed = lambda n: (0, 0)

    out = pl.pallas_call(
        kern,
        out_shape=jax.ShapeDtypeStruct((N, 1, HW), jnp.float32),
        grid=(N,),
        in_specs=[
            pl.BlockSpec((1, 8, HW), lambda n: (n, 0, 0)),      # I_A_t_J rows
            pl.BlockSpec(masks.shape, fixed),                   # column/parity masks
            pl.BlockSpec(w1.shape, fixed), pl.BlockSpec(b1.shape, fixed),
            pl.BlockSpec(w2.shape, fixed), pl.BlockSpec(b2.shape, fixed),
            pl.BlockSpec(w3.shape, fixed), pl.BlockSpec(b3.shape, fixed),
            pl.BlockSpec(w4.shape, fixed), pl.BlockSpec(b4.shape, fixed),
        ],
        out_specs=pl.BlockSpec((1, 1, HW), lambda n: (n, 0, 0)),
        scratch_shapes=[
            pltpu.VMEM((3 * ngf, HW + 4 * W + 4), jnp.bfloat16),  # flat padded acts
            pltpu.VMEM((27 * ngf, HW), jnp.bfloat16),             # bf16 im2col patches
        ],
        compiler_params=pltpu.CompilerParams(
            dimension_semantics=("parallel",),
            vmem_limit_bytes=64 * 1024 * 1024),
    )(x_rows, masks, w1, b1, w2, b2, w3, b3, w4, b4)

    return out.reshape(N, 1, H, W)


# ----------------------------------- main ------------------------------------

if __name__ == "__main__":
    key = jax.random.PRNGKey(0)
    k_in, k_par = jax.random.split(key)

    # args: n_feats=8, t_clamp=0.05, weight_t_prior=0.1
    N, H, W, ngf = 2, 16, 16, 8
    t_clamp, weight_t_prior = 0.05, 0.1

    I_A_t_J = jax.random.uniform(k_in, (N, 8, H, W), jnp.float32, 0.05, 1.0)
    params = init_t_net_params(k_par, ngf)

    fwd = jax.jit(functools.partial(t_net_forward,
                                    t_clamp=t_clamp,
                                    weight_t_prior=weight_t_prior))
    out = fwd(params, I_A_t_J)
    jax.block_until_ready(out)
    assert out.shape == (N, 1, H, W) and out.dtype == jnp.float32
    assert bool(jnp.all(jnp.isfinite(out)))
    print("KERNEL_OK")
</pallas_src>

<mosaic_0001>
module attributes {stable_mosaic.version = 11 : i64} {
  func.func @_t_net_kernel(%arg0: i32, %arg1: memref<1x8x256xf32, #tpu.memory_space<vmem>>, %arg2: memref<8x256xbf16, #tpu.memory_space<vmem>>, %arg3: memref<8x9xbf16, #tpu.memory_space<vmem>>, %arg4: memref<8x1xf32, #tpu.memory_space<vmem>>, %arg5: memref<16x72xbf16, #tpu.memory_space<vmem>>, %arg6: memref<16x1xf32, #tpu.memory_space<vmem>>, %arg7: memref<8x216xbf16, #tpu.memory_space<vmem>>, %arg8: memref<8x1xf32, #tpu.memory_space<vmem>>, %arg9: memref<1x72xbf16, #tpu.memory_space<vmem>>, %arg10: memref<1x1xf32, #tpu.memory_space<vmem>>, %arg11: memref<1x1x256xf32, #tpu.memory_space<vmem>>, %arg12: memref<24x324xbf16, #tpu.memory_space<vmem>>, %arg13: memref<216x256xbf16, #tpu.memory_space<vmem>>) attributes {dimension_semantics = [#tpu.dimension_semantics<parallel>], iteration_bounds = array<i64: 2>, scalar_prefetch = 0 : i64, scratch_operands = 2 : i64, tpu.core_type = #tpu.core_type<tc>, window_params = [{transform_indices = @transform_0, window_bounds = array<i64: 1, 8, 256>}, {pipeline_mode = #tpu.pipeline_mode<synchronous>, transform_indices = @transform_1, window_bounds = array<i64: 8, 256>}, {pipeline_mode = #tpu.pipeline_mode<synchronous>, transform_indices = @transform_2, window_bounds = array<i64: 8, 9>}, {pipeline_mode = #tpu.pipeline_mode<synchronous>, transform_indices = @transform_3, window_bounds = array<i64: 8, 1>}, {pipeline_mode = #tpu.pipeline_mode<synchronous>, transform_indices = @transform_4, window_bounds = array<i64: 16, 72>}, {pipeline_mode = #tpu.pipeline_mode<synchronous>, transform_indices = @transform_5, window_bounds = array<i64: 16, 1>}, {pipeline_mode = #tpu.pipeline_mode<synchronous>, transform_indices = @transform_6, window_bounds = array<i64: 8, 216>}, {pipeline_mode = #tpu.pipeline_mode<synchronous>, transform_indices = @transform_7, window_bounds = array<i64: 8, 1>}, {pipeline_mode = #tpu.pipeline_mode<synchronous>, transform_indices = @transform_8, window_bounds = array<i64: 1, 72>}, {pipeline_mode = #tpu.pipeline_mode<synchronous>, transform_indices = @transform_9, window_bounds = array<i64: 1, 1>}, {transform_indices = @transform_10, window_bounds = array<i64: 1, 1, 256>}]} {
    %cst = arith.constant 0.000000e+00 : bf16
    %0 = vector.broadcast %cst : bf16 to vector<24x34xbf16>
    %c0 = arith.constant 0 : index
    %c0_0 = arith.constant 0 : index
    %1 = vector.load %arg12[%c0, %c0_0] : memref<24x324xbf16, #tpu.memory_space<vmem>>, vector<24x34xbf16>
    tpu.vector_store %arg12[%c0, %c0_0], %0 {strides = array<i32>} : memref<24x324xbf16, #tpu.memory_space<vmem>>, vector<24x34xbf16>,
    %c0_1 = arith.constant 0 : index
    %c290 = arith.constant 290 : index
    %2 = vector.load %arg12[%c0_1, %c290] : memref<24x324xbf16, #tpu.memory_space<vmem>>, vector<24x34xbf16>
    tpu.vector_store %arg12[%c0_1, %c290], %0 {strides = array<i32>} : memref<24x324xbf16, #tpu.memory_space<vmem>>, vector<24x34xbf16>,
    %c0_2 = arith.constant 0 : index
    %c0_3 = arith.constant 0 : index
    %3 = vector.load %arg2[%c0_2, %c0_3] : memref<8x256xbf16, #tpu.memory_space<vmem>>, vector<8x256xbf16>
    %4 = vector.extract_strided_slice %3 {offsets = [1, 0], sizes = [1, 256], strides = [1, 1]} : vector<8x256xbf16> to vector<1x256xbf16>
    %5 = vector.extract_strided_slice %3 {offsets = [2, 0], sizes = [1, 256], strides = [1, 1]} : vector<8x256xbf16> to vector<1x256xbf16>
    %6 = vector.extract_strided_slice %3 {offsets = [3, 0], sizes = [1, 256], strides = [1, 1]} : vector<8x256xbf16> to vector<1x256xbf16>
    %7 = vector.extract_strided_slice %3 {offsets = [4, 0], sizes = [1, 256], strides = [1, 1]} : vector<8x256xbf16> to vector<1x256xbf16>
    %8 = vector.extract_strided_slice %3 {offsets = [5, 0], sizes = [1, 256], strides = [1, 1]} : vector<8x256xbf16> to vector<1x256xbf16>
    %cst_4 = arith.constant 5.000000e-01 : bf16
    %9 = vector.broadcast %cst_4 : bf16 to vector<1x256xbf16>
    %10 = arith.cmpf ogt, %8, %9 : vector<1x256xbf16>
    %11 = vector.extract_strided_slice %3 {offsets = [6, 0], sizes = [1, 256], strides = [1, 1]} : vector<8x256xbf16> to vector<1x256xbf16>
    %cst_5 = arith.constant 5.000000e-01 : bf16
    %12 = vector.broadcast %cst_5 : bf16 to vector<1x256xbf16>
    %13 = arith.cmpf ogt, %11, %12 : vector<1x256xbf16>
    %c0_6 = arith.constant 0 : index
    %c4 = arith.constant 4 : index
    %c0_7 = arith.constant 0 : index
    %14 = vector.load %arg1[%c0_6, %c4, %c0_7] : memref<1x8x256xf32, #tpu.memory_space<vmem>>, vector<1x1x256xf32>
    %15 = vector.shape_cast %14 : vector<1x1x256xf32> to vector<1x256xf32>
    %16 = arith.truncf %15 : vector<1x256xf32> to vector<1x256xbf16>
    %c0_8 = arith.constant 0 : index
    %c34 = arith.constant 34 : index
    %17 = vector.load %arg12[%c0_8, %c34] : memref<24x324xbf16, #tpu.memory_space<vmem>>, vector<1x256xbf16>
    tpu.vector_store %arg12[%c0_8, %c34], %16 {strides = array<i32>} : memref<24x324xbf16, #tpu.memory_space<vmem>>, vector<1x256xbf16>,
    %c0_9 = arith.constant 0 : index
    %c17 = arith.constant 17 : index
    %18 = vector.load %arg12[%c0_9, %c17] : memref<24x324xbf16, #tpu.memory_space<vmem>>, vector<1x256xbf16>
    %19 = arith.mulf %18, %4 : vector<1x256xbf16>
    %c0_10 = arith.constant 0 : index
    %c0_11 = arith.constant 0 : index
    %20 = vector.load %arg13[%c0_10, %c0_11] : memref<216x256xbf16, #tpu.memory_space<vmem>>, vector<1x256xbf16>
    tpu.vector_store %arg13[%c0_10, %c0_11], %19 {strides = array<i32>} : memref<216x256xbf16, #tpu.memory_space<vmem>>, vector<1x256xbf16>,
    %c0_12 = arith.constant 0 : index
    %c18 = arith.constant 18 : index
    %21 = vector.load %arg12[%c0_12, %c18] : memref<24x324xbf16, #tpu.memory_space<vmem>>, vector<1x256xbf16>
    %c1 = arith.constant 1 : index
    %c0_13 = arith.constant 0 : index
    %22 = vector.load %arg13[%c1, %c0_13] : memref<216x256xbf16, #tpu.memory_space<vmem>>, vector<1x256xbf16>
    tpu.vector_store %arg13[%c1, %c0_13], %21 {strides = array<i32>} : memref<216x256xbf16, #tpu.memory_space<vmem>>, vector<1x256xbf16>,
    %c0_14 = arith.constant 0 : index
    %c19 = arith.constant 19 : index
    %23 = vector.load %arg12[%c0_14, %c19] : memref<24x324xbf16, #tpu.memory_space<vmem>>, vector<1x256xbf16>
    %24 = arith.mulf %23, %5 : vector<1x256xbf16>
    %c2 = arith.constant 2 : index
    %c0_15 = arith.constant 0 : index
    %25 = vector.load %arg13[%c2, %c0_15] : memref<216x256xbf16, #tpu.memory_space<vmem>>, vector<1x256xbf16>
    tpu.vector_store %arg13[%c2, %c0_15], %24 {strides = array<i32>} : memref<216x256xbf16, #tpu.memory_space<vmem>>, vector<1x256xbf16>,
    %c0_16 = arith.constant 0 : index
    %c33 = arith.constant 33 : index
    %26 = vector.load %arg12[%c0_16, %c33] : memref<24x324xbf16, #tpu.memory_space<vmem>>, vector<1x256xbf16>
    %27 = arith.mulf %26, %4 : vector<1x256xbf16>
    %c3 = arith.constant 3 : index
    %c0_17 = arith.constant 0 : index
    %28 = vector.load %arg13[%c3, %c0_17] : memref<216x256xbf16, #tpu.memory_space<vmem>>, vector<1x256xbf16>
    tpu.vector_store %arg13[%c3, %c0_17], %27 {strides = array<i32>} : memref<216x256xbf16, #tpu.memory_space<vmem>>, vector<1x256xbf16>,
    %c0_18 = arith.constant 0 : index
    %c34_19 = arith.constant 34 : index
    %29 = vector.load %arg12[%c0_18, %c34_19] : memref<24x324xbf16, #tpu.memory_space<vmem>>, vector<1x256xbf16>
    %c4_20 = arith.constant 4 : index
    %c0_21 = arith.constant 0 : index
    %30 = vector.load %arg13[%c4_20, %c0_21] : memref<216x256xbf16, #tpu.memory_space<vmem>>, vector<1x256xbf16>
    tpu.vector_store %arg13[%c4_20, %c0_21], %29 {strides = array<i32>} : memref<216x256xbf16, #tpu.memory_space<vmem>>, vector<1x256xbf16>,
    %c0_22 = arith.constant 0 : index
    %c35 = arith.constant 35 : index
    %31 = vector.load %arg12[%c0_22, %c35] : memref<24x324xbf16, #tpu.memory_space<vmem>>, vector<1x256xbf16>
    %32 = arith.mulf %31, %5 : vector<1x256xbf16>
    %c5 = arith.constant 5 : index
    %c0_23 = arith.constant 0 : index
    %33 = vector.load %arg13[%c5, %c0_23] : memref<216x256xbf16, #tpu.memory_space<vmem>>, vector<1x256xbf16>
    tpu.vector_store %arg13[%c5, %c0_23], %32 {strides = array<i32>} : memref<216x256xbf16, #tpu.memory_space<vmem>>, vector<1x256xbf16>,
    %c0_24 = arith.constant 0 : index
    %c49 = arith.constant 49 : index
    %34 = vector.load %arg12[%c0_24, %c49] : memref<24x324xbf16, #tpu.memory_space<vmem>>, vector<1x256xbf16>
    %35 = arith.mulf %34, %4 : vector<1x256xbf16>
    %c6 = arith.constant 6 : index
    %c0_25 = arith.constant 0 : index
    %36 = vector.load %arg13[%c6, %c0_25] : memref<216x256xbf16, #tpu.memory_space<vmem>>, vector<1x256xbf16>
    tpu.vector_store %arg13[%c6, %c0_25], %35 {strides = array<i32>} : memref<216x256xbf16, #tpu.memory_space<vmem>>, vector<1x256xbf16>,
    %c0_26 = arith.constant 0 : index
    %c50 = arith.constant 50 : index
    %37 = vector.load %arg12[%c0_26, %c50] : memref<24x324xbf16, #tpu.memory_space<vmem>>, vector<1x256xbf16>
    %c7 = arith.constant 7 : index
    %c0_27 = arith.constant 0 : index
    %38 = vector.load %arg13[%c7, %c0_27] : memref<216x256xbf16, #tpu.memory_space<vmem>>, vector<1x256xbf16>
    tpu.vector_store %arg13[%c7, %c0_27], %37 {strides = array<i32>} : memref<216x256xbf16, #tpu.memory_space<vmem>>, vector<1x256xbf16>,
    %c0_28 = arith.constant 0 : index
    %c51 = arith.constant 51 : index
    %39 = vector.load %arg12[%c0_28, %c51] : memref<24x324xbf16, #tpu.memory_space<vmem>>, vector<1x256xbf16>
    %40 = arith.mulf %39, %5 : vector<1x256xbf16>
    %c8 = arith.constant 8 : index
    %c0_29 = arith.constant 0 : index
    %41 = vector.load %arg13[%c8, %c0_29] : memref<216x256xbf16, #tpu.memory_space<vmem>>, vector<1x256xbf16>
    tpu.vector_store %arg13[%c8, %c0_29], %40 {strides = array<i32>} : memref<216x256xbf16, #tpu.memory_space<vmem>>, vector<1x256xbf16>,
    %c0_30 = arith.constant 0 : index
    %c0_31 = arith.constant 0 : index
    %42 = vector.load %arg3[%c0_30, %c0_31] : memref<8x9xbf16, #tpu.memory_space<vmem>>, vector<8x9xbf16>
    %c0_32 = arith.constant 0 : index
    %c0_33 = arith.constant 0 : index
    %43 = vector.load %arg13[%c0_32, %c0_33] : memref<216x256xbf16, #tpu.memory_space<vmem>>, vector<9x256xbf16>
    %cst_34 = arith.constant dense<0.000000e+00> : vector<8x256xf32>
    %44 = tpu.matmul %42, %43, %cst_34 {dimension_numbers = #tpu.dot_dimension_numbers<[1], [0], [0], [1], [0, 0, 1, 1], [], []>} : vector<8x9xbf16>, vector<9x256xbf16>, vector<8x256xf32> -> vector<8x256xf32>
    %c0_35 = arith.constant 0 : index
    %c0_36 = arith.constant 0 : index
    %45 = vector.load %arg4[%c0_35, %c0_36] : memref<8x1xf32, #tpu.memory_space<vmem>>, vector<8x1xf32>
    %46 = vector.broadcast %45 : vector<8x1xf32> to vector<8x256xf32>
    %47 = arith.addf %44, %46 : vector<8x256xf32>
    %cst_37 = arith.constant 0.000000e+00 : f32
    %48 = vector.broadcast %cst_37 : f32 to vector<8x256xf32>
    %49 = arith.maximumf %47, %48 : vector<8x256xf32>
    %50 = arith.truncf %49 : vector<8x256xf32> to vector<8x256xbf16>
    %c0_38 = arith.constant 0 : index
    %c34_39 = arith.constant 34 : index
    %51 = vector.load %arg12[%c0_38, %c34_39] : memref<24x324xbf16, #tpu.memory_space<vmem>>, vector<8x256xbf16>
    tpu.vector_store %arg12[%c0_38, %c34_39], %50 {strides = array<i32>} : memref<24x324xbf16, #tpu.memory_space<vmem>>, vector<8x256xbf16>,
    %c0_40 = arith.constant 0 : index
    %c34_41 = arith.constant 34 : index
    %52 = vector.load %arg12[%c0_40, %c34_41] : memref<24x324xbf16, #tpu.memory_space<vmem>>, vector<8x256xbf16>
    %53 = arith.extf %52 : vector<8x256xbf16> to vector<8x256xf32>
    %c0_42 = arith.constant 0 : index
    %c35_43 = arith.constant 35 : index
    %54 = vector.load %arg12[%c0_42, %c35_43] : memref<24x324xbf16, #tpu.memory_space<vmem>>, vector<8x256xbf16>
    %c0_44 = arith.constant 0 : index
    %c33_45 = arith.constant 33 : index
    %55 = vector.load %arg12[%c0_44, %c33_45] : memref<24x324xbf16, #tpu.memory_space<vmem>>, vector<8x256xbf16>
    %56 = vector.shape_cast %10 : vector<1x256xi1> to vector<1x256xi1>
    %57 = vector.broadcast %56 : vector<1x256xi1> to vector<8x256xi1>
    %58 = arith.select %57, %54, %55 : vector<8x256xi1>, vector<8x256xbf16>
    %59 = arith.extf %58 : vector<8x256xbf16> to vector<8x256xf32>
    %60 = arith.addf %53, %59 : vector<8x256xf32>
    %61 = arith.truncf %60 : vector<8x256xf32> to vector<8x256xbf16>
    %c0_46 = arith.constant 0 : index
    %c34_47 = arith.constant 34 : index
    %62 = vector.load %arg12[%c0_46, %c34_47] : memref<24x324xbf16, #tpu.memory_space<vmem>>, vector<8x256xbf16>
    tpu.vector_store %arg12[%c0_46, %c34_47], %61 {strides = array<i32>} : memref<24x324xbf16, #tpu.memory_space<vmem>>, vector<8x256xbf16>,
    %c0_48 = arith.constant 0 : index
    %c34_49 = arith.constant 34 : index
    %63 = vector.load %arg12[%c0_48, %c34_49] : memref<24x324xbf16, #tpu.memory_space<vmem>>, vector<8x256xbf16>
    %64 = arith.extf %63 : vector<8x256xbf16> to vector<8x256xf32>
    %c0_50 = arith.constant 0 : index
    %c50_51 = arith.constant 50 : index
    %65 = vector.load %arg12[%c0_50, %c50_51] : memref<24x324xbf16, #tpu.memory_space<vmem>>, vector<8x256xbf16>
    %c0_52 = arith.constant 0 : index
    %c18_53 = arith.constant 18 : index
    %66 = vector.load %arg12[%c0_52, %c18_53] : memref<24x324xbf16, #tpu.memory_space<vmem>>, vector<8x256xbf16>
    %67 = vector.shape_cast %13 : vector<1x256xi1> to vector<1x256xi1>
    %68 = vector.broadcast %67 : vector<1x256xi1> to vector<8x256xi1>
    %69 = arith.select %68, %65, %66 : vector<8x256xi1>, vector<8x256xbf16>
    %70 = arith.extf %69 : vector<8x256xbf16> to vector<8x256xf32>
    %71 = arith.addf %64, %70 : vector<8x256xf32>
    %cst_54 = arith.constant 2.500000e-01 : f32
    %72 = vector.broadcast %cst_54 : f32 to vector<8x256xf32>
    %73 = arith.mulf %72, %71 : vector<8x256xf32>
    %74 = arith.truncf %73 : vector<8x256xf32> to vector<8x256xbf16>
    %c0_55 = arith.constant 0 : index
    %c34_56 = arith.constant 34 : index
    %75 = vector.load %arg12[%c0_55, %c34_56] : memref<24x324xbf16, #tpu.memory_space<vmem>>, vector<8x256xbf16>
    tpu.vector_store %arg12[%c0_55, %c34_56], %74 {strides = array<i32>} : memref<24x324xbf16, #tpu.memory_space<vmem>>, vector<8x256xbf16>,
    %c0_57 = arith.constant 0 : index
    %c0_58 = arith.constant 0 : index
    %76 = vector.load %arg12[%c0_57, %c0_58] : memref<24x324xbf16, #tpu.memory_space<vmem>>, vector<8x256xbf16>
    %77 = vector.broadcast %6 : vector<1x256xbf16> to vector<8x256xbf16>
    %78 = arith.mulf %76, %77 : vector<8x256xbf16>
    %c0_59 = arith.constant 0 : index
    %c0_60 = arith.constant 0 : index
    %79 = vector.load %arg13[%c0_59, %c0_60] : memref<216x256xbf16, #tpu.memory_space<vmem>>, vector<8x256xbf16>
    tpu.vector_store %arg13[%c0_59, %c0_60], %78 {strides = array<i32>} : memref<216x256xbf16, #tpu.memory_space<vmem>>, vector<8x256xbf16>,
    %c0_61 = arith.constant 0 : index
    %c2_62 = arith.constant 2 : index
    %80 = vector.load %arg12[%c0_61, %c2_62] : memref<24x324xbf16, #tpu.memory_space<vmem>>, vector<8x256xbf16>
    %c8_63 = arith.constant 8 : index
    %c0_64 = arith.constant 0 : index
    %81 = vector.load %arg13[%c8_63, %c0_64] : memref<216x256xbf16, #tpu.memory_space<vmem>>, vector<8x256xbf16>
    tpu.vector_store %arg13[%c8_63, %c0_64], %80 {strides = array<i32>} : memref<216x256xbf16, #tpu.memory_space<vmem>>, vector<8x256xbf16>,
    %c0_65 = arith.constant 0 : index
    %c4_66 = arith.constant 4 : index
    %82 = vector.load %arg12[%c0_65, %c4_66] : memref<24x324xbf16, #tpu.memory_space<vmem>>, vector<8x256xbf16>
    %83 = vector.broadcast %7 : vector<1x256xbf16> to vector<8x256xbf16>
    %84 = arith.mulf %82, %83 : vector<8x256xbf16>
    %c16 = arith.constant 16 : index
    %c0_67 = arith.constant 0 : index
    %85 = vector.load %arg13[%c16, %c0_67] : memref<216x256xbf16, #tpu.memory_space<vmem>>, vector<8x256xbf16>
    tpu.vector_store %arg13[%c16, %c0_67], %84 {strides = array<i32>} : memref<216x256xbf16, #tpu.memory_space<vmem>>, vector<8x256xbf16>,
    %c0_68 = arith.constant 0 : index
    %c32 = arith.constant 32 : index
    %86 = vector.load %arg12[%c0_68, %c32] : memref<24x324xbf16, #tpu.memory_space<vmem>>, vector<8x256xbf16>
    %87 = vector.broadcast %6 : vector<1x256xbf16> to vector<8x256xbf16>
    %88 = arith.mulf %86, %87 : vector<8x256xbf16>
    %c24 = arith.constant 24 : index
    %c0_69 = arith.constant 0 : index
    %89 = vector.load %arg13[%c24, %c0_69] : memref<216x256xbf16, #tpu.memory_space<vmem>>, vector<8x256xbf16>
    tpu.vector_store %arg13[%c24, %c0_69], %88 {strides = array<i32>} : memref<216x256xbf16, #tpu.memory_space<vmem>>, vector<8x256xbf16>,
    %c0_70 = arith.constant 0 : index
    %c34_71 = arith.constant 34 : index
    %90 = vector.load %arg12[%c0_70, %c34_71] : memref<24x324xbf16, #tpu.memory_space<vmem>>, vector<8x256xbf16>
    %c32_72 = arith.constant 32 : index
    %c0_73 = arith.constant 0 : index
    %91 = vector.load %arg13[%c32_72, %c0_73] : memref<216x256xbf16, #tpu.memory_space<vmem>>, vector<8x256xbf16>
    tpu.vector_store %arg13[%c32_72, %c0_73], %90 {strides = array<i32>} : memref<216x256xbf16, #tpu.memory_space<vmem>>, vector<8x256xbf16>,
    %c0_74 = arith.constant 0 : index
    %c36 = arith.constant 36 : index
    %92 = vector.load %arg12[%c0_74, %c36] : memref<24x324xbf16, #tpu.memory_space<vmem>>, vector<8x256xbf16>
    %93 = vector.broadcast %7 : vector<1x256xbf16> to vector<8x256xbf16>
    %94 = arith.mulf %92, %93 : vector<8x256xbf16>
    %c40 = arith.constant 40 : index
    %c0_75 = arith.constant 0 : index
    %95 = vector.load %arg13[%c40, %c0_75] : memref<216x256xbf16, #tpu.memory_space<vmem>>, vector<8x256xbf16>
    tpu.vector_store %arg13[%c40, %c0_75], %94 {strides = array<i32>} : memref<216x256xbf16, #tpu.memory_space<vmem>>, vector<8x256xbf16>,
    %c0_76 = arith.constant 0 : index
    %c64 = arith.constant 64 : index
    %96 = vector.load %arg12[%c0_76, %c64] : memref<24x324xbf16, #tpu.memory_space<vmem>>, vector<8x256xbf16>
    %97 = vector.broadcast %6 : vector<1x256xbf16> to vector<8x256xbf16>
    %98 = arith.mulf %96, %97 : vector<8x256xbf16>
    %c48 = arith.constant 48 : index
    %c0_77 = arith.constant 0 : index
    %99 = vector.load %arg13[%c48, %c0_77] : memref<216x256xbf16, #tpu.memory_space<vmem>>, vector<8x256xbf16>
    tpu.vector_store %arg13[%c48, %c0_77], %98 {strides = array<i32>} : memref<216x256xbf16, #tpu.memory_space<vmem>>, vector<8x256xbf16>,
    %c0_78 = arith.constant 0 : index
    %c66 = arith.constant 66 : index
    %100 = vector.load %arg12[%c0_78, %c66] : memref<24x324xbf16, #tpu.memory_space<vmem>>, vector<8x256xbf16>
    %c56 = arith.constant 56 : index
    %c0_79 = arith.constant 0 : index
    %101 = vector.load %arg13[%c56, %c0_79] : memref<216x256xbf16, #tpu.memory_space<vmem>>, vector<8x256xbf16>
    tpu.vector_store %arg13[%c56, %c0_79], %100 {strides = array<i32>} : memref<216x256xbf16, #tpu.memory_space<vmem>>, vector<8x256xbf16>,
    %c0_80 = arith.constant 0 : index
    %c68 = arith.constant 68 : index
    %102 = vector.load %arg12[%c0_80, %c68] : memref<24x324xbf16, #tpu.memory_space<vmem>>, vector<8x256xbf16>
    %103 = vector.broadcast %7 : vector<1x256xbf16> to vector<8x256xbf16>
    %104 = arith.mulf %102, %103 : vector<8x256xbf16>
    %c64_81 = arith.constant 64 : index
    %c0_82 = arith.constant 0 : index
    %105 = vector.load %arg13[%c64_81, %c0_82] : memref<216x256xbf16, #tpu.memory_space<vmem>>, vector<8x256xbf16>
    tpu.vector_store %arg13[%c64_81, %c0_82], %104 {strides = array<i32>} : memref<216x256xbf16, #tpu.memory_space<vmem>>, vector<8x256xbf16>,
    %c0_83 = arith.constant 0 : index
    %c0_84 = arith.constant 0 : index
    %106 = vector.load %arg5[%c0_83, %c0_84] : memref<16x72xbf16, #tpu.memory_space<vmem>>, vector<16x72xbf16>
    %c0_85 = arith.constant 0 : index
    %c0_86 = arith.constant 0 : index
    %107 = vector.load %arg13[%c0_85, %c0_86] : memref<216x256xbf16, #tpu.memory_space<vmem>>, vector<72x256xbf16>
    %cst_87 = arith.constant dense<0.000000e+00> : vector<16x256xf32>
    %108 = tpu.matmul %106, %107, %cst_87 {dimension_numbers = #tpu.dot_dimension_numbers<[1], [0], [0], [1], [0, 0, 1, 1], [], []>} : vector<16x72xbf16>, vector<72x256xbf16>, vector<16x256xf32> -> vector<16x256xf32>
    %c0_88 = arith.constant 0 : index
    %c0_89 = arith.constant 0 : index
    %109 = vector.load %arg6[%c0_88, %c0_89] : memref<16x1xf32, #tpu.memory_space<vmem>>, vector<16x1xf32>
    %110 = vector.broadcast %109 : vector<16x1xf32> to vector<16x256xf32>
    %111 = arith.addf %108, %110 : vector<16x256xf32>
    %cst_90 = arith.constant 0.000000e+00 : f32
    %112 = vector.broadcast %cst_90 : f32 to vector<16x256xf32>
    %113 = arith.maximumf %111, %112 : vector<16x256xf32>
    %114 = arith.truncf %113 : vector<16x256xf32> to vector<16x256xbf16>
    %c0_91 = arith.constant 0 : index
    %c34_92 = arith.constant 34 : index
    %115 = vector.load %arg12[%c0_91, %c34_92] : memref<24x324xbf16, #tpu.memory_space<vmem>>, vector<16x256xbf16>
    tpu.vector_store %arg12[%c0_91, %c34_92], %114 {strides = array<i32>} : memref<24x324xbf16, #tpu.memory_space<vmem>>, vector<16x256xbf16>,
    %116 = arith.truncf %49 : vector<8x256xf32> to vector<8x256xbf16>
    %c16_93 = arith.constant 16 : index
    %c34_94 = arith.constant 34 : index
    %117 = vector.load %arg12[%c16_93, %c34_94] : memref<24x324xbf16, #tpu.memory_space<vmem>>, vector<8x256xbf16>
    tpu.vector_store %arg12[%c16_93, %c34_94], %116 {strides = array<i32>} : memref<24x324xbf16, #tpu.memory_space<vmem>>, vector<8x256xbf16>,
    %c0_95 = arith.constant 0 : index
    %c17_96 = arith.constant 17 : index
    %118 = vector.load %arg12[%c0_95, %c17_96] : memref<24x324xbf16, #tpu.memory_space<vmem>>, vector<24x256xbf16>
    %119 = vector.broadcast %4 : vector<1x256xbf16> to vector<24x256xbf16>
    %120 = arith.mulf %118, %119 : vector<24x256xbf16>
    %c0_97 = arith.constant 0 : index
    %c0_98 = arith.constant 0 : index
    %121 = vector.load %arg13[%c0_97, %c0_98] : memref<216x256xbf16, #tpu.memory_space<vmem>>, vector<24x256xbf16>
    tpu.vector_store %arg13[%c0_97, %c0_98], %120 {strides = array<i32>} : memref<216x256xbf16, #tpu.memory_space<vmem>>, vector<24x256xbf16>,
    %c0_99 = arith.constant 0 : index
    %c18_100 = arith.constant 18 : index
    %122 = vector.load %arg12[%c0_99, %c18_100] : memref<24x324xbf16, #tpu.memory_space<vmem>>, vector<24x256xbf16>
    %c24_101 = arith.constant 24 : index
    %c0_102 = arith.constant 0 : index
    %123 = vector.load %arg13[%c24_101, %c0_102] : memref<216x256xbf16, #tpu.memory_space<vmem>>, vector<24x256xbf16>
    tpu.vector_store %arg13[%c24_101, %c0_102], %122 {strides = array<i32>} : memref<216x256xbf16, #tpu.memory_space<vmem>>, vector<24x256xbf16>,
    %c0_103 = arith.constant 0 : index
    %c19_104 = arith.constant 19 : index
    %124 = vector.load %arg12[%c0_103, %c19_104] : memref<24x324xbf16, #tpu.memory_space<vmem>>, vector<24x256xbf16>
    %125 = vector.broadcast %5 : vector<1x256xbf16> to vector<24x256xbf16>
    %126 = arith.mulf %124, %125 : vector<24x256xbf16>
    %c48_105 = arith.constant 48 : index
    %c0_106 = arith.constant 0 : index
    %127 = vector.load %arg13[%c48_105, %c0_106] : memref<216x256xbf16, #tpu.memory_space<vmem>>, vector<24x256xbf16>
    tpu.vector_store %arg13[%c48_105, %c0_106], %126 {strides = array<i32>} : memref<216x256xbf16, #tpu.memory_space<vmem>>, vector<24x256xbf16>,
    %c0_107 = arith.constant 0 : index
    %c33_108 = arith.constant 33 : index
    %128 = vector.load %arg12[%c0_107, %c33_108] : memref<24x324xbf16, #tpu.memory_space<vmem>>, vector<24x256xbf16>
    %129 = vector.broadcast %4 : vector<1x256xbf16> to vector<24x256xbf16>
    %130 = arith.mulf %128, %129 : vector<24x256xbf16>
    %c72 = arith.constant 72 : index
    %c0_109 = arith.constant 0 : index
    %131 = vector.load %arg13[%c72, %c0_109] : memref<216x256xbf16, #tpu.memory_space<vmem>>, vector<24x256xbf16>
    tpu.vector_store %arg13[%c72, %c0_109], %130 {strides = array<i32>} : memref<216x256xbf16, #tpu.memory_space<vmem>>, vector<24x256xbf16>,
    %c0_110 = arith.constant 0 : index
    %c34_111 = arith.constant 34 : index
    %132 = vector.load %arg12[%c0_110, %c34_111] : memref<24x324xbf16, #tpu.memory_space<vmem>>, vector<24x256xbf16>
    %c96 = arith.constant 96 : index
    %c0_112 = arith.constant 0 : index
    %133 = vector.load %arg13[%c96, %c0_112] : memref<216x256xbf16, #tpu.memory_space<vmem>>, vector<24x256xbf16>
    tpu.vector_store %arg13[%c96, %c0_112], %132 {strides = array<i32>} : memref<216x256xbf16, #tpu.memory_space<vmem>>, vector<24x256xbf16>,
    %c0_113 = arith.constant 0 : index
    %c35_114 = arith.constant 35 : index
    %134 = vector.load %arg12[%c0_113, %c35_114] : memref<24x324xbf16, #tpu.memory_space<vmem>>, vector<24x256xbf16>
    %135 = vector.broadcast %5 : vector<1x256xbf16> to vector<24x256xbf16>
    %136 = arith.mulf %134, %135 : vector<24x256xbf16>
    %c120 = arith.constant 120 : index
    %c0_115 = arith.constant 0 : index
    %137 = vector.load %arg13[%c120, %c0_115] : memref<216x256xbf16, #tpu.memory_space<vmem>>, vector<24x256xbf16>
    tpu.vector_store %arg13[%c120, %c0_115], %136 {strides = array<i32>} : memref<216x256xbf16, #tpu.memory_space<vmem>>, vector<24x256xbf16>,
    %c0_116 = arith.constant 0 : index
    %c49_117 = arith.constant 49 : index
    %138 = vector.load %arg12[%c0_116, %c49_117] : memref<24x324xbf16, #tpu.memory_space<vmem>>, vector<24x256xbf16>
    %139 = vector.broadcast %4 : vector<1x256xbf16> to vector<24x256xbf16>
    %140 = arith.mulf %138, %139 : vector<24x256xbf16>
    %c144 = arith.constant 144 : index
    %c0_118 = arith.constant 0 : index
    %141 = vector.load %arg13[%c144, %c0_118] : memref<216x256xbf16, #tpu.memory_space<vmem>>, vector<24x256xbf16>
    tpu.vector_store %arg13[%c144, %c0_118], %140 {strides = array<i32>} : memref<216x256xbf16, #tpu.memory_space<vmem>>, vector<24x256xbf16>,
    %c0_119 = arith.constant 0 : index
    %c50_120 = arith.constant 50 : index
    %142 = vector.load %arg12[%c0_119, %c50_120] : memref<24x324xbf16, #tpu.memory_space<vmem>>, vector<24x256xbf16>
    %c168 = arith.constant 168 : index
    %c0_121 = arith.constant 0 : index
    %143 = vector.load %arg13[%c168, %c0_121] : memref<216x256xbf16, #tpu.memory_space<vmem>>, vector<24x256xbf16>
    tpu.vector_store %arg13[%c168, %c0_121], %142 {strides = array<i32>} : memref<216x256xbf16, #tpu.memory_space<vmem>>, vector<24x256xbf16>,
    %c0_122 = arith.constant 0 : index
    %c51_123 = arith.constant 51 : index
    %144 = vector.load %arg12[%c0_122, %c51_123] : memref<24x324xbf16, #tpu.memory_space<vmem>>, vector<24x256xbf16>
    %145 = vector.broadcast %5 : vector<1x256xbf16> to vector<24x256xbf16>
    %146 = arith.mulf %144, %145 : vector<24x256xbf16>
    %c192 = arith.constant 192 : index
    %c0_124 = arith.constant 0 : index
    %147 = vector.load %arg13[%c192, %c0_124] : memref<216x256xbf16, #tpu.memory_space<vmem>>, vector<24x256xbf16>
    tpu.vector_store %arg13[%c192, %c0_124], %146 {strides = array<i32>} : memref<216x256xbf16, #tpu.memory_space<vmem>>, vector<24x256xbf16>,
    %c0_125 = arith.constant 0 : index
    %c0_126 = arith.constant 0 : index
    %148 = vector.load %arg7[%c0_125, %c0_126] : memref<8x216xbf16, #tpu.memory_space<vmem>>, vector<8x216xbf16>
    %c0_127 = arith.constant 0 : index
    %c0_128 = arith.constant 0 : index
    %149 = vector.load %arg13[%c0_127, %c0_128] : memref<216x256xbf16, #tpu.memory_space<vmem>>, vector<216x256xbf16>
    %cst_129 = arith.constant dense<0.000000e+00> : vector<8x256xf32>
    %150 = tpu.matmul %148, %149, %cst_129 {dimension_numbers = #tpu.dot_dimension_numbers<[1], [0], [0], [1], [0, 0, 1, 1], [], []>} : vector<8x216xbf16>, vector<216x256xbf16>, vector<8x256xf32> -> vector<8x256xf32>
    %c0_130 = arith.constant 0 : index
    %c0_131 = arith.constant 0 : index
    %151 = vector.load %arg8[%c0_130, %c0_131] : memref<8x1xf32, #tpu.memory_space<vmem>>, vector<8x1xf32>
    %152 = vector.broadcast %151 : vector<8x1xf32> to vector<8x256xf32>
    %153 = arith.addf %150, %152 : vector<8x256xf32>
    %cst_132 = arith.constant 0.000000e+00 : f32
    %154 = vector.broadcast %cst_132 : f32 to vector<8x256xf32>
    %155 = arith.maximumf %153, %154 : vector<8x256xf32>
    %156 = arith.truncf %155 : vector<8x256xf32> to vector<8x256xbf16>
    %c0_133 = arith.constant 0 : index
    %c34_134 = arith.constant 34 : index
    %157 = vector.load %arg12[%c0_133, %c34_134] : memref<24x324xbf16, #tpu.memory_space<vmem>>, vector<8x256xbf16>
    tpu.vector_store %arg12[%c0_133, %c34_134], %156 {strides = array<i32>} : memref<24x324xbf16, #tpu.memory_space<vmem>>, vector<8x256xbf16>,
    %c0_135 = arith.constant 0 : index
    %c17_136 = arith.constant 17 : index
    %158 = vector.load %arg12[%c0_135, %c17_136] : memref<24x324xbf16, #tpu.memory_space<vmem>>, vector<8x256xbf16>
    %159 = vector.broadcast %4 : vector<1x256xbf16> to vector<8x256xbf16>
    %160 = arith.mulf %158, %159 : vector<8x256xbf16>
    %c0_137 = arith.constant 0 : index
    %c0_138 = arith.constant 0 : index
    %161 = vector.load %arg13[%c0_137, %c0_138] : memref<216x256xbf16, #tpu.memory_space<vmem>>, vector<8x256xbf16>
    tpu.vector_store %arg13[%c0_137, %c0_138], %160 {strides = array<i32>} : memref<216x256xbf16, #tpu.memory_space<vmem>>, vector<8x256xbf16>,
    %c0_139 = arith.constant 0 : index
    %c18_140 = arith.constant 18 : index
    %162 = vector.load %arg12[%c0_139, %c18_140] : memref<24x324xbf16, #tpu.memory_space<vmem>>, vector<8x256xbf16>
    %c8_141 = arith.constant 8 : index
    %c0_142 = arith.constant 0 : index
    %163 = vector.load %arg13[%c8_141, %c0_142] : memref<216x256xbf16, #tpu.memory_space<vmem>>, vector<8x256xbf16>
    tpu.vector_store %arg13[%c8_141, %c0_142], %162 {strides = array<i32>} : memref<216x256xbf16, #tpu.memory_space<vmem>>, vector<8x256xbf16>,
    %c0_143 = arith.constant 0 : index
    %c19_144 = arith.constant 19 : index
    %164 = vector.load %arg12[%c0_143, %c19_144] : memref<24x324xbf16, #tpu.memory_space<vmem>>, vector<8x256xbf16>
    %165 = vector.broadcast %5 : vector<1x256xbf16> to vector<8x256xbf16>
    %166 = arith.mulf %164, %165 : vector<8x256xbf16>
    %c16_145 = arith.constant 16 : index
    %c0_146 = arith.constant 0 : index
    %167 = vector.load %arg13[%c16_145, %c0_146] : memref<216x256xbf16, #tpu.memory_space<vmem>>, vector<8x256xbf16>
    tpu.vector_store %arg13[%c16_145, %c0_146], %166 {strides = array<i32>} : memref<216x256xbf16, #tpu.memory_space<vmem>>, vector<8x256xbf16>,
    %c0_147 = arith.constant 0 : index
    %c33_148 = arith.constant 33 : index
    %168 = vector.load %arg12[%c0_147, %c33_148] : memref<24x324xbf16, #tpu.memory_space<vmem>>, vector<8x256xbf16>
    %169 = vector.broadcast %4 : vector<1x256xbf16> to vector<8x256xbf16>
    %170 = arith.mulf %168, %169 : vector<8x256xbf16>
    %c24_149 = arith.constant 24 : index
    %c0_150 = arith.constant 0 : index
    %171 = vector.load %arg13[%c24_149, %c0_150] : memref<216x256xbf16, #tpu.memory_space<vmem>>, vector<8x256xbf16>
    tpu.vector_store %arg13[%c24_149, %c0_150], %170 {strides = array<i32>} : memref<216x256xbf16, #tpu.memory_space<vmem>>, vector<8x256xbf16>,
    %c0_151 = arith.constant 0 : index
    %c34_152 = arith.constant 34 : index
    %172 = vector.load %arg12[%c0_151, %c34_152] : memref<24x324xbf16, #tpu.memory_space<vmem>>, vector<8x256xbf16>
    %c32_153 = arith.constant 32 : index
    %c0_154 = arith.constant 0 : index
    %173 = vector.load %arg13[%c32_153, %c0_154] : memref<216x256xbf16, #tpu.memory_space<vmem>>, vector<8x256xbf16>
    tpu.vector_store %arg13[%c32_153, %c0_154], %172 {strides = array<i32>} : memref<216x256xbf16, #tpu.memory_space<vmem>>, vector<8x256xbf16>,
    %c0_155 = arith.constant 0 : index
    %c35_156 = arith.constant 35 : index
    %174 = vector.load %arg12[%c0_155, %c35_156] : memref<24x324xbf16, #tpu.memory_space<vmem>>, vector<8x256xbf16>
    %175 = vector.broadcast %5 : vector<1x256xbf16> to vector<8x256xbf16>
    %176 = arith.mulf %174, %175 : vector<8x256xbf16>
    %c40_157 = arith.constant 40 : index
    %c0_158 = arith.constant 0 : index
    %177 = vector.load %arg13[%c40_157, %c0_158] : memref<216x256xbf16, #tpu.memory_space<vmem>>, vector<8x256xbf16>
    tpu.vector_store %arg13[%c40_157, %c0_158], %176 {strides = array<i32>} : memref<216x256xbf16, #tpu.memory_space<vmem>>, vector<8x256xbf16>,
    %c0_159 = arith.constant 0 : index
    %c49_160 = arith.constant 49 : index
    %178 = vector.load %arg12[%c0_159, %c49_160] : memref<24x324xbf16, #tpu.memory_space<vmem>>, vector<8x256xbf16>
    %179 = vector.broadcast %4 : vector<1x256xbf16> to vector<8x256xbf16>
    %180 = arith.mulf %178, %179 : vector<8x256xbf16>
    %c48_161 = arith.constant 48 : index
    %c0_162 = arith.constant 0 : index
    %181 = vector.load %arg13[%c48_161, %c0_162] : memref<216x256xbf16, #tpu.memory_space<vmem>>, vector<8x256xbf16>
    tpu.vector_store %arg13[%c48_161, %c0_162], %180 {strides = array<i32>} : memref<216x256xbf16, #tpu.memory_space<vmem>>, vector<8x256xbf16>,
    %c0_163 = arith.constant 0 : index
    %c50_164 = arith.constant 50 : index
    %182 = vector.load %arg12[%c0_163, %c50_164] : memref<24x324xbf16, #tpu.memory_space<vmem>>, vector<8x256xbf16>
    %c56_165 = arith.constant 56 : index
    %c0_166 = arith.constant 0 : index
    %183 = vector.load %arg13[%c56_165, %c0_166] : memref<216x256xbf16, #tpu.memory_space<vmem>>, vector<8x256xbf16>
    tpu.vector_store %arg13[%c56_165, %c0_166], %182 {strides = array<i32>} : memref<216x256xbf16, #tpu.memory_space<vmem>>, vector<8x256xbf16>,
    %c0_167 = arith.constant 0 : index
    %c51_168 = arith.constant 51 : index
    %184 = vector.load %arg12[%c0_167, %c51_168] : memref<24x324xbf16, #tpu.memory_space<vmem>>, vector<8x256xbf16>
    %185 = vector.broadcast %5 : vector<1x256xbf16> to vector<8x256xbf16>
    %186 = arith.mulf %184, %185 : vector<8x256xbf16>
    %c64_169 = arith.constant 64 : index
    %c0_170 = arith.constant 0 : index
    %187 = vector.load %arg13[%c64_169, %c0_170] : memref<216x256xbf16, #tpu.memory_space<vmem>>, vector<8x256xbf16>
    tpu.vector_store %arg13[%c64_169, %c0_170], %186 {strides = array<i32>} : memref<216x256xbf16, #tpu.memory_space<vmem>>, vector<8x256xbf16>,
    %c0_171 = arith.constant 0 : index
    %c0_172 = arith.constant 0 : index
    %188 = vector.load %arg9[%c0_171, %c0_172] : memref<1x72xbf16, #tpu.memory_space<vmem>>, vector<1x72xbf16>
    %c0_173 = arith.constant 0 : index
    %c0_174 = arith.constant 0 : index
    %189 = vector.load %arg13[%c0_173, %c0_174] : memref<216x256xbf16, #tpu.memory_space<vmem>>, vector<72x256xbf16>
    %cst_175 = arith.constant dense<0.000000e+00> : vector<1x256xf32>
    %190 = tpu.matmul %188, %189, %cst_175 {dimension_numbers = #tpu.dot_dimension_numbers<[1], [0], [0], [1], [0, 0, 1, 1], [], []>} : vector<1x72xbf16>, vector<72x256xbf16>, vector<1x256xf32> -> vector<1x256xf32>
    %c0_176 = arith.constant 0 : index
    %c0_177 = arith.constant 0 : index
    %191 = vector.load %arg10[%c0_176, %c0_177] : memref<1x1xf32, #tpu.memory_space<vmem>>, vector<1x1xf32>
    %192 = vector.broadcast %191 : vector<1x1xf32> to vector<1x256xf32>
    %193 = arith.addf %190, %192 : vector<1x256xf32>
    %c0_178 = arith.constant 0 : index
    %c3_179 = arith.constant 3 : index
    %c0_180 = arith.constant 0 : index
    %194 = vector.load %arg1[%c0_178, %c3_179, %c0_180] : memref<1x8x256xf32, #tpu.memory_space<vmem>>, vector<1x1x256xf32>
    %195 = vector.shape_cast %194 : vector<1x1x256xf32> to vector<1x256xf32>
    %c0_181 = arith.constant 0 : index
    %c4_182 = arith.constant 4 : index
    %c0_183 = arith.constant 0 : index
    %196 = vector.load %arg1[%c0_181, %c4_182, %c0_183] : memref<1x8x256xf32, #tpu.memory_space<vmem>>, vector<1x1x256xf32>
    %197 = vector.shape_cast %196 : vector<1x1x256xf32> to vector<1x256xf32>
    %cst_184 = arith.constant 5.000000e-02 : f32
    %198 = vector.broadcast %cst_184 : f32 to vector<1x256xf32>
    %199 = arith.maximumf %197, %198 : vector<1x256xf32>
    %200 = tpu.reciprocal %199 : vector<1x256xf32> -> vector<1x256xf32>
    %cst_185 = arith.constant 0.000000e+00 : f32
    %201 = vector.broadcast %cst_185 : f32 to vector<1x256xf32>
    %cst_186 = arith.constant 0.000000e+00 : f32
    %202 = vector.broadcast %cst_186 : f32 to vector<1x256xf32>
    %c0_187 = arith.constant 0 : index
    %c0_188 = arith.constant 0 : index
    %c0_189 = arith.constant 0 : index
    %203 = vector.load %arg1[%c0_187, %c0_188, %c0_189] : memref<1x8x256xf32, #tpu.memory_space<vmem>>, vector<1x1x256xf32>
    %204 = vector.shape_cast %203 : vector<1x1x256xf32> to vector<1x256xf32>
    %c0_190 = arith.constant 0 : index
    %c5_191 = arith.constant 5 : index
    %c0_192 = arith.constant 0 : index
    %205 = vector.load %arg1[%c0_190, %c5_191, %c0_192] : memref<1x8x256xf32, #tpu.memory_space<vmem>>, vector<1x1x256xf32>
    %206 = vector.shape_cast %205 : vector<1x1x256xf32> to vector<1x256xf32>
    %207 = arith.mulf %206, %197 : vector<1x256xf32>
    %cst_193 = arith.constant 1.000000e+00 : f32
    %208 = vector.broadcast %cst_193 : f32 to vector<1x256xf32>
    %209 = arith.subf %208, %197 : vector<1x256xf32>
    %210 = arith.mulf %195, %209 : vector<1x256xf32>
    %211 = arith.addf %207, %210 : vector<1x256xf32>
    %212 = arith.subf %211, %204 : vector<1x256xf32>
    %213 = arith.subf %206, %195 : vector<1x256xf32>
    %214 = arith.mulf %212, %213 : vector<1x256xf32>
    %215 = arith.addf %201, %214 : vector<1x256xf32>
    %216 = arith.subf %204, %195 : vector<1x256xf32>
    %217 = arith.mulf %216, %200 : vector<1x256xf32>
    %218 = arith.addf %217, %195 : vector<1x256xf32>
    %219 = arith.subf %218, %206 : vector<1x256xf32>
    %220 = arith.mulf %217, %200 : vector<1x256xf32>
    %cst_194 = arith.constant 0.000000e+00 : f32
    %221 = vector.broadcast %cst_194 : f32 to vector<1x256xf32>
    %222 = arith.subf %221, %220 : vector<1x256xf32>
    %223 = arith.mulf %219, %222 : vector<1x256xf32>
    %224 = arith.addf %202, %223 : vector<1x256xf32>
    %c0_195 = arith.constant 0 : index
    %c1_196 = arith.constant 1 : index
    %c0_197 = arith.constant 0 : index
    %225 = vector.load %arg1[%c0_195, %c1_196, %c0_197] : memref<1x8x256xf32, #tpu.memory_space<vmem>>, vector<1x1x256xf32>
    %226 = vector.shape_cast %225 : vector<1x1x256xf32> to vector<1x256xf32>
    %c0_198 = arith.constant 0 : index
    %c6_199 = arith.constant 6 : index
    %c0_200 = arith.constant 0 : index
    %227 = vector.load %arg1[%c0_198, %c6_199, %c0_200] : memref<1x8x256xf32, #tpu.memory_space<vmem>>, vector<1x1x256xf32>
    %228 = vector.shape_cast %227 : vector<1x1x256xf32> to vector<1x256xf32>
    %229 = arith.mulf %228, %197 : vector<1x256xf32>
    %cst_201 = arith.constant 1.000000e+00 : f32
    %230 = vector.broadcast %cst_201 : f32 to vector<1x256xf32>
    %231 = arith.subf %230, %197 : vector<1x256xf32>
    %232 = arith.mulf %195, %231 : vector<1x256xf32>
    %233 = arith.addf %229, %232 : vector<1x256xf32>
    %234 = arith.subf %233, %226 : vector<1x256xf32>
    %235 = arith.subf %228, %195 : vector<1x256xf32>
    %236 = arith.mulf %234, %235 : vector<1x256xf32>
    %237 = arith.addf %215, %236 : vector<1x256xf32>
    %238 = arith.subf %226, %195 : vector<1x256xf32>
    %239 = arith.mulf %238, %200 : vector<1x256xf32>
    %240 = arith.addf %239, %195 : vector<1x256xf32>
    %241 = arith.subf %240, %228 : vector<1x256xf32>
    %242 = arith.mulf %239, %200 : vector<1x256xf32>
    %cst_202 = arith.constant 0.000000e+00 : f32
    %243 = vector.broadcast %cst_202 : f32 to vector<1x256xf32>
    %244 = arith.subf %243, %242 : vector<1x256xf32>
    %245 = arith.mulf %241, %244 : vector<1x256xf32>
    %246 = arith.addf %224, %245 : vector<1x256xf32>
    %c0_203 = arith.constant 0 : index
    %c2_204 = arith.constant 2 : index
    %c0_205 = arith.constant 0 : index
    %247 = vector.load %arg1[%c0_203, %c2_204, %c0_205] : memref<1x8x256xf32, #tpu.memory_space<vmem>>, vector<1x1x256xf32>
    %248 = vector.shape_cast %247 : vector<1x1x256xf32> to vector<1x256xf32>
    %c0_206 = arith.constant 0 : index
    %c7_207 = arith.constant 7 : index
    %c0_208 = arith.constant 0 : index
    %249 = vector.load %arg1[%c0_206, %c7_207, %c0_208] : memref<1x8x256xf32, #tpu.memory_space<vmem>>, vector<1x1x256xf32>
    %250 = vector.shape_cast %249 : vector<1x1x256xf32> to vector<1x256xf32>
    %251 = arith.mulf %250, %197 : vector<1x256xf32>
    %cst_209 = arith.constant 1.000000e+00 : f32
    %252 = vector.broadcast %cst_209 : f32 to vector<1x256xf32>
    %253 = arith.subf %252, %197 : vector<1x256xf32>
    %254 = arith.mulf %195, %253 : vector<1x256xf32>
    %255 = arith.addf %251, %254 : vector<1x256xf32>
    %256 = arith.subf %255, %248 : vector<1x256xf32>
    %257 = arith.subf %250, %195 : vector<1x256xf32>
    %258 = arith.mulf %256, %257 : vector<1x256xf32>
    %259 = arith.addf %237, %258 : vector<1x256xf32>
    %260 = arith.subf %248, %195 : vector<1x256xf32>
    %261 = arith.mulf %260, %200 : vector<1x256xf32>
    %262 = arith.addf %261, %195 : vector<1x256xf32>
    %263 = arith.subf %262, %250 : vector<1x256xf32>
    %264 = arith.mulf %261, %200 : vector<1x256xf32>
    %cst_210 = arith.constant 0.000000e+00 : f32
    %265 = vector.broadcast %cst_210 : f32 to vector<1x256xf32>
    %266 = arith.subf %265, %264 : vector<1x256xf32>
    %267 = arith.mulf %263, %266 : vector<1x256xf32>
    %268 = arith.addf %246, %267 : vector<1x256xf32>
    %269 = arith.addf %259, %268 : vector<1x256xf32>
    %cst_211 = arith.constant 0.333333343 : f32
    %270 = vector.broadcast %cst_211 : f32 to vector<1x256xf32>
    %271 = arith.mulf %269, %270 : vector<1x256xf32>
    %272 = arith.addf %271, %193 : vector<1x256xf32>
    %cst_212 = arith.constant 1.000000e-01 : f32
    %273 = vector.broadcast %cst_212 : f32 to vector<1x256xf32>
    %274 = arith.mulf %273, %272 : vector<1x256xf32>
    %275 = arith.subf %197, %274 : vector<1x256xf32>
    %c0_213 = arith.constant 0 : index
    %c0_214 = arith.constant 0 : index
    %c0_215 = arith.constant 0 : index
    %276 = vector.load %arg11[%c0_213, %c0_214, %c0_215] : memref<1x1x256xf32, #tpu.memory_space<vmem>>, vector<1x1x256xf32>
    %277 = vector.shape_cast %276 : vector<1x1x256xf32> to vector<1x256xf32>
    %278 = vector.shape_cast %275 : vector<1x256xf32> to vector<1x1x256xf32>
    tpu.vector_store %arg11[%c0_213, %c0_214, %c0_215], %278 {strides = array<i32>} : memref<1x1x256xf32, #tpu.memory_space<vmem>>, vector<1x1x256xf32>,
    return
  }
  func.func @transform_0(%arg0: i32) -> (i32, i32, i32) {
    %c0_i32 = arith.constant 0 : i32
    %c0_i32_0 = arith.constant 0 : i32
    %c0_i32_1 = arith.constant 0 : i32
    return %arg0, %c0_i32, %c0_i32_0 : i32, i32, i32
  }
  func.func @transform_1(%arg0: i32) -> (i32, i32) {
    %c0_i32 = arith.constant 0 : i32
    %c0_i32_0 = arith.constant 0 : i32
    %c0_i32_1 = arith.constant 0 : i32
    return %c0_i32, %c0_i32_0 : i32, i32
  }
  func.func @transform_2(%arg0: i32) -> (i32, i32) {
    %c0_i32 = arith.constant 0 : i32
    %c0_i32_0 = arith.constant 0 : i32
    %c0_i32_1 = arith.constant 0 : i32
    return %c0_i32, %c0_i32_0 : i32, i32
  }
  func.func @transform_3(%arg0: i32) -> (i32, i32) {
    %c0_i32 = arith.constant 0 : i32
    %c0_i32_0 = arith.constant 0 : i32
    %c0_i32_1 = arith.constant 0 : i32
    return %c0_i32, %c0_i32_0 : i32, i32
  }
  func.func @transform_4(%arg0: i32) -> (i32, i32) {
    %c0_i32 = arith.constant 0 : i32
    %c0_i32_0 = arith.constant 0 : i32
    %c0_i32_1 = arith.constant 0 : i32
    return %c0_i32, %c0_i32_0 : i32, i32
  }
  func.func @transform_5(%arg0: i32) -> (i32, i32) {
    %c0_i32 = arith.constant 0 : i32
    %c0_i32_0 = arith.constant 0 : i32
    %c0_i32_1 = arith.constant 0 : i32
    return %c0_i32, %c0_i32_0 : i32, i32
  }
  func.func @transform_6(%arg0: i32) -> (i32, i32) {
    %c0_i32 = arith.constant 0 : i32
    %c0_i32_0 = arith.constant 0 : i32
    %c0_i32_1 = arith.constant 0 : i32
    return %c0_i32, %c0_i32_0 : i32, i32
  }
  func.func @transform_7(%arg0: i32) -> (i32, i32) {
    %c0_i32 = arith.constant 0 : i32
    %c0_i32_0 = arith.constant 0 : i32
    %c0_i32_1 = arith.constant 0 : i32
    return %c0_i32, %c0_i32_0 : i32, i32
  }
  func.func @transform_8(%arg0: i32) -> (i32, i32) {
    %c0_i32 = arith.constant 0 : i32
    %c0_i32_0 = arith.constant 0 : i32
    %c0_i32_1 = arith.constant 0 : i32
    return %c0_i32, %c0_i32_0 : i32, i32
  }
  func.func @transform_9(%arg0: i32) -> (i32, i32) {
    %c0_i32 = arith.constant 0 : i32
    %c0_i32_0 = arith.constant 0 : i32
    %c0_i32_1 = arith.constant 0 : i32
    return %c0_i32, %c0_i32_0 : i32, i32
  }
  func.func @transform_10(%arg0: i32) -> (i32, i32, i32) {
    %c0_i32 = arith.constant 0 : i32
    %c0_i32_0 = arith.constant 0 : i32
    %c0_i32_1 = arith.constant 0 : i32
    return %arg0, %c0_i32, %c0_i32_0 : i32, i32, i32
  }
}

</mosaic_0001>

<bundles_post_ra>
// kernel: t_net_forward.1
= control target key start
LH: loop header
LB: loop body
LE: loop exit
PB: predicated region body
PF: predicated region fallthrough
CT: control target
= control target key end

     0   :  { %s4519_s0 = inlined_call_operand.hbm [shape: f32[2,8,256], index: 0, kind: input, shape index: {}]   ;;  %s4520_s1 = inlined_call_operand.hbm [shape: bf16[8,256], index: 1, kind: input, shape index: {}]   ;;  %s4521_s2 = inlined_call_operand.hbm [shape: bf16[8,9], index: 2, kind: input, shape index: {}]   ;;  %s4522_s3 = inlined_call_operand.hbm [shape: f32[8,1], index: 3, kind: input, shape index: {}]   ;;  %s4523_s4 = inlined_call_operand.hbm [shape: bf16[16,72], index: 4, kind: input, shape index: {}]   ;;  %s4524_s5 = inlined_call_operand.hbm [shape: f32[16,1], index: 5, kind: input, shape index: {}]   ;;  %s4525_s6 = inlined_call_operand.hbm [shape: bf16[8,216], index: 6, kind: input, shape index: {}]   ;;  %s4526_s7 = inlined_call_operand.hbm [shape: f32[8,1], index: 7, kind: input, shape index: {}]   ;;  %s4527_s8 = inlined_call_operand.hbm [shape: bf16[1,72], index: 8, kind: input, shape index: {}]   ;;  %s4528_s9 = inlined_call_operand.<no memory space> [shape: f32[1,1], index: 9, kind: input, shape index: {}]   ;;  %s4529_s10 = inlined_call_operand.hbm [shape: f32[2,1,256], index: 10, kind: output, shape index: {}]  }
   0x1   :  { %4575 = sst [smem:[#allocation27_spill]] %s4520_s1  ;;  %v15_v0 = vstv %s4528_s9 }
   0x2   :  { %4576 = sst [smem:[#allocation28_spill]] %s4522_s3  ;;  %16 = vst [vmem:[#allocation4] sm:$0x1] %v15_v0 }
   0x3   :  { %4577 = sst [smem:[#allocation29_spill]] %s4529_s10 }
   0x4   :  { %17 = vsyncpa [#allocation6], 0 }
   0x5   :  { %19 = vsyncpa [#allocation6 + $0x1], 0 }
   0x6   :  { %20 = vsyncpa [#allocation9], 0 }
   0x7   :  { %21 = vsyncpa [#allocation12], 0 }
   0x8   :  { %22 = vsyncpa [#allocation15], 0 }
   0x9   :  { %23 = vsyncpa [#allocation18], 0 }
   0xa   :  { %24 = vsyncpa [#allocation7], 0 }
   0xb   :  { %26 = vsyncpa [#allocation7 + $0x1], 0  ;;  %s3447_s15 = smov 0   ;;  %s3449_s16 = smov 0  }
   0xc   :  { %s3451_s17 = smov 0   ;;  %s3453_s18 = smov 0  }
   0xd LB: > { %s3341_s9 = smov [#allocation8]   ;;  %s3468_s20 = sadd.s32 4294967295, %s3339_s18   ;;  %s3339_s18 = sphi %s3453_s18, %s4757_s18   ;;  %s3335_s17 = sphi %s3451_s17, %s4756_s17   ;;  %s3331_s16 = sphi %s3449_s16, %s4755_s16   ;;  %s3327_s15 = sphi %s3447_s15, %s4754_s15  }
   0xe   : > { %s291_s19 = sshll.u32 %s3341_s9, 4  ;;  %p2675_p0 = scmp.ge.s32.totalorder %s3339_s18, 1  ;;  %s292_s19 = int_to_ptr.vmem [resolvable:$true] %s291_s19 }
   0xf   : > { %p4530_p1 = scmp.eq.s32.totalorder %s3468_s20, 0  ;;  %p278_p2 = scmp.lt.s32.totalorder %s3339_s18, 3 }
  0x10   : > { %s3342_s22 = smov [#allocation11]   ;;  %s3343_s24 = smov [#allocation14]  }
  0x11   : > { %p3473_p3 = pnand %p2675_p0, %p278_p2  ;;  %s313_s23 = sshll.u32 %s3342_s22, 4  ;;  %s3480_s23 = int_to_ptr.vmem [resolvable:$true] %s313_s23 }
  0x12   : > { %s336_s25 = sshll.u32 %s3343_s24, 4  ;;  %s4580_s1 = sld [smem:[#allocation27_spill]]  ;;  %s3488_s25 = int_to_ptr.vmem [resolvable:$true] %s336_s25 }
  0x13   : > { %s4578_s21 = scalar_select %p3473_p3, 1, 0 }
  0x14   : > { %p2834_p5 = pneg %p3473_p3 }
  0x16   : > { %p3484_p6 = pnand %p2834_p5, %p4530_p1 }
  0x18   : > { %s3003_s29 = scalar_lea.hbm %s4580_s1, 128  ;;  %p3498_p8 = pneg %p3484_p6 }
  0x19   : > { %p3004_p7 = scmp.ne.s32.totalorder %s4580_s1, %s3003_s29  ;;  %p3010_p11 = scmp.lt.u32.totalorder %s3003_s29, %s4580_s1 }
  0x1b   : > { %p3006_p9 = pnand %p3498_p8, %p3004_p7 }
  0x1d   : > { %p3007_p10 = pneg %p3006_p9 }
  0x1f   : > { %p3012_p12 = pnand %p3010_p11, %p3007_p10 }
  0x21   : > { %3015 = shalt.err (!%p3012_p12)
}
  0x22   : > { %s3016_s9 = scalar_lea.vmem %s292_s19, 128  ;;  %p3024_p5 = scmp.lt.s32.totalorder %s292_s19, %s292_s19 }
  0x23   : > { %p3017_p13 = scmp.ne.s32.totalorder %s292_s19, %s3016_s9  ;;  %p3025_p4 = scmp.lt.s32.totalorder %s3016_s9, %s3016_s9 }
  0x25   : > { %p3019_p0 = pnand %p3017_p13, %p3498_p8  ;;  %p3026_p1 = por %p3025_p4, %p3024_p5 }
  0x27   : > { %p3020_p2 = pneg %p3019_p0 }
  0x29   : > { %p3027_p3 = pnand %p3026_p1, %p3020_p2 }
  0x2b   : > { %3030 = shalt.err (!%p3027_p3)
}
  0x2c   : > { %2837 = dma.hbm_to_vmem [thread:$0]  (!%p3484_p6), %s4580_s1, 128, %s292_s19, [#allocation9]  }
  0x2d   : > { %s4582_s3 = sld [smem:[#allocation28_spill]] }
  0x33   : > { %s3031_s29 = scalar_lea.hbm %s4582_s3, 128 }
  0x34   : > { %p3032_p7 = scmp.ne.s32.totalorder %s4582_s3, %s3031_s29  ;;  %p3038_p1 = scmp.lt.u32.totalorder %s3031_s29, %s4582_s3 }
  0x36   : > { %p3034_p9 = pnand %p3032_p7, %p3498_p8 }
  0x38   : > { %p3035_p4 = pneg %p3034_p9 }
  0x3a   : > { %p3040_p3 = pnand %p3038_p1, %p3035_p4 }
  0x3c   : > { %3043 = shalt.err (!%p3040_p3)
}
  0x3d   : > { %s3044_s19 = scalar_lea.vmem %s3480_s23, 128  ;;  %p3052_p13 = scmp.lt.s32.totalorder %s3480_s23, %s3480_s23 }
  0x3e   : > { %p3045_p10 = scmp.ne.s32.totalorder %s3480_s23, %s3044_s19  ;;  %p3053_p0 = scmp.lt.s32.totalorder %s3044_s19, %s3044_s19 }
  0x40   : > { %p3047_p11 = pnand %p3045_p10, %p3498_p8  ;;  %p3054_p2 = por %p3053_p0, %p3052_p13 }
  0x42   : > { %p3048_p12 = pneg %p3047_p11 }
  0x44   : > { %p3055_p5 = pnand %p3054_p2, %p3048_p12 }
  0x46   : > { %3058 = shalt.err (!%p3055_p5)
}
  0x47   : > { %2843 = dma.hbm_to_vmem [thread:$0]  (!%p3484_p6), %s4582_s3, 128, %s3480_s23, [#allocation12]  }
  0x48   : > { %s3059_s28 = scalar_lea.hbm %s4524_s5, 256 }
  0x49   : > { %p3060_p7 = scmp.ne.s32.totalorder %s4524_s5, %s3059_s28  ;;  %p3066_p1 = scmp.lt.u32.totalorder %s3059_s28, %s4524_s5 }
  0x4b   : > { %p3062_p9 = pnand %p3060_p7, %p3498_p8 }
  0x4d   : > { %p3063_p4 = pneg %p3062_p9 }
  0x4f   : > { %p3068_p3 = pnand %p3066_p1, %p3063_p4 }
  0x51   : > { %3071 = shalt.err (!%p3068_p3)
}
  0x52   : > { %s3072_s23 = scalar_lea.vmem %s3488_s25, 256  ;;  %p3080_p13 = scmp.lt.s32.totalorder %s3488_s25, %s3488_s25 }
  0x53   : > { %p3073_p10 = scmp.ne.s32.totalorder %s3488_s25, %s3072_s23  ;;  %p3081_p0 = scmp.lt.s32.totalorder %s3072_s23, %s3072_s23 }
  0x55   : > { %p3075_p11 = pnand %p3073_p10, %p3498_p8  ;;  %p3082_p2 = por %p3081_p0, %p3080_p13 }
  0x57   : > { %p3076_p12 = pneg %p3075_p11 }
  0x59   : > { %p3083_p5 = pnand %p3082_p2, %p3076_p12 }
  0x5b   : > { %3086 = shalt.err (!%p3083_p5)
}
  0x5c   : > { %s3344_s14 = smov 128   ;;  %s3345_s19 = smov 8  }
  0x5d   : > { %2849 = dma.hbm_to_vmem [thread:$0]  (!%p3484_p6), %s4524_s5, 256, %s3488_s25, [#allocation15], %s3344_s14, %s3344_s14, %s3345_s19  }
  0x5e   : > { %s3346_s24 = smov [#allocation17]   ;;  %s3347_s28 = smov [#allocation10]  }
  0x5f   : > { %s361_s27 = sshll.u32 %s3346_s24, 4  ;;  %s302_s29 = sshll.u32 %s3347_s28, 4  ;;  %s362_s27 = int_to_ptr.vmem [resolvable:$true] %s361_s27  ;;  %s303_s29 = int_to_ptr.vmem [resolvable:$true] %s302_s29 }
  0x60   : > { %s3087_s13 = scalar_lea.hbm %s4526_s7, 128 }
  0x61   : > { %p3088_p7 = scmp.ne.s32.totalorder %s4526_s7, %s3087_s13  ;;  %p3094_p1 = scmp.lt.u32.totalorder %s3087_s13, %s4526_s7 }
  0x63   : > { %p3090_p9 = pnand %p3088_p7, %p3498_p8 }
  0x65   : > { %p3091_p4 = pneg %p3090_p9 }
  0x67   : > { %p3096_p3 = pnand %p3094_p1, %p3091_p4 }
  0x69   : > { %3099 = shalt.err (!%p3096_p3)
}
  0x6a   : > { %s3100_s25 = scalar_lea.vmem %s362_s27, 128  ;;  %p3108_p13 = scmp.lt.s32.totalorder %s362_s27, %s362_s27 }
  0x6b   : > { %p3101_p10 = scmp.ne.s32.totalorder %s362_s27, %s3100_s25  ;;  %p3109_p0 = scmp.lt.s32.totalorder %s3100_s25, %s3100_s25 }
  0x6d   : > { %p3103_p11 = pnand %p3101_p10, %p3498_p8  ;;  %p3110_p2 = por %p3109_p0, %p3108_p13 }
  0x6f   : > { %p3104_p12 = pneg %p3103_p11 }
  0x71   : > { %p3111_p5 = pnand %p3110_p2, %p3104_p12 }
  0x73   : > { %3114 = shalt.err (!%p3111_p5)
}
  0x74   : > { %2855 = dma.hbm_to_vmem [thread:$0]  (!%p3484_p6), %s4526_s7, 128, %s362_s27, [#allocation18]  }
  0x75   : > { %s3115_s19 = scalar_lea.hbm %s4521_s2, 64 }
  0x76   : > { %p3116_p7 = scmp.ne.s32.totalorder %s4521_s2, %s3115_s19  ;;  %p3122_p1 = scmp.lt.u32.totalorder %s3115_s19, %s4521_s2 }
  0x78   : > { %p3118_p9 = pnand %p3116_p7, %p3498_p8 }
  0x7a   : > { %p3119_p4 = pneg %p3118_p9 }
  0x7c   : > { %p3124_p3 = pnand %p3122_p1, %p3119_p4 }
  0x7e   : > { %3127 = shalt.err (!%p3124_p3)
}
  0x7f   : > { %s3128_s30 = scalar_lea.vmem %s303_s29, 64  ;;  %p3136_p13 = scmp.lt.s32.totalorder %s303_s29, %s303_s29 }
  0x80   : > { %p3129_p10 = scmp.ne.s32.totalorder %s303_s29, %s3128_s30  ;;  %p3137_p0 = scmp.lt.s32.totalorder %s3128_s30, %s3128_s30 }
  0x82   : > { %p3131_p11 = pnand %p3129_p10, %p3498_p8  ;;  %p3138_p2 = por %p3137_p0, %p3136_p13 }
  0x84   : > { %p3132_p12 = pneg %p3131_p11 }
  0x86   : > { %p3139_p5 = pnand %p3138_p2, %p3132_p12 }
  0x88   : > { %3142 = shalt.err (!%p3139_p5)
}
  0x89   : > { %2840 = dma.hbm_to_vmem [thread:$0]  (!%p3484_p6), %s4521_s2, 64, %s303_s29, [#allocation9]  }
  0x8a   : > { %s3348_s13 = smov [#allocation13]   ;;  %s3143_s14 = scalar_lea.hbm %s4523_s4, 128 }
  0x8b   : > { %s323_s23 = sshll.u32 %s3348_s13, 4  ;;  %p3144_p7 = scmp.ne.s32.totalorder %s4523_s4, %s3143_s14  ;;  %s324_s23 = int_to_ptr.vmem [resolvable:$true] %s323_s23 }
  0x8c   : > { %p3150_p1 = scmp.lt.u32.totalorder %s3143_s14, %s4523_s4 }
  0x8d   : > { %p3146_p9 = pnand %p3144_p7, %p3498_p8 }
  0x8f   : > { %p3147_p4 = pneg %p3146_p9 }
  0x91   : > { %p3152_p3 = pnand %p3150_p1, %p3147_p4 }
  0x93   : > { %3155 = shalt.err (!%p3152_p3)
}
  0x94   : > { %s3156_s29 = scalar_lea.vmem %s324_s23, 128  ;;  %p3164_p13 = scmp.lt.s32.totalorder %s324_s23, %s324_s23 }
  0x95   : > { %p3157_p10 = scmp.ne.s32.totalorder %s324_s23, %s3156_s29  ;;  %p3165_p0 = scmp.lt.s32.totalorder %s3156_s29, %s3156_s29 }
  0x97   : > { %p3159_p11 = pnand %p3157_p10, %p3498_p8  ;;  %p3166_p2 = por %p3165_p0, %p3164_p13 }
  0x99   : > { %p3160_p12 = pneg %p3159_p11 }
  0x9b   : > { %p3167_p5 = pnand %p3166_p2, %p3160_p12 }
  0x9d   : > { %3170 = shalt.err (!%p3167_p5)
}
  0x9e   : > { %s3349_s22 = smov 64   ;;  %s3350_s24 = smov 4  }
  0x9f   : > { %2846 = dma.hbm_to_vmem [thread:$0]  (!%p3484_p6), %s4523_s4, 128, %s324_s23, [#allocation12], %s3349_s22, %s3349_s22, %s3350_s24  }
  0xa0   : > { %s3351_s27 = smov [#allocation16]   ;;  %s3352_s13 = smov [#allocation19]  }
  0xa1   : > { %s350_s11 = sshll.u32 %s3351_s27, 4  ;;  %s372_s25 = sshll.u32 %s3352_s13, 4  ;;  %s351_s11 = int_to_ptr.vmem [resolvable:$true] %s350_s11  ;;  %s3614_s25 = int_to_ptr.vmem [resolvable:$true] %s372_s25 }
  0xa2   : > { %s3171_s3 = scalar_lea.hbm %s4525_s6, 128 }
  0xa3   : > { %p3172_p7 = scmp.ne.s32.totalorder %s4525_s6, %s3171_s3  ;;  %p3178_p1 = scmp.lt.u32.totalorder %s3171_s3, %s4525_s6 }
  0xa5   : > { %p3174_p9 = pnand %p3172_p7, %p3498_p8 }
  0xa7   : > { %p3175_p4 = pneg %p3174_p9 }
  0xa9   : > { %p3180_p3 = pnand %p3178_p1, %p3175_p4 }
  0xab   : > { %3183 = shalt.err (!%p3180_p3)
}
  0xac   : > { %s3184_s29 = scalar_lea.vmem %s351_s11, 128  ;;  %p3192_p13 = scmp.lt.s32.totalorder %s351_s11, %s351_s11 }
  0xad   : > { %p3185_p10 = scmp.ne.s32.totalorder %s351_s11, %s3184_s29  ;;  %p3193_p0 = scmp.lt.s32.totalorder %s3184_s29, %s3184_s29 }
  0xaf   : > { %p3187_p11 = pnand %p3185_p10, %p3498_p8  ;;  %p3194_p2 = por %p3193_p0, %p3192_p13 }
  0xb1   : > { %p3188_p12 = pneg %p3187_p11 }
  0xb3   : > { %p3195_p5 = pnand %p3194_p2, %p3188_p12 }
  0xb5   : > { %3198 = shalt.err (!%p3195_p5)
}
  0xb6   : > { %2852 = dma.hbm_to_vmem [thread:$0]  (!%p3484_p6), %s4525_s6, 128, %s351_s11, [#allocation15]  }
  0xb7   : > { %s3199_s27 = scalar_lea.hbm %s4527_s8, 16 }
  0xb8   : > { %p3200_p7 = scmp.ne.s32.totalorder %s4527_s8, %s3199_s27  ;;  %p3206_p1 = scmp.lt.u32.totalorder %s3199_s27, %s4527_s8 }
  0xba   : > { %p3202_p9 = pnand %p3200_p7, %p3498_p8 }
  0xbc   : > { %p3203_p4 = pneg %p3202_p9 }
  0xbe   : > { %p3208_p3 = pnand %p3206_p1, %p3203_p4 }
  0xc0   : > { %3211 = shalt.err (!%p3208_p3)
}
  0xc1   : > { %s3212_s11 = scalar_lea.vmem %s3614_s25, 16  ;;  %s3219_s10 = scalar_lea.vmem %s3614_s25, 32 }
  0xc2   : > { %p3213_p10 = scmp.ne.s32.totalorder %s3614_s25, %s3212_s11  ;;  %p3220_p13 = scmp.lt.s32.totalorder %s3614_s25, %s3614_s25 }
  0xc3   : > { %p3221_p0 = scmp.lt.s32.totalorder %s3219_s10, %s3212_s11 }
  0xc4   : > { %p3215_p11 = pnand %p3213_p10, %p3498_p8 }
  0xc5   : > { %p3222_p2 = por %p3221_p0, %p3220_p13 }
  0xc6   : > { %p3216_p12 = pneg %p3215_p11 }
  0xc8   : > { %p3223_p5 = pnand %p3222_p2, %p3216_p12 }
  0xca   : > { %3226 = shalt.err (!%p3223_p5)
}
  0xcb   : > { %2858 = dma.hbm_to_vmem [thread:$0]  (!%p3484_p6), %s4527_s8, 16, %s3614_s25, [#allocation18]  }
  0xcc   : > { %s2674_s26 = sadd.s32 4294967294, %s3339_s18   ;;  %s3660_s12 = sadd.s32 1, %s3339_s18  }
  0xcd   : > { %s36_s23 = ssub.s32 %s3339_s18, %s3660_s12  ;;  %s39_s29 = sadd.s32 1, %s3335_s17 }
  0xce   : > { %p37_p8 = scmp.eq.s32.totalorder %s36_s23, 0  ;;  %p46_p7 = scmp.ne.s32.totalorder %s3335_s17, %s3331_s16 }
  0xcf   : > { %p47_p9 = scmp.eq.s32.totalorder %s3339_s18, 0  ;;  %p52_p4 = scmp.ne.s32.totalorder %s3331_s16, %s3327_s15 }
  0xd0   : > { %s3671_s22 = scalar_select %p37_p8, %s3335_s17, %s39_s29  }
  0xd1   : > { %p3673_p1 = por %p47_p9, %p46_p7  ;;  %p4584_p3 = scmp.eq.s32.totalorder %s3468_s20, 0 }
  0xd2   : > { %p265_p10 = scmp.eq.s32.totalorder %s3468_s20, 1  ;;  %p271_p11 = scmp.eq.s32.totalorder %s2674_s26, 1 }
  0xd3   : > { %p3679_p6 = por %p4584_p3, %p52_p4  ;;  %p2875_p12 = scmp.lt.s32.totalorder %s3339_s18, 2 }
  0xd4   : > { %s386_s28 = sand.u32 1, %s3335_s17   ;;  %p3686_p13 = por %p265_p10, %p46_p7 }
  0xd5   : > { %p3690_p0 = por %p271_p11, %p52_p4  ;;  %s2685_s13 = sshll.u32 %s386_s28, 4 }
  0xd6   : > { %s4586_s30 = scalar_select %p3686_p13, 1, 0 }
  0xd7   : > { %s4587_s27 = scalar_select %p3690_p0, 1, 0 }
  0xd8   : > { %s2787_s1 = sshll.u32 %s3339_s18, 8  ;;  %s390_s10 = scalar_lea.vmem [#allocation5], %s2685_s13 }
  0xd9   : > { %s3698_s11 = scalar_lea.hbm %s4519_s0, %s2787_s1  ;;  %s398_s19 = sshll.u32 %s390_s10, 4  ;;  %s3700_s19 = int_to_ptr.vmem [resolvable:$true] %s398_s19 }
  0xda   : > { %p3704_p2 = pnand %p2875_p12, %p3673_p1  ;;  %s387_s26 = scalar_lea.sflag [#allocation6], %s386_s28 }
  0xdb   : > { %s3227_s23 = scalar_lea.hbm %s3698_s11, 256  ;;  %s3232_s1 = scalar_lea.hbm %s4519_s0, 512 }
  0xdc   : > { %p3228_p5 = scmp.ne.s32.totalorder %s3698_s11, %s3227_s23  ;;  %p3229_p8 = pneg %p3704_p2 }
  0xdd   : > { %p3233_p4 = scmp.lt.u32.totalorder %s3698_s11, %s4519_s0  ;;  %p3234_p1 = scmp.lt.u32.totalorder %s3232_s1, %s3227_s23 }
  0xde   : > { %p3230_p7 = pnand %p3229_p8, %p3228_p5  ;;  %p3236_p10 = scmp.lt.u32.totalorder %s3227_s23, %s3698_s11 }
  0xdf   : > { %p3235_p3 = por %p3234_p1, %p3233_p4 }
  0xe0   : > { %p3231_p9 = pneg %p3230_p7 }
  0xe1   : > { %p3237_p11 = por %p3236_p10, %p3235_p3 }
  0xe3   : > { %p3238_p12 = pnand %p3237_p11, %p3231_p9 }
  0xe5   : > { %3241 = shalt.err (!%p3238_p12)
}
  0xe6   : > { %s3242_s28 = scalar_lea.vmem %s3700_s19, 256  ;;  %s3353_s3 = smov [#allocation5]  }
  0xe7   : > { %p3243_p5 = scmp.ne.s32.totalorder %s3700_s19, %s3242_s28  ;;  %s3247_s10 = sshll.u32 %s3353_s3, 4  ;;  %s3248_s10 = int_to_ptr.vmem [resolvable:$false] %s3247_s10 }
  0xe8   : > { %s3249_s29 = scalar_lea.vmem %s3248_s10, 512  ;;  %p3250_p13 = scmp.lt.s32.totalorder %s3700_s19, %s3248_s10 }
  0xe9   : > { %p3245_p7 = pnand %p3243_p5, %p3229_p8  ;;  %p3251_p4 = scmp.lt.s32.totalorder %s3249_s29, %s3242_s28 }
  0xeb   : > { %p3246_p0 = pneg %p3245_p7  ;;  %p3252_p1 = por %p3251_p4, %p3250_p13 }
  0xed   : > { %p3253_p3 = pnand %p3252_p1, %p3246_p0 }
  0xef   : > { %3256 = shalt.err (!%p3253_p3)
}
  0xf0   : > { %2862 = dma.hbm_to_vmem [thread:$0]  (!%p3704_p2), %s3698_s11, 256, %s3700_s19, %s387_s26  }
  0xf1   : > { %p4589_p9 = scmp.ne.s32.totalorder %s4578_s21, 0 }
  0xf2   : > { %s3736_s23 = sand.u32 (!%p4589_p9), 1, %s3331_s16  }
  0xf3   : > { %407 = sbr.rel (%p4589_p9) target bundleno = 2883 (0xb43), region = 60  ;;  %s2689_s13 = sshll.u32 (!%p4589_p9), %s3736_s23, 4 }
  0xf4   : > { %s410_s1 = scalar_lea.sflag (!%p4589_p9), [#allocation6], %s3736_s23  ;;  %s3740_s24 = scalar_lea.vmem (!%p4589_p9), [#allocation5], %s2689_s13 }
  0xfa   : > { %3302 = dma.done.wait (%p3679_p6), %s410_s1, 256  }
  0xfb   : > { %3304 = vsyncadd (%p3679_p6), %s410_s1, 4294967040  ;;  %p4590_p13 = scmp.eq.s32.totalorder %s3468_s20, 0 }
  0xfd   : > { %3306 = dma.done.wait (%p4590_p13), [#allocation9], 192   ;;  %p4591_p0 = pmov %p4590_p13 }
  0xff   : > { %3308 = vsyncadd (%p4591_p0), [#allocation9], 4294967104  ;;  %p4592_p2 = pmov %p4591_p0 }
 0x100   : > { %p4593_p8 = pmov %p4591_p0 }
 0x101   : > { %3310 = dma.done.wait (%p4592_p2), [#allocation12], 256  }
 0x102   : > { %3312 = vsyncadd (%p4593_p8), [#allocation12], 4294967040  ;;  %p4594_p10 = pmov %p4591_p0 }
 0x103   : > { %p4595_p11 = pmov %p4591_p0 }
 0x104   : > { %3314 = dma.done.wait (%p4594_p10), [#allocation15], 384  }
 0x105   : > { %3316 = vsyncadd (%p4595_p11), [#allocation15], 4294966912  ;;  %p4596_p6 = pmov %p4591_p0 }
 0x106   : > { %p4597_p12 = pmov %p4591_p0 }
 0x107   : > { %3318 = dma.done.wait (%p4596_p6), [#allocation18], 144  }
 0x108   : > { %3320 = vsyncadd (%p4597_p12), [#allocation18], 4294967152  ;;  %v499_v1 = vlaneseq  ;;  %vm4546_vm0 = vcmask 273408   ;;  %vm490_vm1 = vcmask 552208   ;;  %v3354_v2 = vmov 0   ;;  %v3784_v7 = vld [vmem:[#allocation8] sm:$0xff] }
 0x109   : > { %487 = vst.msk [vmem:[#allocation2] sm:$0xf] %vm4546_vm0, %v3354_v2  ;;  %488 = vst.msk [vmem:[#allocation2 + $0xc] sm:$0xf] %vm4546_vm0, %v3354_v2  ;;  %889 = vmatprep.mubr.bf16.mxu1 %v3354_v2  ;;  %2983 = vset.pattern.permute.xlu1 %v3354_v2  ;;  %v541_v10 = vshrl.u32 %v3784_v7, 16  ;;  %v602_v11 = vrot.slane %v3784_v7, 5 }
 0x10a   : > { %489 = vst.msk [vmem:[#allocation2 + $0x18] sm:$0xf] %vm4546_vm0, %v3354_v2  ;;  %v3771_v3 = vshrl.u32 %v499_v1, 7  ;;  %2994 = vset.pattern.permute.xlu0 %v3354_v2  ;;  %v2699_v6 = vld [vmem:[%s3740_s24 + $0x4] ss:$8 sm:$0x3] }
 0x10b   : > { %491 = vst.msk [vmem:[#allocation2 + $0x8] sm:$0xf] %vm490_vm1, %v3354_v2  ;;  %492 = vst.msk [vmem:[#allocation2 + $0x14] sm:$0xf] %vm490_vm1, %v3354_v2  ;;  %v543_v13 = vrot.slane %v541_v10, 4  ;;  %s3355_s21 = smov 34  }
 0x10c   : > { %493 = vst.msk [vmem:[#allocation2 + $0x20] sm:$0xf] %vm490_vm1, %v3354_v2  ;;  %v3778_v4 = vsub.s32 0, %v3771_v3  ;;  %v3781_v5 = vsub.s32 1, %v3771_v3  ;;  %v603_v15 = vrot.slane %v602_v11, 4  ;;  %s3356_s25 = smov 49  }
 0x10d   : > { %v544_v14 = vrot.slane %v543_v13, 4  ;;  %s3357_s11 = smov 19   ;;  %s3358_s19 = smov 17   ;;  %vm523_vm2 = vcmask 1040656   ;;  %vm524_vm3 = vsmask.f32 256 }
 0x10e   : > { %v502_v8 = vrot.slane %v2699_v6, %v3778_v4  ;;  %v506_v9 = vrot.slane %v2699_v6, %v3781_v5  ;;  %s3359_s9 = smov 33   ;;  %s3360_s26 = smov 35   ;;  %vm4552_vm4 = vcmask 1044484   ;;  %vm527_vm5 = vsmask.f32 4352  ;;  %vm525_vm6 = vmand %vm523_vm2, %vm524_vm3 }
 0x10f   : > { %739 = vrot.lane.b32.xlu1 %v544_v14, %s3356_s25  ;;  %s4574_s14 = smov 51   ;;  %vm533_vm7 = vcmask 270336   ;;  %vm3799_vm8 = vmand %vm4552_vm4, %vm527_vm5  ;;  %v4598_v16 = vmov 0  ;;  %vm4547_vm9 = vcmask 277504   ;;  %vm4544_vm12 = vcmask 138240   ;;  %s4538_s28 = smov 111  }
 0x110   : > { %v2788_v12 = vpack.c.bf16 %v506_v9, %v502_v8  ;;  %v4599_v16 = vsel %vm3799_vm8, 4294967295, %v4598_v16  ;;  %vm534_vm10 = vmand %vm533_vm7, %vm524_vm3  ;;  %v530_v20 = vld [vmem:[#allocation2] sm:$0x11]  ;;  %vm4543_vm13 = vcmask 154624   ;;  %vm4542_vm14 = vcmask 269312   ;;  %s3363_s3 = smov 94  }
 0x111   : > { %vm529_vm11 = vmor %vm3799_vm8, %vm525_vm6  ;;  %vm4545_vm15 = vcmask 285696   ;;  %vm4541_vm1 = vcmask 400384   ;;  %s4534_s10 = smov 109   ;;  %s4536_s29 = smov 79   ;;  %vm4540_vm2 = vcmask 416768   ;;  %vm4551_vm5 = vcmask 1040384  }
 0x112   : > { %516 = vrot.lane.b32.xlu0 %v2788_v12, %s3355_s21  ;;  %v535_v18 = vld [vmem:[#allocation2 + $0x8] sm:$0x1]  ;;  %s4566_s13 = smov 78   ;;  %s4572_s1 = smov 110   ;;  %vm4549_vm6 = vcmask 1042434  }
 0x113   : > { %545 = vrot.lane.b32.xlu1 %v544_v14, %s3358_s19  ;;  %vm691_vm7 = vsmask.f32 2304  ;;  %vm628_vm0 = vsmask.f32 1280  ;;  %vm763_vm4 = vsmask.f32 3328 }
 0x114   : > { %p4751_p7 = scmp.ne.s32.totalorder %s4586_s30, 0 }
 0x116   : > { %604 = vrot.lane.b32.xlu0 %v603_v15, %s3357_s11 }
 0x117   : > { %702 = vrot.lane.b32.xlu1 %v603_v15, %s3360_s26 }
 0x11a   : > { %639 = vrot.lane.b32.xlu0 %v544_v14, %s3359_s9 }
 0x11e   : > { %802 = vrot.lane.b32.xlu0 %v603_v15, %s4574_s14  ;;  %s3380_s14 = smov 68  }
 0x181   : > { %v740_v21 = vpop.permute.xlu1 %739 }
 0x182   : > { %v741_v43 = vrot.slane %v740_v21, 4 }
 0x184   : > { %v517_v17 = vpop.permute.xlu0 %516  ;;  %v743_v58 = vsel %vm4541_vm1, %v741_v43, %v740_v21  ;;  %vm4561_vm1 = vcmask 1043456  }
 0x185   : > { %v518_v19 = vrot.slane %v517_v17, 4  ;;  %v546_v26 = vpop.permute.xlu1 %545 }
 0x186   : > { %v547_v27 = vrot.slane %v546_v26, 4 }
 0x187   : > { %v520_v22 = vsel %vm4547_vm9, %v518_v19, %v517_v17  ;;  %v536_v23 = vsel %vm534_vm10, %v518_v19, %v535_v18  ;;  %vm4548_vm10 = vcmask 1046534   ;;  %vm631_vm9 = vsmask.f32 5376 }
 0x188   : > { %v531_v24 = vsel %vm529_vm11, %v520_v22, %v530_v20  ;;  %537 = vst [vmem:[#allocation2 + $0x8] sm:$0x1] %v536_v23  ;;  %v605_v25 = vpop.permute.xlu0 %604  ;;  %v549_v32 = vsel %vm4544_vm12, %v547_v27, %v546_v26  ;;  %vm694_vm11 = vsmask.f32 6400 }
 0x189   : > { %532 = vst [vmem:[#allocation2] sm:$0x11] %v531_v24  ;;  %v703_v29 = vpop.permute.xlu1 %702  ;;  %v606_v30 = vrot.slane %v605_v25, 4  ;;  %vm3839_vm12 = vmand %vm4548_vm10, %vm694_vm11  ;;  %vm4556_vm10 = vcmask 769024  }
 0x18a   : > { %v704_v34 = vrot.slane %v703_v29, 4 }
 0x18b   : > { %v608_v39 = vsel %vm4543_vm13, %v606_v30, %v605_v25  ;;  %vm4550_vm13 = vcmask 908288  }
 0x18c   : > { %v640_v28 = vpop.permute.xlu0 %639  ;;  %v706_v49 = vsel %vm4545_vm15, %v704_v34, %v703_v29  ;;  %vm4554_vm15 = vcmask 1041409  }
 0x18d   : > { %v641_v33 = vrot.slane %v640_v28, 4 }
 0x18f   : > { %v539_v31 = vld [vmem:[#allocation2 + $0x8] sm:$0x1]  ;;  %v643_v46 = vsel %vm4542_vm14, %v641_v33, %v640_v28  ;;  %vm3834_vm14 = vmand %vm4549_vm6, %vm691_vm7  ;;  %vm4555_vm7 = vcmask 1045509  }
 0x190   : > { %v538_v35 = vld [vmem:[#allocation2] sm:$0x11]  ;;  %v553_v36 = vmul.bf16 %v547_v27, %v539_v31  ;;  %v675_v38 = vld [vmem:[#allocation2 + $0x8] sm:$0x1]  ;;  %v803_v24 = vpop.permute.xlu0 %802  ;;  %vm696_vm11 = vmor %vm3839_vm12, %vm3834_vm14  ;;  %vm4614_vm14 = vsmask.f32 7954 }
 0x191   : > { %v552_v37 = vmul.bf16 %v549_v32, %v538_v35  ;;  %v674_v40 = vld [vmem:[#allocation2] sm:$0x11]  ;;  %v600_v41 = vld [vmem:[#allocation2 + $0x8] sm:$0x1]  ;;  %v679_v50 = vrot.slane %v675_v38, 6  ;;  %v804_v31 = vrot.slane %v803_v24, 4  ;;  %vm3859_vm6 = vmand %vm4554_vm15, %vm628_vm0 }
 0x192   : > { %v599_v42 = vld [vmem:[#allocation2] sm:$0x11]  ;;  %v638_v44 = vld [vmem:[#allocation2 + $0x8] sm:$0x1]  ;;  %558 = vrot.lane.b32.xlu0 %v553_v36, %s4538_s28  ;;  %v678_v51 = vrot.slane %v674_v40, 6  ;;  %v612_v52 = vmul.bf16 %v606_v30, %v600_v41  ;;  %v4600_v40 = vmov 0 }
 0x193   : > { %556 = vrot.lane.b32.xlu1 %v552_v37, %s4538_s28  ;;  %v637_v45 = vld [vmem:[#allocation2] sm:$0x11]  ;;  %v701_v48 = vld [vmem:[#allocation2 + $0x8] sm:$0x1]  ;;  %v611_v53 = vmul.bf16 %v608_v39, %v599_v42  ;;  %v647_v60 = vmul.bf16 %v641_v33, %v638_v44  ;;  %s4564_s28 = smov 77   ;;  %v829_v39 = vld [vmem:[#allocation11] sm:$0xff] }
 0x194   : > { %v700_v47 = vld [vmem:[#allocation2] sm:$0x11]  ;;  %v738_v54 = vld [vmem:[#allocation2 + $0x8] sm:$0x1]  ;;  %v646_v59 = vmul.bf16 %v643_v46, %v637_v45  ;;  %v710_v62 = vmul.bf16 %v704_v34, %v701_v48  ;;  %v616_v6 = vrot.slane %v612_v52, 7  ;;  %v806_v34 = vsel %vm4540_vm2, %v804_v31, %v803_v24  ;;  %vm3829_vm2 = vmand %vm4551_vm5, %vm524_vm3 }
 0x195   : > { %v737_v55 = vld [vmem:[#allocation2] sm:$0x11]  ;;  %v773_v57 = vld [vmem:[#allocation2 + $0x8] sm:$0x1]  ;;  %v709_v61 = vmul.bf16 %v706_v49, %v700_v47  ;;  %v747_v63 = vmul.bf16 %v741_v43, %v738_v54  ;;  %v615_v8 = vrot.slane %v611_v53, 7  ;;  %v653_v14 = vshll.u32 %v647_v60, 16  ;;  %vm4553_vm3 = vmor %vm3799_vm8, %vm3829_vm2 }
 0x196   : > { %v772_v56 = vld [vmem:[#allocation2] sm:$0x11]  ;;  %682 = vrot.lane.b32.xlu0 %v679_v50, %s3363_s3  ;;  %v746_v0 = vmul.bf16 %v743_v58, %v737_v55  ;;  %v779_v10 = vshll.u32 %v773_v57, 16  ;;  %v574_v12 = vld [vmem:[#allocation2 + $0x8] sm:$0x1]  ;;  %v649_v13 = vshll.u32 %v646_v59, 16 }
 0x197   : > { %680 = vrot.lane.b32.xlu1 %v678_v51, %s3363_s3  ;;  %v775_v9 = vshll.u32 %v772_v56, 16  ;;  %v573_v11 = vld [vmem:[#allocation2] sm:$0x11]  ;;  %v712_v15 = vshll.u32 %v709_v61, 16  ;;  %v716_v17 = vshll.u32 %v710_v62, 16  ;;  %v751_v18 = vrot.slane %v747_v63, 5 }
 0x198   : > { %v750_v19 = vrot.slane %v746_v0, 5  ;;  %v781_v21 = vrot.slane %v779_v10, 5  ;;  %v576_v22 = vshll.u32 %v573_v11, 16  ;;  %v579_v23 = vshll.u32 %v574_v12, 16  ;;  %v801_v35 = vld [vmem:[#allocation2 + $0x8] sm:$0x1] }
 0x199   : > { %v777_v20 = vrot.slane %v775_v9, 5  ;;  %v651_v25 = vrot.slane %v649_v13, 7  ;;  %v655_v26 = vrot.slane %v653_v14, 7  ;;  %v714_v27 = vrot.slane %v712_v15, 6  ;;  %v800_v36 = vld [vmem:[#allocation2] sm:$0x11] }
 0x19a   : > { %619 = vrot.lane.b32.xlu0 %v616_v6, %s4534_s10  ;;  %v2963_v29 = vpack.i.bf16 %v579_v23, %v576_v22  ;;  %v718_v30 = vrot.slane %v716_v17, 6  ;;  %v810_v37 = vmul.bf16 %v804_v31, %v801_v35  ;;  %v809_v38 = vmul.bf16 %v806_v34, %v800_v36  ;;  %v570_v47 = vld [vmem:[#allocation3] sm:$0x11]  ;;  %v697_v56 = vld [vmem:[#allocation3] sm:$0x44] }
 0x19b   : > { %617 = vrot.lane.b32.xlu1 %v615_v8, %s4534_s10  ;;  %v2968_v28 = vpack.i.bf16 %v781_v21, %v777_v20  ;;  %v2973_v32 = vpack.i.bf16 %v655_v26, %v651_v25  ;;  %s4570_s10 = smov 95   ;;  %v4601_v40 = vsel %vm3829_vm2, 4294967295, %v4600_v40  ;;  %vm4559_vm5 = vcmask 1043459   ;;  %v634_v6 = vld [vmem:[#allocation3] sm:$0x22] }
 0x19c   : > { %v2978_v33 = vpack.i.bf16 %v718_v30, %v714_v27  ;;  %vm4557_vm0 = vcmask 1047559   ;;  %vm766_vm15 = vsmask.f32 7424  ;;  %v769_v20 = vld [vmem:[#allocation3] sm:$0x88]  ;;  %vm4638_vm2 = vcmask 1046534  }
 0x19d   : > { %vm3887_vm12 = vmand %vm4557_vm0, %vm766_vm15  ;;  %vm4560_vm15 = vcmask 646144   ;;  %vm729_vm0 = vsmask.f32 7946  ;;  %v826_v25 = vld [vmem:[#allocation10] sm:$0xf] }
 0x19e   : > { %754 = vrot.lane.b32.xlu0 %v751_v18, %s4536_s29 }
 0x19f   : > { %752 = vrot.lane.b32.xlu1 %v750_v19, %s4536_s29  ;;  %s4568_s29 = smov 93  }
 0x1a2   : > { %2969 = vrot.lane.b32.xlu0 %v2968_v28, %s4566_s13  ;;  %s3374_s13 = smov 50  }
 0x1a3   : > { %2964 = vrot.lane.b32.xlu1 %v2963_v29, %s4572_s1  ;;  %s3379_s1 = smov 36  }
 0x1a6   : > { %2974 = vrot.lane.b32.xlu0 %v2973_v32, %s4570_s10  ;;  %s3378_s10 = smov 64  }
 0x1a7   : > { %2979 = vrot.lane.b32.xlu1 %v2978_v33, %s4568_s29  ;;  %s3377_s29 = smov 4  }
 0x1aa   : > { %815 = vrot.lane.b32.xlu0 %v810_v37, %s4564_s28 }
 0x1ab   : > { %813 = vrot.lane.b32.xlu1 %v809_v38, %s4564_s28  ;;  %s3372_s28 = smov 2  }
 0x1af   : > { %832 = vperm.xlu1 %2983, %v829_v39  }
 0x204   : > { %v559_v41 = vpop.permute.xlu0 %558 }
 0x205   : > { %v557_v42 = vpop.permute.xlu1 %556  ;;  %v561_v44 = vrot.slane %v559_v41, 4 }
 0x206   : > { %v560_v45 = vrot.slane %v557_v42, 4 }
 0x208   : > { %v563_v48 = vsel %vm4561_vm1, %v560_v45, %v561_v44  ;;  %v683_v50 = vpop.permute.xlu0 %682 }
 0x209   : > { %v565_v49 = vsel %vm4550_vm13, %v557_v42, %v563_v48  ;;  %v681_v51 = vpop.permute.xlu1 %680  ;;  %v685_v53 = vrot.slane %v683_v50, 4  ;;  %vm3864_vm13 = vmand %vm4555_vm7, %vm631_vm9  ;;  %vm4558_vm9 = vcmask 891904  }
 0x20a   : > { %v571_v52 = vsel %vm4553_vm3, %v565_v49, %v570_v47  ;;  %v684_v54 = vrot.slane %v681_v51, 4  ;;  %vm633_vm7 = vmor %vm3864_vm13, %vm3859_vm6  ;;  %vm591_vm3 = vsmask.f32 7938 }
 0x20b   : > { %572 = vst [vmem:[#allocation3] sm:$0x11] %v571_v52 }
 0x20c   : > { %v686_v58 = vsel %vm4561_vm1, %v684_v54, %v685_v53  ;;  %v620_v60 = vpop.permute.xlu0 %619 }
 0x20d   : > { %v688_v59 = vsel %vm4556_vm10, %v681_v51, %v686_v58  ;;  %v618_v61 = vpop.permute.xlu1 %617  ;;  %v622_v63 = vrot.slane %v620_v60, 4  ;;  %vm3881_vm10 = vmand %vm4559_vm5, %vm763_vm4  ;;  %vm4618_vm4 = vcmask 1040384  }
 0x20e   : > { %v698_v62 = vsel %vm696_vm11, %v688_v59, %v697_v56  ;;  %v621_v0 = vrot.slane %v618_v61, 4  ;;  %vm4615_vm11 = vcmask 1044484   ;;  %vm3899_vm6 = vmand %vm4618_vm4, %vm591_vm3  ;;  %vm668_vm3 = vsmask.f32 7958 }
 0x20f   : > { %699 = vst [vmem:[#allocation3] sm:$0x44] %v698_v62  ;;  %vm3893_vm13 = vmand %vm4615_vm11, %vm4614_vm14  ;;  %vm666_vm11 = vsmask.f32 7942 }
 0x210   : > { %v623_v9 = vsel %vm4561_vm1, %v621_v0, %v622_v63  ;;  %v755_v13 = vpop.permute.xlu0 %754  ;;  %vm768_vm14 = vmor %vm3887_vm12, %vm3881_vm10  ;;  %vm4624_vm10 = vcmask 1041409  }
 0x211   : > { %v625_v12 = vsel %vm4558_vm9, %v618_v61, %v623_v9  ;;  %v753_v14 = vpop.permute.xlu1 %752  ;;  %v757_v18 = vrot.slane %v755_v13, 4  ;;  %vm4621_vm9 = vcmask 1042434   ;;  %vm3919_vm12 = vmand %vm4624_vm10, %vm666_vm11  ;;  %vm4634_vm10 = vcmask 1045509   ;;  %v823_v9 = vld [vmem:[#allocation3 + $0x8] sm:$0x11] }
 0x212   : > { %v635_v17 = vsel %vm633_vm7, %v625_v12, %v634_v6  ;;  %v756_v19 = vrot.slane %v753_v14, 4  ;;  %vm792_vm7 = vsmask.f32 7950  ;;  %vm3914_vm5 = vmand %vm4621_vm9, %vm729_vm0  ;;  %vm4630_vm0 = vsmask.f32 7966 }
 0x213   : > { %636 = vst [vmem:[#allocation3] sm:$0x22] %v635_v17  ;;  %vm4631_vm9 = vcmask 1047559   ;;  %vm663_vm11 = vcmask 777216   ;;  %v596_v49 = vld [vmem:[#allocation3] sm:$0x11] }
 0x214   : > { %v758_v21 = vsel %vm4561_vm1, %v756_v19, %v757_v18  ;;  %v2970_v23 = vpop.permute.xlu0 %2969  ;;  %vm4627_vm1 = vcmask 1043459   ;;  %v3371_v18 = vmov 65535  }
 0x215   : > { %v760_v22 = vsel %vm4560_vm15, %v753_v14, %v758_v21  ;;  %v2965_v24 = vpop.permute.xlu1 %2964  ;;  %v2972_v27 = vunpack.i.h.bf16 %v2970_v23  ;;  %v2971_v28 = vunpack.i.l.bf16 %v2970_v23  ;;  %vm3925_vm4 = vmand %vm4627_vm1, %vm792_vm7  ;;  %vm789_vm1 = vcmask 637952  }
 0x216   : > { %v770_v26 = vsel %vm768_vm14, %v760_v22, %v769_v20  ;;  %v2967_v29 = vunpack.i.h.bf16 %v2965_v24  ;;  %v2966_v31 = vunpack.i.l.bf16 %v2965_v24  ;;  %vm3931_vm14 = vmand %vm4631_vm9, %vm4630_vm0  ;;  %vm4637_vm7 = vsmask.f32 7962  ;;  %v734_v11 = vld [vmem:[#allocation3] sm:$0x44] }
 0x217   : > { %771 = vst [vmem:[#allocation3] sm:$0x88] %v770_v26  ;;  %v787_v33 = vrot.slane %v2972_v27, 4  ;;  %v786_v34 = vrot.slane %v2971_v28, 4  ;;  %vm3936_vm15 = vmand %vm4634_vm10, %vm668_vm3  ;;  %vm4641_vm0 = vcmask 1043456   ;;  %vm4643_vm10 = vcmask 900096  }
 0x218   : > { %v586_v35 = vrot.slane %v2967_v29, 4  ;;  %v585_v37 = vrot.slane %v2966_v31, 4  ;;  %v2975_v38 = vpop.permute.xlu0 %2974  ;;  %vm3942_vm8 = vmand %vm4638_vm2, %vm4637_vm7  ;;  %vm4645_vm2 = vcmask 1043456  }
 0x219   : > { %v2980_v39 = vpop.permute.xlu1 %2979  ;;  %v2977_v42 = vunpack.i.h.bf16 %v2975_v38  ;;  %v2976_v43 = vunpack.i.l.bf16 %v2975_v38  ;;  %v788_v46 = vsel %vm4641_vm0, %v786_v34, %v787_v33  ;;  %vm4642_vm9 = vmmov %vm4641_vm0  ;;  %vm726_vm0 = vcmask 760832  }
 0x21a   : > { %v2982_v44 = vunpack.i.h.bf16 %v2980_v39  ;;  %v587_v47 = vsel %vm4642_vm9, %v585_v37, %v586_v35  ;;  %v2981_v48 = vunpack.i.l.bf16 %v2980_v39  ;;  %vm796_vm3 = vmor %vm3931_vm14, %vm3925_vm4  ;;  %vm820_vm9 = vcmask 629760   ;;  %v671_v6 = vld [vmem:[#allocation3] sm:$0x22] }
 0x21b   : > { %v589_v50 = vsel %vm4643_vm10, %v2966_v31, %v587_v47  ;;  %v661_v51 = vrot.slane %v2977_v42, 4  ;;  %v660_v52 = vrot.slane %v2976_v43, 4  ;;  %vm4644_vm7 = vmor %vm3893_vm13, %vm3899_vm6  ;;  %v790_v58 = vsel %vm789_vm1, %v2971_v28, %v788_v46 }
 0x21c   : > { %v724_v53 = vrot.slane %v2982_v44, 4  ;;  %v597_v54 = vsel %vm4644_vm7, %v589_v50, %v596_v49  ;;  %v723_v55 = vrot.slane %v2981_v48, 4  ;;  %v816_v56 = vpop.permute.xlu0 %815  ;;  %vm733_vm10 = vmor %vm3942_vm8, %vm3914_vm5  ;;  %vm4648_vm4 = vnez %v4599_v16 }
 0x21d   : > { %v814_v57 = vpop.permute.xlu1 %813  ;;  %598 = vst [vmem:[#allocation3] sm:$0x11] %v597_v54  ;;  %v662_v60 = vsel %vm4645_vm2, %v660_v52, %v661_v51  ;;  %v818_v61 = vrot.slane %v816_v56, 4  ;;  %vm4646_vm13 = vmmov %vm4645_vm2  ;;  %vm848_vm14 = vcmask 1044480   ;;  %vm843_vm8 = vcmask 72704  }
 0x21e   : > { %v797_v59 = vld [vmem:[#allocation3] sm:$0x88]  ;;  %v817_v62 = vrot.slane %v814_v57, 4  ;;  %v664_v0 = vsel %vm663_vm11, %v2976_v43, %v662_v60  ;;  %v725_v8 = vsel %vm4646_vm13, %v723_v55, %v724_v53  ;;  %vm4647_vm6 = vmor %vm3936_vm15, %vm3919_vm12  ;;  %vm4649_vm15 = vnez %v4601_v40 }
 0x21f   : > { %v798_v63 = vsel %vm796_vm3, %v790_v58, %v797_v59  ;;  %v672_v10 = vsel %vm4647_vm6, %v664_v0, %v671_v6  ;;  %v727_v12 = vsel %vm726_vm0, %v2981_v48, %v725_v8  ;;  %vm4650_vm12 = vmor %vm4648_vm4, %vm4649_vm15  ;;  %vm495_vm5 = vcmp.gt.bf16.partialorder %v3784_v7, 1056980736 }
 0x220   : > { %799 = vst [vmem:[#allocation3] sm:$0x88] %v798_v63  ;;  %v819_v13 = vsel %vm4645_vm2, %v817_v62, %v818_v61  ;;  %673 = vst [vmem:[#allocation3] sm:$0x22] %v672_v10  ;;  %v735_v14 = vsel %vm733_vm10, %v727_v12, %v734_v11  ;;  %v923_v16 = vsel %vm495_vm5, 65537, %v3354_v2  ;;  %vm4655_vm5 = vcmask 273408  }
 0x221   : > { %v821_v15 = vsel %vm820_vm9, %v814_v57, %v819_v13  ;;  %736 = vst [vmem:[#allocation3] sm:$0x44] %v735_v14  ;;  %vm4651_vm3 = vmmov %vm4645_vm2  ;;  %v924_v40 = vunpack.c.l.b16 %v923_v16  ;;  %v925_v26 = vunpack.c.h.b16 %v923_v16 }
 0x222   : > { %v824_v17 = vsel %vm4650_vm12, %v821_v15, %v823_v9  ;;  %v849_v19 = vsel %vm4651_vm3, 4294967295, %v3371_v18  ;;  %vm913_vm12 = vcmask 1043728  }
 0x223   : > { %825 = vst [vmem:[#allocation3 + $0x8] sm:$0x11] %v824_v17  ;;  %v850_v20 = vsel %vm848_vm14, %v849_v19, 0  ;;  %vm926_vm7 = vcmp.ne.s32.totalorder %v924_v40, 0  ;;  %vm927_vm10 = vcmp.ne.s32.totalorder %v925_v26, 0  ;;  %vm914_vm14 = vcmask 1047556  }
 0x224   : > { %v928_v28 = vsel %vm926_vm7, 1, %v3354_v2  ;;  %v929_v29 = vsel %vm927_vm10, 1, %v3354_v2  ;;  %vm4006_vm3 = vmor %vm914_vm14, %vm913_vm12  ;;  %vm4657_vm10 = vcmask 285696  }
 0x225   : > { %v930_v31 = vrot.slane %v928_v28, 5  ;;  %v931_v32 = vrot.slane %v929_v29, 5  ;;  %vm4656_vm7 = vmmov %vm4655_vm5  ;;  %v1009_v58 = vrot.slane %v928_v28, 6  ;;  %v1010_v59 = vrot.slane %v929_v29, 6 }
 0x227   : > { %vm932_vm13 = vcmp.ne.s32.totalorder %v930_v31, 0  ;;  %vm933_vm6 = vcmp.ne.s32.totalorder %v931_v32, 0  ;;  %v2709_v31 = vcombine.low %v3784_v7, %v3784_v7  ;;  %v2710_v32 = vcombine.high %v3784_v7, %v3784_v7 }
 0x228   : > { %v934_v39 = vsel %vm932_vm13, 1, %v3354_v2  ;;  %v935_v41 = vsel %vm933_vm6, 1, %v3354_v2  ;;  %vm961_vm13 = vcmask 15360  }
 0x229   : > { %v939_v43 = vrot.slane %v934_v39, %v3778_v4  ;;  %v943_v44 = vrot.slane %v935_v41, %v3778_v4 }
 0x22a   : > { %v2995_v21 = vld [vmem:[#allocation3 + $0x4] ss:$8 sps:$4 sm:$0x1f]   ;;  %v2997_v22 = vld [vmem:[#allocation3] ss:$8 sps:$4 sm:$0x1f]  }
 0x22b   : > { %v855_v23 = vand.u32 %v2995_v21, %v850_v20  ;;  %v852_v24 = vand.u32 %v2997_v22, %v850_v20  ;;  %vm944_vm2 = vcmp.eq.s32.totalorder %v939_v43, 1  ;;  %vm945_vm4 = vcmp.eq.s32.totalorder %v943_v44, 1 }
 0x22c   : > { %vm946_vm15 = vmpackc.low %vm945_vm4, %vm944_vm2  ;;  %vm1011_vm4 = vcmp.ne.s32.totalorder %v1009_v58, 0  ;;  %v1137_v43 = vsub.s32 2, %v3771_v3 }
 0x22d   : > { %857 = vmatprep.subr.bf16.mxu1 %v855_v23  ;;  %v947_v46 = vsel %vm946_vm15, 65537, %v3354_v2  ;;  %vm1012_vm15 = vcmp.ne.s32.totalorder %v1010_v59, 0  ;;  %v1013_v6 = vsel %vm1011_vm4, 1, %v3354_v2  ;;  %vm1060_vm4 = vcmask 916480  }
 0x22e   : > { %858 = vmatpush1.bf16.msra.mxu1 %v852_v24  ;;  %v833_v27 = vpop.permute.xlu1 %832  ;;  %948 = vrot.lane.b32.xlu1 %v947_v46, %s3360_s26  ;;  %v1014_v8 = vsel %vm1012_vm15, 1, %v3354_v2  ;;  %v1018_v12 = vrot.slane %v1013_v6, %v3778_v4  ;;  %vm4658_vm15 = vmmov %vm4656_vm7 }
 0x22f   : > { %v1022_v13 = vrot.slane %v1014_v8, %v3778_v4 }
 0x230   : > { %vm1023_vm12 = vcmp.eq.s32.totalorder %v1018_v12, 1 }
 0x231   : > { %2703 = vmatmul.mubr.msk.bf16.vlgmr.msra.gmra.mrb[0].mxu1 %vm843_vm8, %v826_v25  ;;  %vm4654_vm8 = vcmask 277504   ;;  %vm1024_vm14 = vcmp.eq.s32.totalorder %v1022_v13, 1 }
 0x232   : > { %1410 = vmatprep.mubr.bf16.mxu1 %v3354_v2 }
 0x2a0   : > { %v949_v53 = vpop.permute.xlu1 %948 }
 0x2a1   : > { %v950_v54 = vrot.slane %v949_v53, 4 }
 0x2a3   : > { %v951_v55 = vsel %vm4657_vm10, %v950_v54, %v949_v53  ;;  %vm953_vm6 = vcmp.ne.s16.totalorder %v950_v54, 0  ;;  %vm1030_vm10 = vcmask 408576  }
 0x2a4   : > { %vm952_vm2 = vcmp.ne.s16.totalorder %v951_v55, 0 }
 0x304   : > { %v891_v30 = vpop.f32.mrb[0].mxu1 }
 0x305   : > { %v892_v33 = vadd.f32 %v891_v30, %v833_v27  ;;  %v893_v34 = vpop.f32.mrb[1].mxu1 }
 0x306   : > { %v894_v35 = vadd.f32 %v893_v34, %v833_v27  ;;  %v895_v36 = vpop.f32.mrb[2].mxu1 }
 0x307   : > { %v898_v37 = vmax.f32 %v892_v33, 0.0  ;;  %v896_v38 = vpop.f32.mrb[3].mxu1  ;;  %v1101_v36 = vshrl.u32 %v2710_v32, 16 }
 0x308   : > { %v899_v42 = vmax.f32 %v894_v35, 0.0  ;;  %v1093_v35 = vshrl.u32 %v2709_v31, 16 }
 0x309   : > { %v4034_v39 = vpack.i.b16 %v1101_v36, %v1101_v36 }
 0x30a   : > { %v2789_v45 = vpack.c.bf16 %v899_v42, %v898_v37  ;;  %v4032_v38 = vpack.i.b16 %v1093_v35, %v1093_v35  ;;  %v4036_v42 = vpack.i.b16 %v2709_v31, %v2709_v31 }
 0x30c   : > { %907 = vrot.lane.b32.xlu0 %v2789_v45, %s3355_s21  ;;  %v4039_v45 = vpack.i.b16 %v2710_v32, %v2710_v32  ;;  %v1138_v53 = vrot.slane %v4036_v42, %v1137_v43 }
 0x37e   : > { %v908_v47 = vpop.permute.xlu0 %907 }
 0x37f   : > { %v909_v49 = vrot.slane %v908_v47, 4 }
 0x381   : > { %v910_v50 = vsel %vm4654_vm8, %v909_v49, %v908_v47  ;;  %1452 = vst.msk [vmem:[#allocation2 + $0x20] sm:$0xf] %vm4655_vm5, %v909_v49  ;;  %vm1025_vm8 = vmpackc.low %vm1024_vm14, %vm1023_vm12  ;;  %vm980_vm5 = vcmask 1039360   ;;  %vm1153_vm12 = vcmask 31744   ;;  %vm1214_vm14 = vcmask 293888  }
 0x382   : > { %917 = vst.msk [vmem:[#allocation2 + $0x8] sm:$0xf] %vm4656_vm7, %v909_v49  ;;  %v1026_v15 = vsel %vm1025_vm8, 65537, %v3354_v2  ;;  %v1099_v49 = vrot.slane %v4032_v38, %v3781_v5  ;;  %vm1238_vm8 = vcmask 523264  }
 0x383   : > { %1451 = vst.msk [vmem:[#allocation2 + $0x18] sm:$0xff] %vm4006_vm3, %v910_v50  ;;  %916 = vst.msk [vmem:[#allocation2] sm:$0xff] %vm4006_vm3, %v910_v50  ;;  %v1107_v50 = vrot.slane %v4034_v39, %v3781_v5 }
 0x385   : > { %v4049_v59 = vcombine.low %v1099_v49, %v1107_v50 }
 0x389   : > { %v919_v51 = vld [vmem:[#allocation2 + $0x8] sm:$0xf] }
 0x38a   : > { %958 = vrot.lane.b32.xlu1 %v919_v51, %s3372_s28  ;;  %v918_v52 = vld [vmem:[#allocation2] sm:$0xff]  ;;  %v922_v17 = vunpack.c.l.bf16 %v919_v51 }
 0x38b   : > { %956 = vrot.lane.b32.xlu0 %v918_v52, %s3372_s28  ;;  %s3373_s28 = smov 127   ;;  %v920_v24 = vunpack.c.l.bf16 %v918_v52  ;;  %v921_v25 = vunpack.c.h.bf16 %v918_v52 }
 0x3fc   : > { %v959_v60 = vpop.permute.xlu1 %958 }
 0x3fd   : > { %v957_v56 = vpop.permute.xlu0 %956 }
 0x3fe   : > { %v960_v57 = vrot.slane %v957_v56, 4 }
 0x400   : > { %v962_v61 = vsel %vm961_vm13, %v960_v57, %v957_v56  ;;  %v963_v62 = vsel %vm961_vm13, %v960_v57, %v959_v60  ;;  %vm1041_vm13 = vcmask 261120   ;;  %v1144_v57 = vrot.slane %v4039_v45, %v1137_v43 }
 0x401   : > { %v966_v63 = vsel %vm952_vm2, %v918_v52, %v962_v61  ;;  %v967_v0 = vsel %vm953_vm6, %v919_v51, %v963_v62 }
 0x402   : > { %v970_v9 = vunpack.c.l.bf16 %v967_v0  ;;  %v968_v10 = vunpack.c.l.bf16 %v966_v63  ;;  %v969_v11 = vunpack.c.h.bf16 %v966_v63  ;;  %v2712_v60 = vcombine.low %v1138_v53, %v1144_v57  ;;  %v1307_v57 = vld [vmem:[#allocation14 + $0x8] sm:$0xff] }
 0x404   : > { %978 = vrot.lane.b32.xlu1 %v970_v9, %s3373_s28  ;;  %v2984_v14 = vpack.i.bf16 %v969_v11, %v968_v10 }
 0x406   : > { %2985 = vrot.lane.b32.xlu0 %v2984_v14, %s3373_s28  ;;  %s3376_s28 = smov 112  }
 0x40a   : > { %1027 = vrot.lane.b32.xlu0 %v1026_v15, %s3374_s13  ;;  %s3375_s13 = smov 32  }
 0x476   : > { %v979_v18 = vpop.permute.xlu1 %978 }
 0x477   : > { %v988_v19 = vadd.f32 %v979_v18, %v922_v17 }
 0x478   : > { %v2986_v20 = vpop.permute.xlu0 %2985 }
 0x479   : > { %v2791_v21 = vpack.c.bf16 %v988_v19, %v988_v19  ;;  %v2988_v22 = vunpack.i.h.bf16 %v2986_v20  ;;  %v2987_v23 = vunpack.i.l.bf16 %v2986_v20 }
 0x47b   : > { %1003 = vst.msk [vmem:[#allocation2 + $0x8] sm:$0xf] %vm4656_vm7, %v2791_v21  ;;  %v982_v16 = vsel %vm980_vm5, %v2988_v22, %v979_v18  ;;  %v981_v40 = vsel %vm980_vm5, %v2987_v23, %v2988_v22  ;;  %vm1276_vm5 = vcmask 556032   ;;  %vm1127_vm7 = vcmask 1031168  }
 0x47c   : > { %v986_v26 = vadd.f32 %v981_v40, %v920_v24  ;;  %v987_v27 = vadd.f32 %v982_v16, %v921_v25  ;;  %v1028_v33 = vpop.permute.xlu0 %1027 }
 0x47d   : > { %v1029_v34 = vrot.slane %v1028_v33, 4 }
 0x47e   : > { %v2790_v28 = vpack.c.bf16 %v987_v27, %v986_v26 }
 0x47f   : > { %v1031_v37 = vsel %vm1030_vm10, %v1029_v34, %v1028_v33  ;;  %vm1033_vm6 = vcmp.ne.s16.totalorder %v1029_v34, 0  ;;  %vm4659_vm10 = vcmask 1043456  }
 0x480   : > { %1002 = vst.msk [vmem:[#allocation2] sm:$0xff] %vm4006_vm3, %v2790_v28  ;;  %vm1032_vm2 = vcmp.ne.s16.totalorder %v1031_v37, 0 }
 0x482   : > { %v1005_v29 = vld [vmem:[#allocation2 + $0x8] sm:$0xf] }
 0x483   : > { %1038 = vrot.lane.b32.xlu0 %v1005_v29, %s3375_s13  ;;  %v1008_v61 = vunpack.c.l.bf16 %v1005_v29 }
 0x487   : > { %v1004_v30 = vld [vmem:[#allocation2] sm:$0xff] }
 0x488   : > { %1036 = vrot.lane.b32.xlu1 %v1004_v30, %s3375_s13  ;;  %v1006_v10 = vunpack.c.l.bf16 %v1004_v30  ;;  %v1007_v11 = vunpack.c.h.bf16 %v1004_v30 }
 0x4f5   : > { %v1039_v7 = vpop.permute.xlu0 %1038 }
 0x4fa   : > { %v1037_v41 = vpop.permute.xlu1 %1036 }
 0x4fb   : > { %v1040_v44 = vrot.slane %v1037_v41, 4 }
 0x4fd   : > { %v1042_v46 = vsel %vm1041_vm13, %v1040_v44, %v1037_v41  ;;  %v1043_v47 = vsel %vm1041_vm13, %v1040_v44, %v1039_v7 }
 0x4fe   : > { %v1046_v51 = vsel %vm1032_vm2, %v1004_v30, %v1042_v46  ;;  %v1047_v52 = vsel %vm1033_vm6, %v1005_v29, %v1043_v47  ;;  %vm4660_vm6 = vmmov %vm4659_vm10  ;;  %vm1191_vm2 = vcmask 785408  }
 0x4ff   : > { %v1050_v54 = vunpack.c.l.bf16 %v1047_v52  ;;  %v1048_v55 = vunpack.c.l.bf16 %v1046_v51  ;;  %v1049_v56 = vunpack.c.h.bf16 %v1046_v51 }
 0x501   : > { %1058 = vrot.lane.b32.xlu0 %v1050_v54, %s3376_s28  ;;  %v2989_v58 = vpack.i.bf16 %v1049_v56, %v1048_v55 }
 0x503   : > { %2990 = vrot.lane.b32.xlu1 %v2989_v58, %s3376_s28  ;;  %s3385_s28 = smov 92  }
 0x505   : > { %1174 = vrot.lane.b32.xlu0 %v4049_v59, %s3375_s13  ;;  %s3384_s13 = smov 96  }
 0x507   : > { %1150 = vrot.lane.b32.xlu1 %v2712_v60, %s3377_s29  ;;  %s3382_s29 = smov 62  }
 0x509   : > { %1235 = vrot.lane.b32.xlu0 %v4049_v59, %s3378_s10 }
 0x50b   : > { %1211 = vrot.lane.b32.xlu1 %v2712_v60, %s3379_s1  ;;  %s3383_s1 = smov 124  }
 0x50f   : > { %1273 = vrot.lane.b32.xlu1 %v2712_v60, %s3380_s14  ;;  %s3381_s14 = smov 126   ;;  %v1306_v60 = vld [vmem:[#allocation14] sm:$0xff] }
 0x573   : > { %v1059_v62 = vpop.permute.xlu0 %1058 }
 0x574   : > { %v1068_v63 = vadd.f32 %v1059_v62, %v1008_v61 }
 0x575   : > { %v2991_v0 = vpop.permute.xlu1 %2990 }
 0x576   : > { %v1071_v6 = vmul.f32 0.25, %v1068_v63  ;;  %v2993_v8 = vunpack.i.h.bf16 %v2991_v0  ;;  %v2992_v9 = vunpack.i.l.bf16 %v2991_v0 }
 0x577   : > { %v1175_v26 = vpop.permute.xlu0 %1174 }
 0x578   : > { %v2793_v12 = vpack.c.bf16 %v1071_v6, %v1071_v6  ;;  %v1062_v13 = vsel %vm1060_vm4, %v2993_v8, %v1059_v62  ;;  %v1061_v14 = vsel %vm1060_vm4, %v2992_v9, %v2993_v8  ;;  %v1176_v27 = vrot.slane %v1175_v26, 4  ;;  %vm4661_vm4 = vmmov %vm4660_vm6 }
 0x579   : > { %v1066_v15 = vadd.f32 %v1061_v14, %v1006_v10  ;;  %v1067_v17 = vadd.f32 %v1062_v13, %v1007_v11  ;;  %v1151_v24 = vpop.permute.xlu1 %1150 }
 0x57a   : > { %1086 = vst.msk [vmem:[#allocation2 + $0x8] sm:$0xf] %vm4658_vm15, %v2793_v12  ;;  %v1152_v25 = vrot.slane %v1151_v24, 4  ;;  %v1177_v37 = vsel %vm1041_vm13, %v1176_v27, %v1175_v26  ;;  %vm1168_vm13 = vcmask 1014784   ;;  %vm1229_vm15 = vcmask 752640  }
 0x57b   : > { %v1069_v18 = vmul.f32 0.25, %v1066_v15  ;;  %v1070_v19 = vmul.f32 0.25, %v1067_v17  ;;  %v1236_v34 = vpop.permute.xlu0 %1235 }
 0x57c   : > { %v1154_v30 = vsel %vm1153_vm12, %v1152_v25, %v1151_v24  ;;  %v1237_v41 = vrot.slane %v1236_v34, 4  ;;  %vm4662_vm12 = vmmov %vm4661_vm4 }
 0x57d   : > { %v2792_v20 = vpack.c.bf16 %v1070_v19, %v1069_v18  ;;  %v1212_v31 = vpop.permute.xlu1 %1211 }
 0x57e   : > { %v1213_v32 = vrot.slane %v1212_v31, 4  ;;  %v1239_v52 = vsel %vm1238_vm8, %v1237_v41, %v1236_v34 }
 0x57f   : > { %1085 = vst.msk [vmem:[#allocation2] sm:$0xff] %vm4006_vm3, %v2792_v20 }
 0x580   : > { %v1215_v47 = vsel %vm1214_vm14, %v1213_v32, %v1212_v31  ;;  %vm4663_vm14 = vmmov %vm4661_vm4 }
 0x581   : > { %v1117_v21 = vld [vmem:[#allocation2 + $0x8] sm:$0xf]  ;;  %v1274_v44 = vpop.permute.xlu1 %1273 }
 0x582   : > { %1122 = vrot.lane.b32.xlu1 %v1117_v21, %s3381_s14  ;;  %v1196_v22 = vld [vmem:[#allocation2 + $0x8] sm:$0xf]  ;;  %v1275_v49 = vrot.slane %v1274_v44, 4 }
 0x583   : > { %v1257_v16 = vld [vmem:[#allocation2 + $0x8] sm:$0xf] }
 0x584   : > { %v1132_v40 = vld [vmem:[#allocation2 + $0x8] sm:$0xf]  ;;  %v1277_v56 = vsel %vm1276_vm5, %v1275_v49, %v1274_v44  ;;  %vm4664_vm5 = vcmask 769024  }
 0x585   : > { %v1158_v28 = vmul.bf16 %v1152_v25, %v1132_v40  ;;  %v1173_v29 = vld [vmem:[#allocation2 + $0x8] sm:$0xf] }
 0x586   : > { %1201 = vrot.lane.b32.xlu1 %v1196_v22, %s3363_s3  ;;  %v4059_v23 = vld [vmem:[#allocation2] sm:$0xff]  ;;  %v1181_v33 = vmul.bf16 %v1176_v27, %v1173_v29  ;;  %v1210_v36 = vld [vmem:[#allocation2 + $0x8] sm:$0xf] }
 0x587   : > { %1120 = vrot.lane.b32.xlu0 %v4059_v23, %s3381_s14  ;;  %v1157_v35 = vmul.bf16 %v1154_v30, %v4059_v23  ;;  %v1219_v43 = vmul.bf16 %v1213_v32, %v1210_v36  ;;  %v1180_v7 = vmul.bf16 %v1177_v37, %v4059_v23  ;;  %v1234_v46 = vld [vmem:[#allocation2 + $0x8] sm:$0xf]  ;;  %v1218_v51 = vmul.bf16 %v1215_v47, %v4059_v23  ;;  %s3386_s14 = smov 60  }
 0x588   : > { %v1243_v50 = vmul.bf16 %v1237_v41, %v1234_v46  ;;  %v1272_v53 = vld [vmem:[#allocation2 + $0x8] sm:$0xf]  ;;  %v1242_v55 = vmul.bf16 %v1239_v52, %v4059_v23  ;;  %v1280_v58 = vmul.bf16 %v1277_v56, %v4059_v23  ;;  %v1114_v10 = vmul.bf16 %v4049_v59, %v4059_v23 }
 0x589   : > { %v1281_v54 = vmul.bf16 %v1275_v49, %v1272_v53 }
 0x58a   : > { %1262 = vrot.lane.b32.xlu1 %v1257_v16, %s3382_s29 }
 0x58b   : > { %1199 = vrot.lane.b32.xlu0 %v4059_v23, %s3363_s3 }
 0x58e   : > { %1163 = vrot.lane.b32.xlu1 %v1158_v28, %s3383_s1 }
 0x58f   : > { %1260 = vrot.lane.b32.xlu0 %v4059_v23, %s3382_s29  ;;  %s4685_s29 = smov 79  }
 0x592   : > { %1186 = vrot.lane.b32.xlu1 %v1181_v33, %s3384_s13 }
 0x593   : > { %1161 = vrot.lane.b32.xlu0 %v1157_v35, %s3383_s1  ;;  %s4686_s1 = smov 78  }
 0x596   : > { %1224 = vrot.lane.b32.xlu1 %v1219_v43, %s3385_s28 }
 0x597   : > { %1184 = vrot.lane.b32.xlu0 %v1180_v7, %s3384_s13  ;;  %s4688_s13 = smov 77  }
 0x59a   : > { %1248 = vrot.lane.b32.xlu1 %v1243_v50, %s3378_s10 }
 0x59b   : > { %1222 = vrot.lane.b32.xlu0 %v1218_v51, %s3385_s28 }
 0x59e   : > { %1286 = vrot.lane.b32.xlu1 %v1281_v54, %s3386_s14 }
 0x59f   : > { %1246 = vrot.lane.b32.xlu0 %v1242_v55, %s3378_s10  ;;  %s4670_s10 = smov 51  }
 0x5a2   : > { %1315 = vperm.xlu1 %2983, %v1307_v57  }
 0x5a3   : > { %1284 = vrot.lane.b32.xlu0 %v1280_v58, %s3386_s14 }
 0x5a7   : > { %1310 = vperm.xlu0 %2994, %v1306_v60  }
 0x5f4   : > { %v1123_v61 = vpop.permute.xlu1 %1122 }
 0x5f5   : > { %v1125_v0 = vrot.slane %v1123_v61, 4 }
 0x5f8   : > { %v1202_v62 = vpop.permute.xlu1 %1201 }
 0x5f9   : > { %v1121_v63 = vpop.permute.xlu0 %1120  ;;  %v1204_v23 = vrot.slane %v1202_v62, 4 }
 0x5fa   : > { %v1124_v6 = vrot.slane %v1121_v63, 4 }
 0x5fc   : > { %v1126_v8 = vsel %vm4659_vm10, %v1124_v6, %v1125_v0  ;;  %v1263_v9 = vpop.permute.xlu1 %1262  ;;  %vm4665_vm10 = vmmov %vm4661_vm4 }
 0x5fd   : > { %v1128_v11 = vsel %vm1127_vm7, %v1121_v63, %v1126_v8  ;;  %v1200_v12 = vpop.permute.xlu0 %1199  ;;  %v1265_v37 = vrot.slane %v1263_v9, 4  ;;  %vm1267_vm7 = vcmask 506880   ;;  %v2998_v9 = vld [vmem:[#allocation13] sm:$0xff]  }
 0x5fe   : > { %v2715_v13 = vcombine.high %v1114_v10, %v1128_v11  ;;  %v2714_v14 = vcombine.low %v1114_v10, %v1128_v11  ;;  %v1203_v24 = vrot.slane %v1200_v12, 4 }
 0x600   : > { %v1164_v15 = vpop.permute.xlu1 %1163  ;;  %1378 = vmatprep.subr.bf16.mxu1 %v2715_v13  ;;  %v1205_v27 = vsel %vm4662_vm12, %v1203_v24, %v1204_v23  ;;  %v1462_v24 = vrot.slane %v4032_v38, %v3778_v4  ;;  %v1575_v23 = vrot.slane %v4039_v45, %v3781_v5  ;;  %vm4671_vm12 = vcmask 277504  }
 0x601   : > { %v1261_v17 = vpop.permute.xlu0 %1260  ;;  %1379 = vmatpush1.bf16.msra.mxu1 %v2714_v14  ;;  %v1166_v21 = vrot.slane %v1164_v15, 4  ;;  %v1206_v43 = vsel %vm4664_vm5, %v1200_v12, %v1205_v27  ;;  %vm4673_vm5 = vmmov %vm4671_vm12 }
 0x602   : > { %v1264_v28 = vrot.slane %v1261_v17, 4 }
 0x604   : > { %v1187_v18 = vpop.permute.xlu1 %1186  ;;  %v1266_v44 = vsel %vm4665_vm10, %v1264_v28, %v1265_v37  ;;  %vm4675_vm10 = vcmask 138240  }
 0x605   : > { %v1162_v19 = vpop.permute.xlu0 %1161  ;;  %v1189_v16 = vrot.slane %v1187_v18, 4  ;;  %v1268_v54 = vsel %vm1267_vm7, %v1261_v17, %v1266_v44  ;;  %v1525_v44 = vld [vmem:[#allocation2 + $0x20] sm:$0xf] }
 0x606   : > { %v1165_v20 = vrot.slane %v1162_v19, 4 }
 0x608   : > { %v1225_v22 = vpop.permute.xlu1 %1224  ;;  %v1167_v40 = vsel %vm4660_vm6, %v1165_v20, %v1166_v21  ;;  %vm1291_vm6 = vcmask 490496  }
 0x609   : > { %v1185_v25 = vpop.permute.xlu0 %1184  ;;  %v1169_v29 = vsel %vm1168_vm13, %v1162_v19, %v1167_v40  ;;  %v1227_v33 = vrot.slane %v1225_v22, 4  ;;  %vm4666_vm13 = vmmov %vm4661_vm4 }
 0x60a   : > { %v1188_v59 = vrot.slane %v1185_v25, 4 }
 0x60c   : > { %v1190_v26 = vsel %vm4661_vm4, %v1188_v59, %v1189_v16  ;;  %v1249_v31 = vpop.permute.xlu1 %1248  ;;  %v1571_v59 = vrot.slane %v4036_v42, %v3781_v5 }
 0x60d   : > { %v1192_v30 = vsel %vm1191_vm2, %v1185_v25, %v1190_v26  ;;  %v1223_v32 = vpop.permute.xlu0 %1222  ;;  %v1251_v47 = vrot.slane %v1249_v31, 4  ;;  %vm4667_vm2 = vmmov %vm4661_vm4  ;;  %v1466_v25 = vrot.slane %v4034_v39, %v3778_v4 }
 0x60e   : > { %v1226_v34 = vrot.slane %v1223_v32, 4  ;;  %v2717_v35 = vcombine.high %v1169_v29, %v1192_v30  ;;  %v2716_v36 = vcombine.low %v1169_v29, %v1192_v30  ;;  %vm4668_vm4 = vmmov %vm4667_vm2  ;;  %v2729_v28 = vcombine.low %v1571_v59, %v1575_v23 }
 0x60f   : > { %v2728_v27 = vcombine.low %v1462_v24, %v1466_v25 }
 0x610   : > { %v1228_v41 = vsel %vm4663_vm14, %v1226_v34, %v1227_v33  ;;  %1380 = vmatprep.subr.bf16.mxu1 %v2717_v35  ;;  %v1287_v52 = vpop.permute.xlu1 %1286  ;;  %vm4672_vm14 = vcmask 273408   ;;  %v1458_v33 = vld [vmem:[#allocation2 + $0x20] sm:$0xf] }
 0x611   : > { %v1230_v7 = vsel %vm1229_vm15, %v1223_v32, %v1228_v41  ;;  %v1247_v46 = vpop.permute.xlu0 %1246  ;;  %1381 = vmatpush1.bf16.msra.mxu1 %v2716_v36  ;;  %v1289_v57 = vrot.slane %v1287_v52, 4  ;;  %vm4669_vm15 = vmmov %vm4667_vm2  ;;  %v4122_v36 = vld [vmem:[#allocation2 + $0x18] sm:$0xff]  ;;  %v1634_v52 = vld [vmem:[#allocation2 + $0x20] sm:$0xf] }
 0x612   : > { %v1250_v49 = vrot.slane %v1247_v46, 4  ;;  %v2719_v50 = vcombine.high %v1206_v43, %v1230_v7  ;;  %v2718_v51 = vcombine.low %v1206_v43, %v1230_v7  ;;  %vm4674_vm7 = vmmov %vm4672_vm14 }
 0x614   : > { %v1252_v53 = vsel %vm4666_vm13, %v1250_v49, %v1251_v47  ;;  %1382 = vmatprep.subr.bf16.mxu1 %v2719_v50  ;;  %vm4677_vm13 = vcmask 154624   ;;  %v1567_v47 = vld [vmem:[#allocation2 + $0x20] sm:$0xf] }
 0x615   : > { %v1253_v55 = vsel %vm1238_vm8, %v1247_v46, %v1252_v53  ;;  %v1285_v56 = vpop.permute.xlu0 %1284  ;;  %1383 = vmatpush1.bf16.msra.mxu1 %v2718_v51  ;;  %vm1368_vm8 = vcmask 588800  }
 0x616   : > { %v1288_v58 = vrot.slane %v1285_v56, 4  ;;  %v2721_v60 = vcombine.high %v1253_v55, %v1268_v54  ;;  %v2720_v61 = vcombine.low %v1253_v55, %v1268_v54  ;;  %v1688_v55 = vld [vmem:[#allocation2 + $0x20] sm:$0xf] }
 0x618   : > { %v1290_v62 = vsel %vm4667_vm2, %v1288_v58, %v1289_v57  ;;  %1384 = vmatprep.subr.bf16.mxu1 %v2721_v60  ;;  %vm4682_vm2 = vcmask 285696  }
 0x619   : > { %v1292_v63 = vsel %vm1291_vm6, %v1285_v56, %v1290_v62  ;;  %1385 = vmatpush1.bf16.msra.mxu1 %v2720_v61  ;;  %vm4679_vm6 = vcmask 269312  }
 0x61a   : > { %v2723_v0 = vcombine.high %v1292_v63, %v1292_v63  ;;  %v2722_v6 = vcombine.low %v1292_v63, %v1292_v63 }
 0x61c   : > { %2724 = vmatprep.subr.msk.bf16.mxu1 %vm4668_vm4, %v2723_v0  ;;  %v1373_v8 = vsel %vm4669_vm15, %v2722_v6, 0  ;;  %vm4684_vm4 = vcmask 400384   ;;  %vm4687_vm15 = vcmask 416768  }
 0x61d   : > { %1387 = vmatpush1.bf16.msra.mxu1 %v1373_v8 }
 0x620   : > { %2725 = vmatmul.mubr.msk.bf16.vlgmr.msra.gmra.mrb[4].mxu1 %vm1368_vm8, %v2998_v9 }
 0x621   : > { %2416 = vmatprep.mubr.bf16.mxu1 %v3354_v2  ;;  %v1316_v14 = vpop.permute.xlu1 %1315 }
 0x626   : > { %v1311_v10 = vpop.permute.xlu0 %1310 }
 0x6f3   : > { %v1412_v11 = vpop.f32.mrb[4].mxu1 }
 0x6f4   : > { %v1413_v12 = vadd.f32 %v1412_v11, %v1311_v10  ;;  %v1414_v13 = vpop.f32.mrb[5].mxu1 }
 0x6f5   : > { %v1415_v15 = vadd.f32 %v1414_v13, %v1311_v10  ;;  %v1416_v17 = vpop.f32.mrb[6].mxu1 }
 0x6f6   : > { %v1421_v18 = vmax.f32 %v1413_v12, 0.0  ;;  %v1417_v19 = vadd.f32 %v1416_v17, %v1316_v14  ;;  %v1418_v20 = vpop.f32.mrb[7].mxu1 }
 0x6f7   : > { %v1422_v21 = vmax.f32 %v1415_v15, 0.0  ;;  %v1419_v22 = vadd.f32 %v1418_v20, %v1316_v14 }
 0x6f8   : > { %v1423_v16 = vmax.f32 %v1417_v19, 0.0 }
 0x6f9   : > { %v2794_v2 = vpack.c.bf16 %v1422_v21, %v1421_v18  ;;  %v1424_v40 = vmax.f32 %v1419_v22, 0.0 }
 0x6fb   : > { %v2795_v26 = vpack.c.bf16 %v1424_v40, %v1423_v16  ;;  %1435 = vrot.lane.b32.xlu1 %v2794_v2, %s3355_s21 }
 0x6fd   : > { %1437 = vrot.lane.b32.xlu0 %v2795_v26, %s3355_s21 }
 0x6ff   : > { %1472 = vrot.lane.b32.xlu1 %v2728_v27, %s3358_s19  ;;  %s4680_s19 = smov 109  }
 0x701   : > { %1581 = vrot.lane.b32.xlu0 %v2729_v28, %s3357_s11  ;;  %s4678_s11 = smov 110  }
 0x703   : > { %1635 = vrot.lane.b32.xlu1 %v2728_v27, %s3359_s9  ;;  %s4681_s9 = smov 95  }
 0x705   : > { %1731 = vrot.lane.b32.xlu0 %v2729_v28, %s3360_s26  ;;  %s4683_s26 = smov 93  }
 0x707   : > { %1785 = vrot.lane.b32.xlu1 %v2728_v27, %s3356_s25  ;;  %s4676_s25 = smov 111  }
 0x709   : > { %1881 = vrot.lane.b32.xlu0 %v2729_v28, %s4670_s10 }
 0x76d   : > { %v1436_v5 = vpop.permute.xlu1 %1435 }
 0x76e   : > { %v1439_v38 = vrot.slane %v1436_v5, 4 }
 0x76f   : > { %v1438_v39 = vpop.permute.xlu0 %1437 }
 0x770   : > { %v1441_v42 = vsel %vm4671_vm12, %v1439_v38, %v1436_v5  ;;  %1448 = vst.msk [vmem:[#allocation2 + $0x8] sm:$0xf] %vm4672_vm14, %v1439_v38  ;;  %v1440_v45 = vrot.slane %v1438_v39, 4  ;;  %vm2104_vm12 = vcmask 719872   ;;  %vm4689_vm14 = vcmask 1043456  }
 0x771   : > { %1447 = vst.msk [vmem:[#allocation2] sm:$0xff] %vm4006_vm3, %v1441_v42  ;;  %v1473_v29 = vpop.permute.xlu1 %1472  ;;  %v1730_v42 = vld [vmem:[#allocation2 + $0x20] sm:$0xf] }
 0x772   : > { %v1442_v30 = vsel %vm4673_vm5, %v1440_v45, %v1438_v39  ;;  %1450 = vst.msk [vmem:[#allocation2 + $0x14] sm:$0xf] %vm4674_vm7, %v1440_v45  ;;  %v4113_v31 = vrot.slane %v1473_v29, 4  ;;  %vm4690_vm5 = vmmov %vm4689_vm14  ;;  %vm4691_vm7 = vcmask 769024  }
 0x773   : > { %1449 = vst.msk [vmem:[#allocation2 + $0xc] sm:$0xff] %vm4006_vm3, %v1442_v30  ;;  %v1582_v32 = vpop.permute.xlu0 %1581 }
 0x774   : > { %v4119_v34 = vsel %vm4675_vm10, %v4113_v31, %v1473_v29  ;;  %v1483_v35 = vmul.bf16 %v4113_v31, %v1458_v33  ;;  %v4126_v41 = vrot.slane %v1582_v32, 4  ;;  %vm4692_vm10 = vmmov %vm4690_vm5 }
 0x775   : > { %v1482_v37 = vmul.bf16 %v4119_v34, %v4122_v36  ;;  %v1636_v43 = vpop.permute.xlu1 %1635 }
 0x776   : > { %1500 = vrot.lane.b32.xlu0 %v1483_v35, %s4676_s25  ;;  %v4132_v7 = vsel %vm4677_vm13, %v4126_v41, %v1582_v32  ;;  %v4134_v46 = vrot.slane %v1636_v43, 4  ;;  %v1592_v49 = vmul.bf16 %v4126_v41, %v1567_v47  ;;  %vm4693_vm13 = vmmov %vm4691_vm7 }
 0x777   : > { %1498 = vrot.lane.b32.xlu1 %v1482_v37, %s4676_s25  ;;  %v1591_v50 = vmul.bf16 %v4132_v7, %v4122_v36  ;;  %v1521_v56 = vld [vmem:[#allocation2 + $0x8] sm:$0xf]  ;;  %v1732_v11 = vpop.permute.xlu0 %1731 }
 0x778   : > { %v4144_v51 = vsel %vm4679_vm6, %v4134_v46, %v1636_v43  ;;  %v1646_v53 = vmul.bf16 %v4134_v46, %v1634_v52  ;;  %v4156_v57 = vld [vmem:[#allocation2] sm:$0xff]  ;;  %v1684_v58 = vld [vmem:[#allocation2 + $0x8] sm:$0xf]  ;;  %v4182_v14 = vrot.slane %v1732_v11, 4  ;;  %vm4694_vm6 = vmmov %vm4690_vm5 }
 0x779   : > { %v1645_v54 = vmul.bf16 %v4144_v51, %v4122_v36  ;;  %v1454_v60 = vld [vmem:[#allocation2 + $0x8] sm:$0xf]  ;;  %v1478_v62 = vmul.bf16 %v4156_v57, %v4119_v34  ;;  %v1523_v63 = vld [vmem:[#allocation2 + $0x14] sm:$0xf]  ;;  %v1587_v9 = vmul.bf16 %v4156_v57, %v4132_v7  ;;  %v1641_v13 = vmul.bf16 %v4156_v57, %v4144_v51  ;;  %v1786_v22 = vpop.permute.xlu1 %1785  ;;  %v1784_v43 = vld [vmem:[#allocation2 + $0x20] sm:$0xf] }
 0x77a   : > { %1542 = vrot.lane.b32.xlu0 %v1525_v44, %s4678_s11  ;;  %v1479_v61 = vmul.bf16 %v4113_v31, %v1454_v60  ;;  %v1563_v0 = vld [vmem:[#allocation2 + $0x8] sm:$0xf]  ;;  %v4169_v6 = vld [vmem:[#allocation2 + $0xc] sm:$0xff]  ;;  %v1686_v15 = vld [vmem:[#allocation2 + $0x14] sm:$0xf]  ;;  %v4188_v17 = vsel %vm4682_vm2, %v4182_v14, %v1732_v11  ;;  %v4201_v2 = vrot.slane %v1786_v22, 4  ;;  %v1742_v45 = vmul.bf16 %v4182_v14, %v1730_v42 }
 0x77b   : > { %1540 = vrot.lane.b32.xlu1 %v4122_v36, %s4678_s11  ;;  %v1588_v8 = vmul.bf16 %v4126_v41, %v1563_v0  ;;  %v1630_v10 = vld [vmem:[#allocation2 + $0x8] sm:$0xf]  ;;  %v1737_v20 = vmul.bf16 %v4156_v57, %v4188_v17  ;;  %v1456_v21 = vld [vmem:[#allocation2 + $0x14] sm:$0xf]  ;;  %v1480_v25 = vmul.bf16 %v4169_v6, %v4119_v34  ;;  %v1741_v59 = vmul.bf16 %v4188_v17, %v4122_v36  ;;  %vm4695_vm2 = vmmov %vm4690_vm5 }
 0x77c   : > { %v1642_v12 = vmul.bf16 %v4134_v46, %v1630_v10  ;;  %v1726_v18 = vld [vmem:[#allocation2 + $0x8] sm:$0xf]  ;;  %v1481_v24 = vmul.bf16 %v4113_v31, %v1456_v21  ;;  %v1565_v16 = vld [vmem:[#allocation2 + $0x14] sm:$0xf]  ;;  %v4210_v26 = vsel %vm4684_vm4, %v4201_v2, %v1786_v22  ;;  %v1589_v39 = vmul.bf16 %v4169_v6, %v4132_v7  ;;  %vm4696_vm4 = vmmov %vm4691_vm7 }
 0x77d   : > { %v1738_v19 = vmul.bf16 %v4182_v14, %v1726_v18  ;;  %v1590_v40 = vmul.bf16 %v4126_v41, %v1565_v16  ;;  %v1632_v23 = vld [vmem:[#allocation2 + $0x14] sm:$0xf]  ;;  %v1791_v28 = vmul.bf16 %v4156_v57, %v4210_v26  ;;  %v1795_v29 = vmul.bf16 %v4210_v26, %v4122_v36  ;;  %v1780_v30 = vld [vmem:[#allocation2 + $0x8] sm:$0xf] }
 0x77e   : > { %1609 = vrot.lane.b32.xlu0 %v1592_v49, %s4680_s19  ;;  %v1644_v27 = vmul.bf16 %v4134_v46, %v1632_v23  ;;  %v1728_v5 = vld [vmem:[#allocation2 + $0x14] sm:$0xf]  ;;  %v1792_v32 = vmul.bf16 %v4201_v2, %v1780_v30  ;;  %v1643_v33 = vmul.bf16 %v4144_v51, %v4169_v6  ;;  %v1796_v44 = vmul.bf16 %v4201_v2, %v1784_v43  ;;  %v1834_v49 = vld [vmem:[#allocation2 + $0x8] sm:$0xf] }
 0x77f   : > { %1607 = vrot.lane.b32.xlu1 %v1591_v50, %s4680_s19  ;;  %v1740_v38 = vmul.bf16 %v4182_v14, %v1728_v5  ;;  %v1782_v35 = vld [vmem:[#allocation2 + $0x14] sm:$0xf]  ;;  %v1739_v47 = vmul.bf16 %v4188_v17, %v4169_v6  ;;  %v1882_v50 = vpop.permute.xlu0 %1881  ;;  %v1793_v52 = vmul.bf16 %v4210_v26, %v4169_v6  ;;  %v4274_v11 = vld [vmem:[#allocation16] sm:$0xff] }
 0x780   : > { %v1794_v37 = vmul.bf16 %v4201_v2, %v1782_v35  ;;  %v1957_v10 = vld [vmem:[#allocation17] sm:$0xff] }
 0x782   : > { %1663 = vrot.lane.b32.xlu0 %v1646_v53, %s4681_s9  ;;  %v1836_v53 = vld [vmem:[#allocation2 + $0x14] sm:$0xf] }
 0x783   : > { %1661 = vrot.lane.b32.xlu1 %v1645_v54, %s4681_s9  ;;  %v4248_v54 = vrot.slane %v1882_v50, 4 }
 0x786   : > { %1705 = vrot.lane.b32.xlu0 %v1688_v55, %s3363_s3  ;;  %v1838_v55 = vld [vmem:[#allocation2 + $0x20] sm:$0xf] }
 0x787   : > { %1703 = vrot.lane.b32.xlu1 %v4122_v36, %s3363_s3 }
 0x78a   : > { %1534 = vrot.lane.b32.xlu0 %v1521_v56, %s4678_s11  ;;  %v4254_v56 = vsel %vm4687_vm15, %v4248_v54, %v1882_v50  ;;  %vm4697_vm15 = vmmov %vm4695_vm2 }
 0x78b   : > { %1532 = vrot.lane.b32.xlu1 %v4156_v57, %s4678_s11  ;;  %v1889_v0 = vmul.bf16 %v4254_v56, %v4169_v6 }
 0x78e   : > { %1697 = vrot.lane.b32.xlu0 %v1684_v58, %s3363_s3  ;;  %v1876_v58 = vld [vmem:[#allocation2 + $0x8] sm:$0xf] }
 0x78f   : > { %1695 = vrot.lane.b32.xlu1 %v4156_v57, %s3363_s3  ;;  %v1888_v60 = vmul.bf16 %v4248_v54, %v1876_v58 }
 0x792   : > { %1492 = vrot.lane.b32.xlu0 %v1479_v61, %s4676_s25  ;;  %v1887_v61 = vmul.bf16 %v4254_v56, %v4156_v57 }
 0x793   : > { %1490 = vrot.lane.b32.xlu1 %v1478_v62, %s4676_s25  ;;  %v1878_v62 = vld [vmem:[#allocation2 + $0x14] sm:$0xf] }
 0x796   : > { %1538 = vrot.lane.b32.xlu0 %v1523_v63, %s4678_s11  ;;  %v1890_v63 = vmul.bf16 %v4248_v54, %v1878_v62 }
 0x797   : > { %1536 = vrot.lane.b32.xlu1 %v4169_v6, %s4678_s11 }
 0x79a   : > { %1601 = vrot.lane.b32.xlu0 %v1588_v8, %s4680_s19  ;;  %v1880_v8 = vld [vmem:[#allocation2 + $0x20] sm:$0xf] }
 0x79b   : > { %1599 = vrot.lane.b32.xlu1 %v1587_v9, %s4680_s19  ;;  %v1892_v9 = vmul.bf16 %v4248_v54, %v1880_v8 }
 0x79e   : > { %1655 = vrot.lane.b32.xlu0 %v1642_v12, %s4681_s9 }
 0x79f   : > { %1653 = vrot.lane.b32.xlu1 %v1641_v13, %s4681_s9 }
 0x7a2   : > { %1701 = vrot.lane.b32.xlu0 %v1686_v15, %s3363_s3 }
 0x7a3   : > { %1699 = vrot.lane.b32.xlu1 %v4169_v6, %s3363_s3 }
 0x7a6   : > { %1751 = vrot.lane.b32.xlu0 %v1738_v19, %s4683_s26 }
 0x7a7   : > { %1749 = vrot.lane.b32.xlu1 %v1737_v20, %s4683_s26 }
 0x7aa   : > { %1496 = vrot.lane.b32.xlu0 %v1481_v24, %s4676_s25 }
 0x7ab   : > { %1494 = vrot.lane.b32.xlu1 %v1480_v25, %s4676_s25 }
 0x7ae   : > { %1605 = vrot.lane.b32.xlu0 %v1590_v40, %s4680_s19 }
 0x7af   : > { %1757 = vrot.lane.b32.xlu1 %v1741_v59, %s4683_s26 }
 0x7b2   : > { %1659 = vrot.lane.b32.xlu0 %v1644_v27, %s4681_s9 }
 0x7b3   : > { %1803 = vrot.lane.b32.xlu1 %v1791_v28, %s4685_s29 }
 0x7b6   : > { %1755 = vrot.lane.b32.xlu0 %v1740_v38, %s4683_s26 }
 0x7b7   : > { %1603 = vrot.lane.b32.xlu1 %v1589_v39, %s4680_s19 }
 0x7ba   : > { %1759 = vrot.lane.b32.xlu0 %v1742_v45, %s4683_s26 }
 0x7bb   : > { %1811 = vrot.lane.b32.xlu1 %v1795_v29, %s4685_s29 }
 0x7be   : > { %1805 = vrot.lane.b32.xlu0 %v1792_v32, %s4685_s29 }
 0x7bf   : > { %1657 = vrot.lane.b32.xlu1 %v1643_v33, %s4681_s9 }
 0x7c2   : > { %1809 = vrot.lane.b32.xlu0 %v1794_v37, %s4685_s29 }
 0x7c3   : > { %1845 = vrot.lane.b32.xlu1 %v4156_v57, %s4686_s1  ;;  %v1891_v57 = vmul.bf16 %v4254_v56, %v4122_v36 }
 0x7c6   : > { %1813 = vrot.lane.b32.xlu0 %v1796_v44, %s4685_s29 }
 0x7c7   : > { %1849 = vrot.lane.b32.xlu1 %v4169_v6, %s4686_s1  ;;  %v2731_v6 = vcombine.high %v4274_v11, %v4274_v11 }
 0x7c9   : > { %2761 = vmatprep.mubr.msk.bf16.mxu0 %vm2104_vm12, %v2731_v6  ;;  %vm4698_vm12 = vmmov %vm4695_vm2 }
 0x7ca   : > { %1847 = vrot.lane.b32.xlu0 %v1834_v49, %s4686_s1 }
 0x7cb   : > { %1753 = vrot.lane.b32.xlu1 %v1739_v47, %s4683_s26 }
 0x7ce   : > { %1851 = vrot.lane.b32.xlu0 %v1836_v53, %s4686_s1 }
 0x7cf   : > { %1807 = vrot.lane.b32.xlu1 %v1793_v52, %s4685_s29 }
 0x7d2   : > { %1855 = vrot.lane.b32.xlu0 %v1838_v55, %s4686_s1 }
 0x7d3   : > { %1853 = vrot.lane.b32.xlu1 %v4122_v36, %s4686_s1 }
 0x7d6   : > { %1901 = vrot.lane.b32.xlu0 %v1888_v60, %s4688_s13 }
 0x7d7   : > { %1899 = vrot.lane.b32.xlu1 %v1887_v61, %s4688_s13 }
 0x7da   : > { %1905 = vrot.lane.b32.xlu0 %v1890_v63, %s4688_s13 }
 0x7db   : > { %1903 = vrot.lane.b32.xlu1 %v1889_v0, %s4688_s13 }
 0x7de   : > { %1909 = vrot.lane.b32.xlu0 %v1892_v9, %s4688_s13 }
 0x7df   : > { %1907 = vrot.lane.b32.xlu1 %v1891_v57, %s4688_s13 }
 0x7e3   : > { %1960 = vperm.xlu1 %2983, %v1957_v10  }
 0x7e8   : > { %v4278_v12 = vpop.permute.xlu0 %1500 }
 0x7e9   : > { %v4280_v13 = vpop.permute.xlu1 %1498 }
 0x7ec   : > { %v4282_v15 = vpop.permute.xlu0 %1542 }
 0x7ed   : > { %v4284_v36 = vpop.permute.xlu1 %1540 }
 0x7f0   : > { %v4286_v18 = vpop.permute.xlu0 %1609 }
 0x7f1   : > { %v4288_v19 = vpop.permute.xlu1 %1607 }
 0x7f4   : > { %v1664_v20 = vpop.permute.xlu0 %1663 }
 0x7f5   : > { %v1670_v21 = vrot.slane %v1664_v20, 4  ;;  %v1662_v22 = vpop.permute.xlu1 %1661 }
 0x7f6   : > { %v1669_v24 = vrot.slane %v1662_v22, 4 }
 0x7f8   : > { %v1675_v25 = vsel %vm4689_vm14, %v1669_v24, %v1670_v21  ;;  %v1706_v16 = vpop.permute.xlu0 %1705  ;;  %vm4699_vm14 = vmmov %vm4695_vm2 }
 0x7f9   : > { %v4292_v40 = vsel %vm663_vm11, %v1662_v22, %v1675_v25  ;;  %v1712_v59 = vrot.slane %v1706_v16, 4  ;;  %v1704_v23 = vpop.permute.xlu1 %1703  ;;  %v1507_v16 = vrot.slane %v4278_v12, 4  ;;  %v1549_v12 = vrot.slane %v4282_v15, 4 }
 0x7fa   : > { %v1711_v27 = vrot.slane %v1704_v23, 4 }
 0x7fc   : > { %v1717_v28 = vsel %vm4690_vm5, %v1711_v27, %v1712_v59  ;;  %v1535_v5 = vpop.permute.xlu0 %1534  ;;  %v1506_v59 = vrot.slane %v4280_v13, 4  ;;  %vm4700_vm5 = vmmov %vm4695_vm2 }
 0x7fd   : > { %v4296_v38 = vsel %vm4691_vm7, %v1704_v23, %v1717_v28  ;;  %v1533_v39 = vpop.permute.xlu1 %1532  ;;  %v1545_v57 = vrot.slane %v1535_v5, 4  ;;  %vm4701_vm7 = vmmov %vm4695_vm2 }
 0x7fe   : > { %v1544_v10 = vrot.slane %v1533_v39, 4 }
 0x800   : > { %v1698_v42 = vpop.permute.xlu0 %1697  ;;  %v1550_v28 = vsel %vm4698_vm12, %v1544_v10, %v1545_v57 }
 0x801   : > { %v1708_v45 = vrot.slane %v1698_v42, 4  ;;  %v1696_v29 = vpop.permute.xlu1 %1695 }
 0x802   : > { %v1707_v30 = vrot.slane %v1696_v29, 4 }
 0x804   : > { %v1713_v32 = vsel %vm4692_vm10, %v1707_v30, %v1708_v45  ;;  %v1493_v33 = vpop.permute.xlu0 %1492  ;;  %vm4702_vm10 = vcmask 900096  }
 0x805   : > { %v4300_v35 = vsel %vm4693_vm13, %v1696_v29, %v1713_v32  ;;  %v1491_v37 = vpop.permute.xlu1 %1490  ;;  %v1503_v22 = vrot.slane %v1493_v33, 4  ;;  %vm4703_vm13 = vcmask 908288   ;;  %vm4707_vm12 = vmmov %vm4702_vm10 }
 0x806   : > { %v1502_v24 = vrot.slane %v1491_v37, 4 }
 0x808   : > { %v1539_v43 = vpop.permute.xlu0 %1538  ;;  %v1508_v29 = vsel %vm4699_vm14, %v1502_v24, %v1503_v22  ;;  %vm4708_vm14 = vmmov %vm4702_vm10 }
 0x809   : > { %v1537_v44 = vpop.permute.xlu1 %1536  ;;  %v1547_v30 = vrot.slane %v1539_v43, 4 }
 0x80a   : > { %v1546_v32 = vrot.slane %v1537_v44, 4 }
 0x80c   : > { %v4302_v47 = vpop.permute.xlu0 %1601  ;;  %v1552_v43 = vsel %vm4695_vm2, %v1546_v32, %v1547_v30 }
 0x80d   : > { %v4304_v49 = vpop.permute.xlu1 %1599 }
 0x810   : > { %v1656_v50 = vpop.permute.xlu0 %1655 }
 0x811   : > { %v1666_v52 = vrot.slane %v1656_v50, 4  ;;  %v1654_v53 = vpop.permute.xlu1 %1653  ;;  %v1512_v50 = vsel %vm4700_vm5, %v1506_v59, %v1507_v16  ;;  %vm4709_vm5 = vmmov %vm4695_vm2 }
 0x812   : > { %v1665_v55 = vrot.slane %v1654_v53, 4 }
 0x814   : > { %v1671_v58 = vsel %vm4694_vm6, %v1665_v55, %v1666_v52  ;;  %v1702_v60 = vpop.permute.xlu0 %1701  ;;  %v1548_v52 = vrot.slane %v4284_v36, 4  ;;  %vm4704_vm6 = vmmov %vm4703_vm13 }
 0x815   : > { %v4308_v61 = vsel %vm663_vm11, %v1654_v53, %v1671_v58  ;;  %v1710_v62 = vrot.slane %v1702_v60, 4  ;;  %v1700_v63 = vpop.permute.xlu1 %1699  ;;  %v1551_v58 = vsel %vm4702_vm10, %v1533_v39, %v1550_v28  ;;  %v1509_v60 = vsel %vm4703_vm13, %v1491_v37, %v1508_v29  ;;  %vm4711_vm10 = vmmov %vm4695_vm2 }
 0x816   : > { %v1709_v0 = vrot.slane %v1700_v63, 4  ;;  %v1612_v37 = vrot.slane %v4302_v47, 4  ;;  %vm4712_vm13 = vcmask 891904  }
 0x818   : > { %v1715_v8 = vsel %vm4695_vm2, %v1709_v0, %v1710_v62  ;;  %v1752_v9 = vpop.permute.xlu0 %1751 }
 0x819   : > { %v4312_v6 = vsel %vm4696_vm4, %v1700_v63, %v1715_v8  ;;  %v1762_v20 = vrot.slane %v1752_v9, 4  ;;  %v1750_v21 = vpop.permute.xlu1 %1749  ;;  %vm4705_vm4 = vmmov %vm4704_vm6 }
 0x81a   : > { %v1761_v25 = vrot.slane %v1750_v21, 4  ;;  %v1513_v9 = vsel %vm4705_vm4, %v4280_v13, %v1512_v50  ;;  %v1616_v13 = vrot.slane %v4286_v18, 4  ;;  %vm4715_vm4 = vmmov %vm4709_vm5 }
 0x81b   : > { %v2735_v10 = vcombine.high %v1513_v9, %v1551_v58  ;;  %v2734_v24 = vcombine.low %v1513_v9, %v1551_v58 }
 0x81c   : > { %v1767_v23 = vsel %vm4697_vm15, %v1761_v25, %v1762_v20  ;;  %v1497_v27 = vpop.permute.xlu0 %1496  ;;  %vm4706_vm15 = vmmov %vm4695_vm2  ;;  %v1553_v20 = vsel %vm4707_vm12, %v1537_v44, %v1552_v43  ;;  %v1615_v25 = vrot.slane %v4288_v19, 4  ;;  %vm4717_vm12 = vcmask 646144  }
 0x81d   : > { %v4319_v5 = vsel %vm726_vm0, %v1750_v21, %v1767_v23  ;;  %v1505_v42 = vrot.slane %v1497_v27, 4  ;;  %v1495_v45 = vpop.permute.xlu1 %1494  ;;  %v1554_v15 = vsel %vm4706_vm15, %v1548_v52, %v1549_v12  ;;  %v1611_v21 = vrot.slane %v4304_v49, 4  ;;  %vm4716_vm15 = vmmov %vm4715_vm4 }
 0x81e   : > { %v1504_v33 = vrot.slane %v1495_v45, 4  ;;  %v1555_v22 = vsel %vm4708_vm14, %v4284_v36, %v1554_v15  ;;  %vm4718_vm14 = vmmov %vm4715_vm4 }
 0x81f   : > { %v2737_v59 = vcombine.high %v1553_v20, %v1555_v22  ;;  %v1617_v44 = vsel %vm4709_vm5, %v1611_v21, %v1612_v37  ;;  %v2736_v28 = vcombine.low %v1553_v20, %v1555_v22  ;;  %vm4719_vm5 = vmmov %vm4715_vm4 }
 0x820   : > { %v1510_v53 = vsel %vm4701_vm7, %v1504_v33, %v1505_v42  ;;  %v1606_v55 = vpop.permute.xlu0 %1605  ;;  %vm4710_vm7 = vmmov %vm4695_vm2  ;;  %v1618_v18 = vsel %vm4712_vm13, %v4304_v49, %v1617_v44 }
 0x821   : > { %v1511_v62 = vsel %vm4704_vm6, %v1495_v45, %v1510_v53  ;;  %v1758_v63 = vpop.permute.xlu1 %1757  ;;  %v1614_v27 = vrot.slane %v1606_v55, 4  ;;  %v1621_v42 = vsel %vm4710_vm7, %v1615_v25, %v1616_v13  ;;  %vm4713_vm6 = vmmov %vm4712_vm13 }
 0x822   : > { %v2733_v0 = vcombine.high %v1509_v60, %v1511_v62  ;;  %v2732_v8 = vcombine.low %v1509_v60, %v1511_v62  ;;  %v1765_v29 = vrot.slane %v1758_v63, 4  ;;  %vm4714_vm2 = vmmov %vm4713_vm6 }
 0x823   : > { %v1622_v52 = vsel %vm4714_vm2, %v4288_v19, %v1621_v42  ;;  %vm4720_vm7 = vmmov %vm4717_vm12 }
 0x824   : > { %v1660_v57 = vpop.permute.xlu0 %1659  ;;  %2114 = vmatprep.subr.bf16.mxu0 %v2733_v0  ;;  %v2741_v49 = vcombine.high %v1622_v52, %v4308_v61  ;;  %v2740_v19 = vcombine.low %v1622_v52, %v4308_v61  ;;  %vm4722_vm13 = vmmov %vm4715_vm4 }
 0x825   : > { %v1804_v39 = vpop.permute.xlu1 %1803  ;;  %2115 = vmatpush1.bf16.msra.mxu0 %v2732_v8  ;;  %v1668_v0 = vrot.slane %v1660_v57, 4  ;;  %vm4724_vm2 = vmmov %vm4715_vm4 }
 0x826   : > { %2116 = vmatprep.subr.bf16.mxu0 %v2735_v10  ;;  %v1815_v60 = vrot.slane %v1804_v39, 4 }
 0x828   : > { %v4340_v16 = vpop.permute.xlu0 %1755 }
 0x829   : > { %v1604_v23 = vpop.permute.xlu1 %1603  ;;  %2117 = vmatpush1.bf16.msra.mxu0 %v2734_v24  ;;  %v2745_v24 = vcombine.high %v4300_v35, %v4312_v6  ;;  %v1764_v42 = vrot.slane %v4340_v16, 4 }
 0x82a   : > { %v1613_v47 = vrot.slane %v1604_v23, 4  ;;  %2118 = vmatprep.subr.bf16.mxu0 %v2737_v59  ;;  %v2744_v59 = vcombine.low %v4300_v35, %v4312_v6 }
 0x82c   : > { %v1619_v36 = vsel %vm4711_vm10, %v1613_v47, %v1614_v27  ;;  %v1760_v45 = vpop.permute.xlu0 %1759  ;;  %vm4721_vm10 = vmmov %vm4715_vm4 }
 0x82d   : > { %v1620_v30 = vsel %vm4713_vm6, %v1604_v23, %v1619_v36  ;;  %v1766_v32 = vrot.slane %v1760_v45, 4  ;;  %v1812_v33 = vpop.permute.xlu1 %1811  ;;  %2119 = vmatpush1.bf16.msra.mxu0 %v2736_v28  ;;  %vm4723_vm6 = vmmov %vm4715_vm4 }
 0x82e   : > { %v2739_v50 = vcombine.high %v1618_v18, %v1620_v30  ;;  %v2738_v12 = vcombine.low %v1618_v18, %v1620_v30  ;;  %v1819_v13 = vrot.slane %v1812_v33, 4  ;;  %v2746_v18 = vcombine.low %v4296_v38, %v4319_v5 }
 0x82f   : > { %v1771_v53 = vsel %vm4715_vm4, %v1765_v29, %v1766_v32  ;;  %vm4725_vm4 = vmmov %vm4720_vm7 }
 0x830   : > { %v4352_v55 = vsel %vm726_vm0, %v1758_v63, %v1771_v53  ;;  %v1806_v58 = vpop.permute.xlu0 %1805  ;;  %2120 = vmatprep.subr.bf16.mxu0 %v2739_v50 }
 0x831   : > { %v1816_v62 = vrot.slane %v1806_v58, 4  ;;  %v1658_v43 = vpop.permute.xlu1 %1657  ;;  %2121 = vmatpush1.bf16.msra.mxu0 %v2738_v12 }
 0x832   : > { %v1667_v8 = vrot.slane %v1658_v43, 4  ;;  %2122 = vmatprep.subr.bf16.mxu0 %v2741_v49 }
 0x833   : > { %v1821_v9 = vsel %vm4716_vm15, %v1815_v60, %v1816_v62  ;;  %vm4726_vm15 = vmmov %vm4724_vm2 }
 0x834   : > { %v1822_v15 = vsel %vm4717_vm12, %v1804_v39, %v1821_v9  ;;  %v1673_v63 = vsel %vm4718_vm14, %v1667_v8, %v1668_v0  ;;  %v1810_v10 = vpop.permute.xlu0 %1809  ;;  %vm4727_vm12 = vmmov %vm4724_vm2 }
 0x835   : > { %v1674_v20 = vsel %vm663_vm11, %v1658_v43, %v1673_v63  ;;  %v1846_v37 = vpop.permute.xlu1 %1845  ;;  %2123 = vmatpush1.bf16.msra.mxu0 %v2740_v19  ;;  %v1818_v12 = vrot.slane %v1810_v10, 4  ;;  %vm4728_vm14 = vmmov %vm4724_vm2 }
 0x836   : > { %v2743_v21 = vcombine.high %v1674_v20, %v4292_v40  ;;  %v2742_v22 = vcombine.low %v1674_v20, %v4292_v40  ;;  %v2747_v40 = vcombine.high %v4296_v38, %v4319_v5  ;;  %v1857_v27 = vrot.slane %v1846_v37, 4 }
 0x838   : > { %v1814_v57 = vpop.permute.xlu0 %1813  ;;  %2124 = vmatprep.subr.bf16.mxu0 %v2743_v21 }
 0x839   : > { %v1820_v61 = vrot.slane %v1814_v57, 4  ;;  %v1850_v25 = vpop.permute.xlu1 %1849  ;;  %2125 = vmatpush1.bf16.msra.mxu0 %v2742_v22 }
 0x83a   : > { %2126 = vmatprep.subr.bf16.mxu0 %v2745_v24  ;;  %v1859_v30 = vrot.slane %v1850_v25, 4 }
 0x83b   : > { %v1825_v39 = vsel %vm4719_vm5, %v1819_v13, %v1820_v61  ;;  %vm4729_vm5 = vmmov %vm4724_vm2 }
 0x83c   : > { %v1826_v23 = vsel %vm4720_vm7, %v1812_v33, %v1825_v39  ;;  %v1848_v44 = vpop.permute.xlu0 %1847  ;;  %vm4730_vm7 = vmmov %vm4724_vm2 }
 0x83d   : > { %v1858_v47 = vrot.slane %v1848_v44, 4  ;;  %v1754_v28 = vpop.permute.xlu1 %1753  ;;  %2127 = vmatpush1.bf16.msra.mxu0 %v2744_v59 }
 0x83e   : > { %v1763_v36 = vrot.slane %v1754_v28, 4  ;;  %2128 = vmatprep.subr.bf16.mxu0 %v2747_v40 }
 0x83f   : > { %v1863_v45 = vsel %vm4721_vm10, %v1857_v27, %v1858_v47  ;;  %vm4731_vm10 = vmmov %vm4724_vm2 }
 0x840   : > { %v1864_v35 = vsel %vm789_vm1, %v1846_v37, %v1863_v45  ;;  %v1769_v6 = vsel %vm4722_vm13, %v1763_v36, %v1764_v42  ;;  %v1852_v29 = vpop.permute.xlu0 %1851  ;;  %vm4732_vm13 = vcmask 277504  }
 0x841   : > { %v1770_v32 = vsel %vm726_vm0, %v1754_v28, %v1769_v6  ;;  %v1860_v33 = vrot.slane %v1852_v29, 4  ;;  %v1808_v50 = vpop.permute.xlu1 %1807  ;;  %2129 = vmatpush1.bf16.msra.mxu0 %v2746_v18  ;;  %v2752_v22 = vcombine.low %v1826_v23, %v1864_v35 }
 0x842   : > { %v1817_v16 = vrot.slane %v1808_v50, 4  ;;  %v2749_v52 = vcombine.high %v1770_v32, %v4352_v55  ;;  %v2748_v53 = vcombine.low %v1770_v32, %v4352_v55  ;;  %v2753_v55 = vcombine.high %v1826_v23, %v1864_v35 }
 0x843   : > { %v1865_v58 = vsel %vm4723_vm6, %v1859_v30, %v1860_v33  ;;  %v2730_v30 = vcombine.low %v4274_v11, %v4274_v11  ;;  %vm4733_vm6 = vcmask 273408  }
 0x844   : > { %v1866_v38 = vsel %vm789_vm1, %v1850_v25, %v1865_v58  ;;  %v1823_v5 = vsel %vm4724_vm2, %v1817_v16, %v1818_v12  ;;  %v1856_v49 = vpop.permute.xlu0 %1855  ;;  %2130 = vmatprep.subr.bf16.mxu0 %v2749_v52 }
 0x845   : > { %v1824_v60 = vsel %vm4725_vm4, %v1808_v50, %v1823_v5  ;;  %v1862_v62 = vrot.slane %v1856_v49, 4  ;;  %v1854_v43 = vpop.permute.xlu1 %1853  ;;  %2131 = vmatpush1.bf16.msra.mxu0 %v2748_v53 }
 0x846   : > { %v1861_v0 = vrot.slane %v1854_v43, 4  ;;  %v2751_v8 = vcombine.high %v1822_v15, %v1824_v60  ;;  %v2750_v9 = vcombine.low %v1822_v15, %v1824_v60 }
 0x848   : > { %v1867_v19 = vsel %vm4726_vm15, %v1861_v0, %v1862_v62  ;;  %v1902_v63 = vpop.permute.xlu0 %1901  ;;  %2132 = vmatprep.subr.bf16.mxu0 %v2751_v8  ;;  %vm4737_vm15 = vcmask 769024  }
 0x849   : > { %v1868_v10 = vsel %vm789_vm1, %v1854_v43, %v1867_v19  ;;  %v1912_v20 = vrot.slane %v1902_v63, 4  ;;  %v1900_v37 = vpop.permute.xlu1 %1899  ;;  %2133 = vmatpush1.bf16.msra.mxu0 %v2750_v9 }
 0x84a   : > { %v1911_v21 = vrot.slane %v1900_v37, 4  ;;  %2134 = vmatprep.subr.bf16.mxu0 %v2753_v55  ;;  %v2755_v13 = vcombine.high %v1866_v38, %v1868_v10  ;;  %v2754_v59 = vcombine.low %v1866_v38, %v1868_v10 }
 0x84c   : > { %v1917_v57 = vsel %vm4727_vm12, %v1911_v21, %v1912_v20  ;;  %v1906_v24 = vpop.permute.xlu0 %1905 }
 0x84d   : > { %v1918_v61 = vsel %vm820_vm9, %v1900_v37, %v1917_v57  ;;  %v1914_v15 = vrot.slane %v1906_v24, 4  ;;  %v1904_v25 = vpop.permute.xlu1 %1903  ;;  %2135 = vmatpush1.bf16.msra.mxu0 %v2752_v22 }
 0x84e   : > { %v1913_v39 = vrot.slane %v1904_v25, 4  ;;  %2136 = vmatprep.subr.bf16.mxu0 %v2755_v13 }
 0x850   : > { %v1919_v44 = vsel %vm4728_vm14, %v1913_v39, %v1914_v15  ;;  %v1910_v40 = vpop.permute.xlu0 %1909 }
 0x851   : > { %v1920_v27 = vsel %vm820_vm9, %v1904_v25, %v1919_v44  ;;  %v1916_v47 = vrot.slane %v1910_v40, 4  ;;  %v1908_v28 = vpop.permute.xlu1 %1907  ;;  %2137 = vmatpush1.bf16.msra.mxu0 %v2754_v59 }
 0x852   : > { %v1915_v23 = vrot.slane %v1908_v28, 4  ;;  %v2757_v42 = vcombine.high %v1918_v61, %v1920_v27  ;;  %v2756_v36 = vcombine.low %v1918_v61, %v1920_v27 }
 0x854   : > { %v1921_v45 = vsel %vm4729_vm5, %v1915_v23, %v1916_v47  ;;  %2138 = vmatprep.subr.bf16.mxu0 %v2757_v42  ;;  %vm4740_vm5 = vcmask 908288  }
 0x855   : > { %v1922_v18 = vsel %vm820_vm9, %v1908_v28, %v1921_v45  ;;  %2139 = vmatpush1.bf16.msra.mxu0 %v2756_v36 }
 0x856   : > { %v2759_v35 = vcombine.high %v1922_v18, %v1922_v18  ;;  %v2758_v6 = vcombine.low %v1922_v18, %v1922_v18 }
 0x858   : > { %2760 = vmatprep.subr.msk.bf16.mxu0 %vm4730_vm7, %v2759_v35  ;;  %v2109_v29 = vsel %vm4731_vm10, %v2758_v6, 0  ;;  %vm4742_vm10 = vcmask 891904  }
 0x859   : > { %2141 = vmatpush1.bf16.msra.mxu0 %v2109_v29 }
 0x85c   : > { %2147 = vmatmul.mubr.bf16.vlgmr.msra.gmra.mrb[0].mxu0 %v2730_v30 }
 0x862   : > { %v1961_v32 = vpop.permute.xlu1 %1960 }
 0x92f   : > { %v2148_v33 = vpop.f32.mrb[0].mxu0 }
 0x930   : > { %v2149_v50 = vadd.f32 %v2148_v33, %v1961_v32  ;;  %v2150_v12 = vpop.f32.mrb[1].mxu0 }
 0x931   : > { %v2151_v16 = vadd.f32 %v2150_v12, %v1961_v32  ;;  %v2152_v52 = vpop.f32.mrb[2].mxu0 }
 0x932   : > { %v2155_v53 = vmax.f32 %v2149_v50, 0.0  ;;  %v2153_v58 = vpop.f32.mrb[3].mxu0 }
 0x933   : > { %v2156_v38 = vmax.f32 %v2151_v16, 0.0 }
 0x935   : > { %v2796_v5 = vpack.c.bf16 %v2156_v38, %v2155_v53 }
 0x937   : > { %2164 = vrot.lane.b32.xlu0 %v2796_v5, %s3355_s21  ;;  %s2797_s21 = sshll.u32 %s3468_s20, 5 }
 0x9a9   : > { %v2165_v49 = vpop.permute.xlu0 %2164 }
 0x9aa   : > { %v2166_v60 = vrot.slane %v2165_v49, 4 }
 0x9ac   : > { %v2167_v62 = vsel %vm4732_vm13, %v2166_v60, %v2165_v49  ;;  %2171 = vst.msk [vmem:[#allocation2 + $0x8] sm:$0xf] %vm4733_vm6, %v2166_v60 }
 0x9ad   : > { %2170 = vst.msk [vmem:[#allocation2] sm:$0xff] %vm4006_vm3, %v2167_v62  ;;  %vm4734_vm3 = vmmov %vm4724_vm2  ;;  %vm4735_vm2 = vcmask 900096  }
 0x9ae   : > { %vm4736_vm4 = vmmov %vm4734_vm3 }
 0x9af   : > { %vm4738_vm12 = vmmov %vm4734_vm3 }
 0x9b0   : > { %vm4739_vm14 = vmmov %vm4734_vm3 }
 0x9b1   : > { %vm4741_vm7 = vmmov %vm4734_vm3 }
 0x9b3   : > { %v2189_v11 = vld [vmem:[#allocation2 + $0x8] sm:$0xf] }
 0x9b4   : > { %2194 = vrot.lane.b32.xlu0 %v2189_v11, %s4678_s11  ;;  %v2188_v43 = vld [vmem:[#allocation2] sm:$0xff]  ;;  %v2235_v0 = vld [vmem:[#allocation2 + $0x8] sm:$0xf] }
 0x9b5   : > { %2192 = vrot.lane.b32.xlu1 %v2188_v43, %s4678_s11  ;;  %v2281_v8 = vld [vmem:[#allocation2 + $0x8] sm:$0xf]  ;;  %v2174_v19 = vmul.bf16 %v2188_v43, %v4119_v34  ;;  %v2204_v10 = vmul.bf16 %v2188_v43, %v4132_v7 }
 0x9b6   : > { %v2173_v9 = vld [vmem:[#allocation2 + $0x8] sm:$0xf] }
 0x9b7   : > { %v2175_v48 = vmul.bf16 %v2173_v9, %v4113_v31  ;;  %v2203_v63 = vld [vmem:[#allocation2 + $0x8] sm:$0xf]  ;;  %v2220_v31 = vmul.bf16 %v2188_v43, %v4144_v51 }
 0x9b8   : > { %2240 = vrot.lane.b32.xlu0 %v2235_v0, %s3363_s3  ;;  %v2205_v55 = vmul.bf16 %v2203_v63, %v4126_v41  ;;  %v2219_v20 = vld [vmem:[#allocation2 + $0x8] sm:$0xf]  ;;  %v2250_v41 = vmul.bf16 %v2188_v43, %v4188_v17  ;;  %v2320_v17 = vld [vmem:[#allocation4] sm:$0x1] }
 0x9b9   : > { %2238 = vrot.lane.b32.xlu1 %v2188_v43, %s3363_s3  ;;  %v2221_v37 = vmul.bf16 %v2219_v20, %v4134_v46  ;;  %v2249_v21 = vld [vmem:[#allocation2 + $0x8] sm:$0xf]  ;;  %v2266_v46 = vmul.bf16 %v2188_v43, %v4210_v26 }
 0x9ba   : > { %v2251_v34 = vmul.bf16 %v2249_v21, %v4182_v14  ;;  %v2265_v22 = vld [vmem:[#allocation2 + $0x8] sm:$0xf]  ;;  %v2296_v14 = vmul.bf16 %v2188_v43, %v4254_v56 }
 0x9bb   : > { %v2267_v7 = vmul.bf16 %v2265_v22, %v4201_v2  ;;  %v2295_v57 = vld [vmem:[#allocation2 + $0x8] sm:$0xf] }
 0x9bc   : > { %2286 = vrot.lane.b32.xlu0 %v2281_v8, %s4686_s1  ;;  %v2297_v51 = vmul.bf16 %v2295_v57, %v4248_v54 }
 0x9bd   : > { %2284 = vrot.lane.b32.xlu1 %v2188_v43, %s4686_s1 }
 0x9c0   : > { %2180 = vrot.lane.b32.xlu0 %v2175_v48, %s4676_s25 }
 0x9c1   : > { %2178 = vrot.lane.b32.xlu1 %v2174_v19, %s4676_s25  ;;  %s4750_s25 = sld [smem:[#allocation29_spill]] }
 0x9c4   : > { %2210 = vrot.lane.b32.xlu0 %v2205_v55, %s4680_s19 }
 0x9c5   : > { %2208 = vrot.lane.b32.xlu1 %v2204_v10, %s4680_s19  ;;  %s2514_s19 = scalar_lea.sflag [#allocation7], %s3736_s23 }
 0x9c7   : > { %s4475_s11 = scalar_lea.hbm %s4750_s25, %s2797_s21 }
 0x9c8   : > { %2226 = vrot.lane.b32.xlu0 %v2221_v37, %s4681_s9 }
 0x9c9   : > { %2224 = vrot.lane.b32.xlu1 %v2220_v31, %s4681_s9  ;;  %s3388_s9 = smov [#allocation20]  }
 0x9cc   : > { %2256 = vrot.lane.b32.xlu0 %v2251_v34, %s4683_s26 }
 0x9cd   : > { %2254 = vrot.lane.b32.xlu1 %v2250_v41, %s4683_s26  ;;  %s3261_s26 = sshll.u32 %s3388_s9, 4  ;;  %s3262_s26 = int_to_ptr.vmem [resolvable:$false] %s3261_s26 }
 0x9d0   : > { %2272 = vrot.lane.b32.xlu0 %v2267_v7, %s4685_s29 }
 0x9d1   : > { %2270 = vrot.lane.b32.xlu1 %v2266_v46, %s4685_s29  ;;  %s3263_s29 = scalar_lea.vmem %s3262_s26, 64 }
 0x9d4   : > { %2302 = vrot.lane.b32.xlu0 %v2297_v51, %s4688_s13 }
 0x9d5   : > { %2300 = vrot.lane.b32.xlu1 %v2296_v14, %s4688_s13 }
 0x9d9   : > { %2323 = vperm.xlu1 %2983, %v2320_v17  }
 0xa26   : > { %v2195_v24 = vpop.permute.xlu0 %2194 }
 0xa27   : > { %v2197_v13 = vrot.slane %v2195_v24, 4  ;;  %v2193_v2 = vpop.permute.xlu1 %2192 }
 0xa28   : > { %v2196_v61 = vrot.slane %v2193_v2, 4 }
 0xa2a   : > { %v2198_v26 = vsel %vm4734_vm3, %v2196_v61, %v2197_v13  ;;  %v2241_v15 = vpop.permute.xlu0 %2240 }
 0xa2b   : > { %v2199_v25 = vsel %vm4735_vm2, %v2193_v2, %v2198_v26  ;;  %v2243_v39 = vrot.slane %v2241_v15, 4  ;;  %v2239_v59 = vpop.permute.xlu1 %2238  ;;  %v2310_v26 = vld [vmem:[#allocation19] sm:$0x1] }
 0xa2c   : > { %2201 = vst [vmem:[#allocation3 + $0x8] sm:$0xff] %v2199_v25  ;;  %v2242_v54 = vrot.slane %v2239_v59, 4  ;;  %v4452_v15 = vld [vmem:[%s3740_s24 + $0x4] ss:$8 sm:$0x3] }
 0xa2e   : > { %v2244_v56 = vsel %vm4736_vm4, %v2242_v54, %v2243_v39  ;;  %v2287_v44 = vpop.permute.xlu0 %2286  ;;  %v2775_v39 = vld [vmem:[%s3740_s24 + $0x3] ss:$8 sm:$0x3]  ;;  %v2778_v54 = vld [vmem:[%s3740_s24 + $0x1] ss:$8 sm:$0x3] }
 0xa2f   : > { %v2245_v40 = vsel %vm4737_vm15, %v2239_v59, %v2244_v56  ;;  %v2289_v27 = vrot.slane %v2287_v44, 4  ;;  %v2285_v47 = vpop.permute.xlu1 %2284  ;;  %v2430_v59 = vld [vmem:[%s3740_s24] ss:$8 sm:$0x3]  ;;  %v2434_v56 = vsub.f32 1.0, %v4452_v15 }
 0xa30   : > { %v2288_v28 = vrot.slane %v2285_v47, 4  ;;  %v2441_v44 = vsub.f32 %v2430_v59, %v2775_v39 }
 0xa32   : > { %v2290_v23 = vsel %vm4738_vm12, %v2288_v28, %v2289_v27  ;;  %v2181_v42 = vpop.permute.xlu0 %2180  ;;  %v2777_v27 = vld [vmem:[%s3740_s24 + $0x5] ss:$8 sm:$0x3]  ;;  %v2459_v28 = vsub.f32 %v2778_v54, %v2775_v39 }
 0xa33   : > { %v2291_v36 = vsel %vm789_vm1, %v2285_v47, %v2290_v23  ;;  %v2183_v45 = vrot.slane %v2181_v42, 4  ;;  %v2179_v18 = vpop.permute.xlu1 %2178  ;;  %vm4743_vm1 = vmmov %vm4734_vm3  ;;  %v2779_v47 = vld [vmem:[%s3740_s24 + $0x6] ss:$8 sm:$0x3]  ;;  %v2433_v42 = vmul.f32 %v2777_v27, %v4452_v15 }
 0xa34   : > { %v2182_v35 = vrot.slane %v2179_v18, 4  ;;  %vm4744_vm13 = vmmov %vm4743_vm1  ;;  %v2780_v23 = vld [vmem:[%s3740_s24 + $0x2] ss:$8 sm:$0x3] }
 0xa35   : > { %vm4745_vm6 = vmmov %vm4743_vm1 }
 0xa36   : > { %v2184_v6 = vsel %vm4739_vm14, %v2182_v35, %v2183_v45  ;;  %v2211_v29 = vpop.permute.xlu0 %2210  ;;  %v2781_v35 = vld [vmem:[%s3740_s24 + $0x7] ss:$8 sm:$0x3]  ;;  %s2698_s24 = sshll.u32 %s3736_s23, 1 }
 0xa37   : > { %v2185_v30 = vsel %vm4740_vm5, %v2179_v18, %v2184_v6  ;;  %v2213_v32 = vrot.slane %v2211_v29, 4  ;;  %v2209_v33 = vpop.permute.xlu1 %2208  ;;  %v2453_v18 = vmul.f32 %v2779_v47, %v4452_v15  ;;  %v2477_v29 = vsub.f32 %v2780_v23, %v2775_v39  ;;  %s481_s3 = scalar_lea.vmem [#allocation20], %s2698_s24 }
 0xa38   : > { %2187 = vst [vmem:[#allocation3] sm:$0xff] %v2185_v30  ;;  %v2212_v50 = vrot.slane %v2209_v33, 4  ;;  %v2763_v12 = vcombine.low %v2185_v30, %v2199_v25  ;;  %v2764_v16 = vcombine.high %v2185_v30, %v2199_v25  ;;  %v2428_v25 = vmax.f32 %v4452_v15, 0.05  ;;  %s2528_s28 = sshll.u32 %s481_s3, 4  ;;  %s4477_s28 = int_to_ptr.vmem [resolvable:$true] %s2528_s28 }
 0xa39   : > { %v2471_v30 = vmul.f32 %v2781_v35, %v4452_v15  ;;  %s3257_s20 = scalar_lea.vmem %s4477_s28, 32  ;;  %p3264_p3 = scmp.lt.s32.totalorder %s4477_s28, %s3262_s26 }
 0xa3a   : > { %v2214_v52 = vsel %vm4741_vm7, %v2212_v50, %v2213_v32  ;;  %v2227_v53 = vpop.permute.xlu0 %2226  ;;  %2384 = vmatprep.subr.bf16.mxu1 %v2764_v16  ;;  %3001 = vrcp.f32 %v2428_v25  ;;  %p3258_p5 = scmp.ne.s32.totalorder %s4477_s28, %s3257_s20  ;;  %p3265_p9 = scmp.lt.s32.totalorder %s3263_s29, %s3257_s20 }
 0xa3b   : > { %v2215_v58 = vsel %vm4742_vm10, %v2209_v33, %v2214_v52  ;;  %v2229_v38 = vrot.slane %v2227_v53, 4  ;;  %v2225_v5 = vpop.permute.xlu1 %2224  ;;  %2385 = vmatpush1.bf16.msra.mxu1 %v2763_v12 }
 0xa3c   : > { %v2228_v49 = vrot.slane %v2225_v5, 4  ;;  %p3259_p4 = pnand %p3258_p5, %p4751_p7  ;;  %p3266_p13 = por %p3265_p9, %p3264_p3 }
 0xa3e   : > { %v2230_v60 = vsel %vm4743_vm1, %v2228_v49, %v2229_v38  ;;  %v2257_v62 = vpop.permute.xlu0 %2256  ;;  %v2456_v38 = vsub.f32 %v2779_v47, %v2775_v39  ;;  %p3260_p1 = pneg %p3259_p4 }
 0xa3f   : > { %v2231_v11 = vsel %vm663_vm11, %v2225_v5, %v2230_v60  ;;  %v2259_v43 = vrot.slane %v2257_v62, 4  ;;  %v2255_v0 = vpop.permute.xlu1 %2254  ;;  %vm4746_vm11 = vcmask 646144  }
 0xa40   : > { %v2258_v8 = vrot.slane %v2255_v0, 4  ;;  %v2765_v9 = vcombine.low %v2215_v58, %v2231_v11  ;;  %v2766_v48 = vcombine.high %v2215_v58, %v2231_v11  ;;  %v2438_v58 = vsub.f32 %v2777_v27, %v2775_v39  ;;  %p3267_p0 = pnand %p3266_p13, %p3260_p1 }
 0xa42   : > { %v2260_v19 = vsel %vm4744_vm13, %v2258_v8, %v2259_v43  ;;  %v2273_v63 = vpop.permute.xlu0 %2272  ;;  %2386 = vmatprep.subr.bf16.mxu1 %v2766_v48 }
 0xa43   : > { %v2261_v55 = vsel %vm726_vm0, %v2255_v0, %v2260_v19  ;;  %v2275_v10 = vrot.slane %v2273_v63, 4  ;;  %v2271_v20 = vpop.permute.xlu1 %2270  ;;  %2387 = vmatpush1.bf16.msra.mxu1 %v2765_v9  ;;  %vm4747_vm0 = vmmov %vm4743_vm1 }
 0xa44   : > { %v2274_v37 = vrot.slane %v2271_v20, 4  ;;  %v2767_v31 = vcombine.low %v2245_v40, %v2261_v55  ;;  %v2768_v21 = vcombine.high %v2245_v40, %v2261_v55  ;;  %vm4748_vm3 = vmmov %vm4747_vm0  ;;  %v3002_v40 = vpop.eup %3001  ;;  %v2474_v55 = vsub.f32 %v2781_v35, %v2775_v39 }
 0xa45   : > { %vm4749_vm2 = vmmov %vm4747_vm0  ;;  %v2442_v45 = vmul.f32 %v3002_v40, %v2441_v44  ;;  %v2460_v6 = vmul.f32 %v3002_v40, %v2459_v28  ;;  %v2478_v53 = vmul.f32 %v3002_v40, %v2477_v29 }
 0xa46   : > { %v2276_v34 = vsel %vm4745_vm6, %v2274_v37, %v2275_v10  ;;  %v2303_v41 = vpop.permute.xlu0 %2302  ;;  %2388 = vmatprep.subr.bf16.mxu1 %v2768_v21 }
 0xa47   : > { %v2277_v22 = vsel %vm4746_vm11, %v2271_v20, %v2276_v34  ;;  %v2305_v7 = vrot.slane %v2303_v41, 4  ;;  %v2301_v46 = vpop.permute.xlu1 %2300  ;;  %2389 = vmatpush1.bf16.msra.mxu1 %v2767_v31  ;;  %v2443_v33 = vadd.f32 %v2775_v39, %v2442_v45  ;;  %v2445_v50 = vmul.f32 %v3002_v40, %v2442_v45 }
 0xa48   : > { %v2304_v57 = vrot.slane %v2301_v46, 4  ;;  %v2769_v51 = vcombine.low %v2277_v22, %v2291_v36  ;;  %v2770_v14 = vcombine.high %v2277_v22, %v2291_v36  ;;  %v2435_v36 = vmul.f32 %v2775_v39, %v2434_v56 }
 0xa49   : > { %v2461_v16 = vadd.f32 %v2775_v39, %v2460_v6  ;;  %v2463_v52 = vmul.f32 %v3002_v40, %v2460_v6  ;;  %v2444_v60 = vsub.f32 %v2443_v33, %v2777_v27  ;;  %v2446_v62 = vsub.f32 0.0, %v2445_v50 }
 0xa4a   : > { %v2306_v17 = vsel %vm4747_vm0, %v2304_v57, %v2305_v7  ;;  %2390 = vmatprep.subr.bf16.mxu1 %v2770_v14  ;;  %v2436_v32 = vadd.f32 %v2435_v36, %v2433_v42  ;;  %v2454_v12 = vadd.f32 %v2453_v18, %v2435_v36  ;;  %v2472_v5 = vadd.f32 %v2471_v30, %v2435_v36 }
 0xa4b   : > { %v2307_v24 = vsel %vm820_vm9, %v2301_v46, %v2306_v17  ;;  %2391 = vmatpush1.bf16.msra.mxu1 %v2769_v51  ;;  %v2462_v43 = vsub.f32 %v2461_v16, %v2779_v47  ;;  %v2464_v0 = vsub.f32 0.0, %v2463_v52  ;;  %v2479_v8 = vadd.f32 %v2775_v39, %v2478_v53 }
 0xa4c   : > { %v2772_v13 = vcombine.high %v2307_v24, %v2307_v24  ;;  %v2771_v2 = vcombine.low %v2307_v24, %v2307_v24  ;;  %v2437_v49 = vsub.f32 %v2436_v32, %v2430_v59  ;;  %v2455_v11 = vsub.f32 %v2454_v12, %v2778_v54 }
 0xa4d   : > { %v2481_v9 = vmul.f32 %v3002_v40, %v2478_v53  ;;  %v2447_v19 = vmul.f32 %v2446_v62, %v2444_v60  ;;  %v2473_v63 = vsub.f32 %v2472_v5, %v2780_v23  ;;  %v2465_v20 = vmul.f32 %v2464_v0, %v2462_v43 }
 0xa4e   : > { %2773 = vmatprep.subr.msk.bf16.mxu1 %vm4748_vm3, %v2772_v13  ;;  %v2379_v61 = vsel %vm4749_vm2, %v2771_v2, 0  ;;  %v2439_v48 = vmul.f32 %v2438_v58, %v2437_v49  ;;  %v2457_v10 = vmul.f32 %v2456_v38, %v2455_v11  ;;  %v2480_v37 = vsub.f32 %v2479_v8, %v2781_v35 }
 0xa4f   : > { %2393 = vmatpush1.bf16.msra.mxu1 %v2379_v61  ;;  %v2482_v31 = vsub.f32 0.0, %v2481_v9  ;;  %v2475_v21 = vmul.f32 %v2474_v55, %v2473_v63  ;;  %v2466_v41 = vadd.f32 %v2465_v20, %v2447_v19  ;;  %v3387_v7 = vmov 1966171168  }
 0xa50   : > { %v2458_v34 = vadd.f32 %v2457_v10, %v2439_v48  ;;  %v2491_v46 = vunpack.c.l.s4 %v3387_v7  ;;  %vm2510_vm9 = vcmp.lt.s32.totalorder %v499_v1, 256 }
 0xa51   : > { %v2483_v22 = vmul.f32 %v2482_v31, %v2480_v37 }
 0xa52   : > { %2774 = vmatmul.mubr.msk.bf16.vlgmr.msra.gmra.mrb[8].mxu1 %vm1368_vm8, %v2310_v26  ;;  %v2476_v51 = vadd.f32 %v2475_v21, %v2458_v34  ;;  %v2492_v17 = vunpack.c.0.s8 %v2491_v46 }
 0xa53   : > { %v2484_v14 = vadd.f32 %v2483_v22, %v2466_v41 }
 0xa54   : > { %v2495_v39 = vsub.s32 %v2492_v17, %v3771_v3 }
 0xa55   : > { %v2485_v25 = vadd.f32 %v2484_v14, %v2476_v51 }
 0xa57   : > { %v2486_v44 = vmul.f32 0.33333334, %v2485_v25 }
 0xa58   : > { %v2324_v57 = vpop.permute.xlu1 %2323 }
 0xa59   : > { %v2329_v24 = vrot.slane %v2324_v57, %v3778_v4 }
 0xb25   : > { %v2418_v13 = vpop.f32.mrb[8].mxu1 }
 0xb26   : > { %v2419_v2 = vadd.f32 %v2418_v13, %v2329_v24  ;;  %v2420_v61 = vpop.f32.mrb[9].mxu1 }
 0xb27   : > { %v2421_v26 = vadd.f32 %v2420_v61, %v2329_v24  ;;  %v2422_v59 = vpop.f32.mrb[10].mxu1 }
 0xb28   : > { %v2423_v54 = vpop.f32.mrb[11].mxu1 }
 0xb29   : > { %v2489_v56 = vcombine.low %v2419_v2, %v2421_v26 }
 0xb2b   : > { %v2496_v40 = vrot.slane %v2489_v56, %v2495_v39 }
 0xb2d   : > { %v2503_v27 = vrot.slane %v2496_v40, %v2495_v39 }
 0xb2f   : > { %v2505_v47 = vadd.f32 %v2503_v27, %v2486_v44 }
 0xb31   : > { %v2506_v4 = vmul.f32 0.1, %v2505_v47 }
 0xb33   : > { %v2507_v28 = vsub.f32 %v4452_v15, %v2506_v4 }
 0xb35   : > { %2512 = vst.msk [vmem:[%s481_s3] sm:$0x3] %vm2510_vm9, %v2507_v28 }
 0xb36   : > { %3270 = shalt.err (!%p3267_p0)
}
 0xb37   : > { %s3271_s23 = scalar_lea.hbm %s4475_s11, 32  ;;  %s3275_s24 = scalar_lea.hbm %s4750_s25, 64 }
 0xb38   : > { %p3272_p2 = scmp.ne.s32.totalorder %s4475_s11, %s3271_s23  ;;  %p3276_p11 = scmp.lt.u32.totalorder %s4475_s11, %s4750_s25 }
 0xb39   : > { %p3277_p6 = scmp.lt.u32.totalorder %s3275_s24, %s3271_s23  ;;  %p3279_p5 = scmp.lt.u32.totalorder %s3271_s23, %s4475_s11 }
 0xb3a   : > { %p3273_p8 = pnand %p3272_p2, %p4751_p7 }
 0xb3b   : > { %p3278_p12 = por %p3277_p6, %p3276_p11 }
 0xb3c   : > { %p3274_p10 = pneg %p3273_p8 }
 0xb3d   : > { %p3280_p4 = por %p3279_p5, %p3278_p12 }
 0xb3f   : > { %p3281_p1 = pnand %p3280_p4, %p3274_p10 }
 0xb41   : > { %3284 = shalt.err (!%p3281_p1)
}
 0xb42   : > { %2832 = dma.vmem_to_hbm [thread:$0]  (%p4751_p7), %s4477_s28, 32, %s4475_s11, %s2514_s19  }
 0xb43 PF: > { %s2540_s14 = sand.u32 1, %s3327_s15   ;;  %p4752_p3 = scmp.ne.s32.totalorder %s4587_s27, 0 }
 0xb44   : > { %p4753_p9 = scmp.ge.s32.totalorder %s3339_s18, 2  ;;  %s2541_s10 = scalar_lea.sflag [#allocation7], %s2540_s14 }
 0xb46   : > { %p2864_p13 = pnand %p4753_p9, %p4752_p3 }
 0xb48   : > { %3322 = dma.done.wait (!%p2864_p13), %s2541_s10, 32  }
 0xb49   : > { %3324 = vsyncadd (!%p2864_p13), %s2541_s10, 4294967264  ;;  %p29_p0 = scmp.ge.s32.totalorder %s3660_s12, 4   ;;  %s4754_s15 = smov %s3331_s16 }
 0xb4a   : > { %s4755_s16 = smov %s3335_s17  ;;  %s4756_s17 = smov %s3671_s22 }
 0xb4b   : > { %s4757_s18 = smov %s3660_s12  ;;  %31 = sbr.rel (!%p29_p0) target bundleno = 13 (0xd), region = 144 }
 0xb52   :  { %2546 = vsyncpa [#allocation6], 1 }
 0xb53   :  { %2548 = vsyncpa [#allocation6 + $0x1], 1 }
 0xb54   :  { %2549 = vsyncpa [#allocation9], 1 }
 0xb55   :  { %2550 = vsyncpa [#allocation12], 1 }
 0xb56   :  { %2551 = vsyncpa [#allocation15], 1 }
 0xb57   :  { %2552 = vsyncpa [#allocation18], 1 }
 0xb58   :  { %2553 = vsyncpa [#allocation7], 1 }
 0xb59   :  { %2555 = vsyncpa [#allocation7 + $0x1], 1 }

</bundles_post_ra>
